<compile_context>
chip_gen: v7x
topology: tpu7x:2x2x1
jax: 0.10.0
libtpu: 0.0.40
codegen_flags: <defaults>
</compile_context>

<pallas_src>
import numpy as np
import jax
import jax.numpy as jnp
from jax.experimental import pallas as pl
from jax.experimental.pallas import tpu as pltpu


# --------------------- host-side 1-D linear operators (separable factors) ----------------

def bilinear_matrix(out_size, in_size):
    """1-D factor of F.interpolate(mode='bilinear', align_corners=False) as a matrix."""
    d = np.arange(out_size, dtype=np.float64)
    src = (d + 0.5) * (in_size / out_size) - 0.5
    src = np.maximum(src, 0.0)
    i0 = np.minimum(np.floor(src).astype(np.int64), in_size - 1)
    i1 = np.minimum(i0 + 1, in_size - 1)
    lam = src - i0
    m = np.zeros((out_size, in_size), dtype=np.float32)
    m[np.arange(out_size), i0] += (1.0 - lam).astype(np.float32)
    m[np.arange(out_size), i1] += lam.astype(np.float32)
    return m


def adaptive_avg_pool_matrix(out_size, in_size):
    """1-D factor of nn.AdaptiveAvgPool2d as a matrix (exact PyTorch bin boundaries)."""
    m = np.zeros((out_size, in_size), dtype=np.float32)
    for o in range(out_size):
        start = (o * in_size) // out_size
        end = -(-((o + 1) * in_size) // out_size)  # ceil
        m[o, start:end] = 1.0 / (end - start)
    return m


# ------------------------------- fused kernel (per grid step) ----------------------------
#
# grid = (N, CT).  Per batch element b (channels-first, lanes = flattened spatial dims):
#   ct == 0:  x               (Cin, HW)
#             pooled_all      = x @ Pt                              (Cin, Spad=128)
#             feat            = relu(W_stack @ pooled_all + sh)*M   (nb*Cmid, Spad)
#             G               = WL_cat @ feat                       (K, Spad)
#             logits (scratch)= WLx @ x + b + G @ Ut                (K, HW)
#   every ct: up_tile         = logits @ KronT[:, tile_ct]          (K, TILE)  lane-dense
#             out_tile        = up_tile - logsumexp_over_K(up_tile)            (log_softmax)

def _fused_kernel(x_ref, pt_ref, ut_ref, w_ref, mask_ref, sh_ref,
                  wl_ref, wlx_ref, b_ref, kron_ref, o_ref, logits_sc):
    ct = pl.program_id(1)

    @pl.when(ct == 0)
    def _():
        x = x_ref[...]                                                        # (Cin, HW)
        pooled = jnp.dot(x, pt_ref[...], preferred_element_type=jnp.float32)  # (Cin, Spad)
        feat = jnp.maximum(
            jnp.dot(w_ref[...], pooled, preferred_element_type=jnp.float32)
            + sh_ref[...], 0.0) * mask_ref[...]                               # (nb*Cmid, Spad)
        g = jnp.dot(wl_ref[...], feat, preferred_element_type=jnp.float32)    # (K, Spad)
        logits_sc[...] = (
            jnp.dot(wlx_ref[...], x, preferred_element_type=jnp.float32)
            + b_ref[...]
            + jnp.dot(g, ut_ref[...], preferred_element_type=jnp.float32))    # (K, HW)

    up = jnp.dot(logits_sc[...], kron_ref[...],
                 preferred_element_type=jnp.float32)                          # (K, TILE)
    m = jnp.max(up, axis=0, keepdims=True)
    lse = m + jnp.log(jnp.sum(jnp.exp(up - m), axis=0, keepdims=True))
    o_ref[...] = (up - lse).astype(o_ref.dtype)


def _num_col_tiles(howo, preferred=(4, 2)):
    for ct in preferred:
        if howo % ct == 0 and (howo // ct) % 128 == 0:
            return ct
    return 1


def _fused_call(x_t, p, num_class, howo):
    n, cin, hw = x_t.shape
    spad = p["pt_all"].shape[1]
    nbm = p["w_stack"].shape[0]
    ct = _num_col_tiles(howo)
    tile = howo // ct

    def const(shape):
        # Constant (weight) operands: same block index every step -> DMA'd once, revisited.
        # (pipeline_mode=pl.Buffered(1) would also halve their VMEM copies; omitted because
        #  the whole working set is ~6 MiB here, far under every generation's limit.)
        return pl.BlockSpec(shape, lambda b, c: (0,) * len(shape))

    grid_spec = pltpu.PrefetchScalarGridSpec(
        num_scalar_prefetch=0,
        grid=(n, ct),
        in_specs=[
            pl.BlockSpec((None, cin, hw), lambda b, c: (b, 0, 0)),   # x, per batch element
            const((hw, spad)),                                       # pooling operator Pt
            const((spad, hw)),                                       # branch upsample Ut
            const((nbm, cin)),                                       # stacked conv+BN weights
            const((nbm, spad)),                                      # branch block mask
            const((nbm, 1)),                                         # stacked BN shifts
            const((num_class, nbm)),                                 # conv_last (branch part)
            const((num_class, cin)),                                 # conv_last (direct part)
            const((num_class, 1)),                                   # conv_last bias
            pl.BlockSpec((hw, tile), lambda b, c: (0, c)),           # x8 Kron, column tiles
        ],
        out_specs=pl.BlockSpec((None, num_class, tile), lambda b, c: (b, 0, c)),
        scratch_shapes=[pltpu.VMEM((num_class, hw), jnp.float32)],   # per-batch logits
    )
    return pl.pallas_call(
        _fused_kernel,
        out_shape=jax.ShapeDtypeStruct((n, num_class, howo), jnp.float32),
        grid_spec=grid_spec,
        compiler_params=pltpu.CompilerParams(
            dimension_semantics=("parallel", "arbitrary")),
    )(x_t, p["pt_all"], p["ut_all"], p["w_stack"], p["mask"], p["sh_stack"],
      p["wl_cat"], p["wlx_t"], p["b_t"], p["kron_t"])


# ------------------------------------- model wrapper -------------------------------------

def init_params(key, num_class, fc_dim, mid_dim, pool_scales, h, w, train_scale):
    hw = h * w
    eps = 1e-5
    nb = len(pool_scales)
    keys = jax.random.split(key, 5 * nb + 2)
    ki = 0
    raw = {"ppm": []}
    for _ in pool_scales:
        wconv = 0.05 * jax.random.normal(keys[ki], (fc_dim, mid_dim), jnp.float32); ki += 1
        gamma = 1.0 + 0.1 * jax.random.normal(keys[ki], (mid_dim,), jnp.float32); ki += 1
        beta = 0.1 * jax.random.normal(keys[ki], (mid_dim,), jnp.float32); ki += 1
        rmean = 0.1 * jax.random.normal(keys[ki], (mid_dim,), jnp.float32); ki += 1
        rvar = 1.0 + 0.1 * jax.random.uniform(keys[ki], (mid_dim,), jnp.float32); ki += 1
        raw["ppm"].append(dict(w=wconv, gamma=gamma, beta=beta, rmean=rmean, rvar=rvar))
    ctot = fc_dim + nb * mid_dim
    raw["w_last"] = 0.02 * jax.random.normal(keys[ki], (ctot, num_class), jnp.float32); ki += 1
    raw["b_last"] = 0.01 * jax.random.normal(keys[ki], (num_class,), jnp.float32); ki += 1

    # ---- fused / transposed parameters for the Pallas kernel ----
    s2s = [s * s for s in pool_scales]
    s_tot = sum(s2s)
    spad = max(128, -(-s_tot // 128) * 128)          # pooled columns padded to 128 lanes
    offsets = np.cumsum([0] + s2s[:-1]).tolist()

    pt_all = np.zeros((hw, spad), np.float32)
    ut_all = np.zeros((spad, hw), np.float32)
    mask = np.zeros((nb * mid_dim, spad), np.float32)
    w_rows, sh_rows, wl_cols = [], [], []
    w_last_np = np.asarray(raw["w_last"])
    for si, s in enumerate(pool_scales):
        s2, off = s2s[si], offsets[si]
        p2 = np.kron(adaptive_avg_pool_matrix(s, h), adaptive_avg_pool_matrix(s, w))  # (s2, HW)
        u2 = np.kron(bilinear_matrix(h, s), bilinear_matrix(w, s))                    # (HW, s2)
        pt_all[:, off:off + s2] = p2.T
        ut_all[off:off + s2, :] = u2.T
        mask[si * mid_dim:(si + 1) * mid_dim, off:off + s2] = 1.0    # valid cols of own branch

        p = raw["ppm"][si]
        scale = np.asarray(p["gamma"]) / np.sqrt(np.asarray(p["rvar"]) + eps)
        shift = np.asarray(p["beta"]) - np.asarray(p["rmean"]) * scale
        w_rows.append((np.asarray(p["w"]) * scale[None, :]).T)       # BN folded, (mid, fc_dim)
        sh_rows.append(shift)                                        # (mid,)
        wl = w_last_np[fc_dim + si * mid_dim: fc_dim + (si + 1) * mid_dim]  # (mid, K)
        wl_cols.append(wl.T)                                         # (K, mid)

    ho, wo = h * train_scale, w * train_scale
    kron_t = np.kron(bilinear_matrix(ho, h), bilinear_matrix(wo, w)).T.astype(np.float32)

    params = dict(
        pt_all=jnp.asarray(pt_all),                                   # (HW, Spad)
        ut_all=jnp.asarray(ut_all),                                   # (Spad, HW)
        mask=jnp.asarray(mask),                                       # (nb*mid, Spad)
        w_stack=jnp.asarray(np.concatenate(w_rows, axis=0)),          # (nb*mid, fc_dim)
        sh_stack=jnp.asarray(np.concatenate(sh_rows, axis=0))[:, None],  # (nb*mid, 1)
        wl_cat=jnp.asarray(np.concatenate(wl_cols, axis=1)),          # (K, nb*mid)
        wlx_t=jnp.asarray(w_last_np[:fc_dim].T),                      # (K, fc_dim)
        b_t=jnp.asarray(np.asarray(raw["b_last"])[:, None]),          # (K, 1)
        kron_t=jnp.asarray(kron_t),                                   # (HW, HO*WO)
    )
    return params, raw


def ppm_bilinear_forward(conv5_nchw, params, pool_scales, train_scale):
    n, cin, h, w = conv5_nchw.shape
    hw = h * w
    k = params["wlx_t"].shape[0]
    ho, wo = h * train_scale, w * train_scale
    x_t = conv5_nchw.reshape(n, cin, hw)                 # NCHW -> (N, Cin, HW), free reshape
    out = _fused_call(x_t, params, k, ho * wo)           # (N, K, HO*WO), lane-dense stores
    return out.reshape(n, k, ho, wo)                     # NCHW, no transpose needed


# ----------------------------------- pure-JAX reference ----------------------------------

def reference_forward(conv5, raw, pool_scales, train_scale):
    n, cin, h, w = conv5.shape
    eps = 1e-5
    hp = "highest"
    feats = [conv5]
    for si, s in enumerate(pool_scales):
        p = raw["ppm"][si]
        ph = jnp.asarray(adaptive_avg_pool_matrix(s, h))
        pw = jnp.asarray(adaptive_avg_pool_matrix(s, w))
        pooled = jnp.einsum("ph,qw,nchw->ncpq", ph, pw, conv5, precision=hp)
        conv = jnp.einsum("ncpq,cd->ndpq", pooled, p["w"], precision=hp)
        scale = p["gamma"] / jnp.sqrt(p["rvar"] + eps)
        shift = p["beta"] - p["rmean"] * scale
        act = jnp.maximum(conv * scale[None, :, None, None] + shift[None, :, None, None], 0.0)
        uh = jnp.asarray(bilinear_matrix(h, s))
        uw = jnp.asarray(bilinear_matrix(w, s))
        feats.append(jnp.einsum("hp,wq,ndpq->ndhw", uh, uw, act, precision=hp))
    cat = jnp.concatenate(feats, axis=1)
    logits = (jnp.einsum("nchw,ck->nkhw", cat, raw["w_last"], precision=hp)
              + raw["b_last"][None, :, None, None])
    ur = jnp.asarray(bilinear_matrix(h * train_scale, h))
    uc = jnp.asarray(bilinear_matrix(w * train_scale, w))
    up8 = jnp.einsum("oh,pw,nkhw->nkop", ur, uc, logits, precision=hp)
    return jax.nn.log_softmax(up8, axis=1)


# ------------------------------------------ main -----------------------------------------

if __name__ == "__main__":
    # Small shapes consistent with the module (fc_dim/num_class shrunk, PPM width kept at 256).
    N, FC_DIM, H, W = 2, 32, 12, 12
    NUM_CLASS, MID_DIM = 8, 256
    POOL_SCALES = (1, 2, 3, 6)
    TRAIN_SCALE = 8

    key = jax.random.PRNGKey(0)
    kx, kp = jax.random.split(key)
    conv5 = jax.random.normal(kx, (N, FC_DIM, H, W), jnp.float32)   # conv_out[-1], NCHW
    params, raw = init_params(kp, NUM_CLASS, FC_DIM, MID_DIM, POOL_SCALES, H, W, TRAIN_SCALE)

    out = jax.block_until_ready(ppm_bilinear_forward(conv5, params, POOL_SCALES, TRAIN_SCALE))
    assert out.shape == (N, NUM_CLASS, H * TRAIN_SCALE, W * TRAIN_SCALE), out.shape

    ref = jax.block_until_ready(reference_forward(conv5, raw, POOL_SCALES, TRAIN_SCALE))
    max_err = float(jnp.max(jnp.abs(out - ref)))
    assert jnp.allclose(out, ref, atol=1e-3, rtol=1e-3), f"max_err={max_err}"

    print("KERNEL_OK")
</pallas_src>

<mosaic_0001>
module attributes {stable_mosaic.version = 11 : i64} {
  func.func @_fused_kernel(%arg0: i32, %arg1: i32, %arg2: memref<1x32x144xf32, #tpu.memory_space<vmem>>, %arg3: memref<144x128xf32, #tpu.memory_space<vmem>>, %arg4: memref<128x144xf32, #tpu.memory_space<vmem>>, %arg5: memref<1024x32xf32, #tpu.memory_space<vmem>>, %arg6: memref<1024x128xf32, #tpu.memory_space<vmem>>, %arg7: memref<1024x1xf32, #tpu.memory_space<vmem>>, %arg8: memref<8x1024xf32, #tpu.memory_space<vmem>>, %arg9: memref<8x32xf32, #tpu.memory_space<vmem>>, %arg10: memref<8x1xf32, #tpu.memory_space<vmem>>, %arg11: memref<144x2304xf32, #tpu.memory_space<vmem>>, %arg12: memref<1x8x2304xf32, #tpu.memory_space<vmem>>, %arg13: memref<8x144xf32, #tpu.memory_space<vmem>>) attributes {dimension_semantics = [#tpu.dimension_semantics<parallel>, #tpu.dimension_semantics<arbitrary>], iteration_bounds = array<i64: 2, 4>, scalar_prefetch = 0 : i64, scratch_operands = 1 : i64, tpu.core_type = #tpu.core_type<tc>, window_params = [{transform_indices = @transform_0, window_bounds = array<i64: 1, 32, 144>}, {pipeline_mode = #tpu.pipeline_mode<synchronous>, transform_indices = @transform_1, window_bounds = array<i64: 144, 128>}, {pipeline_mode = #tpu.pipeline_mode<synchronous>, transform_indices = @transform_2, window_bounds = array<i64: 128, 144>}, {pipeline_mode = #tpu.pipeline_mode<synchronous>, transform_indices = @transform_3, window_bounds = array<i64: 1024, 32>}, {pipeline_mode = #tpu.pipeline_mode<synchronous>, transform_indices = @transform_4, window_bounds = array<i64: 1024, 128>}, {pipeline_mode = #tpu.pipeline_mode<synchronous>, transform_indices = @transform_5, window_bounds = array<i64: 1024, 1>}, {pipeline_mode = #tpu.pipeline_mode<synchronous>, transform_indices = @transform_6, window_bounds = array<i64: 8, 1024>}, {pipeline_mode = #tpu.pipeline_mode<synchronous>, transform_indices = @transform_7, window_bounds = array<i64: 8, 32>}, {pipeline_mode = #tpu.pipeline_mode<synchronous>, transform_indices = @transform_8, window_bounds = array<i64: 8, 1>}, {transform_indices = @transform_9, window_bounds = array<i64: 144, 2304>}, {transform_indices = @transform_10, window_bounds = array<i64: 1, 8, 2304>}]} {
    %c0_i32 = arith.constant 0 : i32
    %0 = arith.cmpi eq, %arg1, %c0_i32 : i32
    %1 = arith.extui %0 : i1 to i32
    %c0_i32_0 = arith.constant 0 : i32
    %2 = arith.cmpi ne, %1, %c0_i32_0 : i32
    scf.if %2 {
      %c0_9 = arith.constant 0 : index
      %c0_10 = arith.constant 0 : index
      %c0_11 = arith.constant 0 : index
      %20 = vector.load %arg2[%c0_9, %c0_10, %c0_11] : memref<1x32x144xf32, #tpu.memory_space<vmem>>, vector<1x32x144xf32>
      %21 = vector.shape_cast %20 : vector<1x32x144xf32> to vector<32x144xf32>
      %c0_12 = arith.constant 0 : index
      %c0_13 = arith.constant 0 : index
      %22 = vector.load %arg3[%c0_12, %c0_13] : memref<144x128xf32, #tpu.memory_space<vmem>>, vector<144x128xf32>
      %cst_14 = arith.constant dense<0.000000e+00> : vector<32x128xf32>
      %23 = tpu.matmul %21, %22, %cst_14 {dimension_numbers = #tpu.dot_dimension_numbers<[1], [0], [0], [1], [0, 0, 1, 1], [], []>} : vector<32x144xf32>, vector<144x128xf32>, vector<32x128xf32> -> vector<32x128xf32>
      %c0_15 = arith.constant 0 : index
      %c0_16 = arith.constant 0 : index
      %24 = vector.load %arg5[%c0_15, %c0_16] : memref<1024x32xf32, #tpu.memory_space<vmem>>, vector<1024x32xf32>
      %cst_17 = arith.constant dense<0.000000e+00> : vector<1024x128xf32>
      %25 = tpu.matmul %24, %23, %cst_17 {dimension_numbers = #tpu.dot_dimension_numbers<[1], [0], [0], [1], [0, 0, 1, 1], [], []>} : vector<1024x32xf32>, vector<32x128xf32>, vector<1024x128xf32> -> vector<1024x128xf32>
      %c0_18 = arith.constant 0 : index
      %c0_19 = arith.constant 0 : index
      %26 = vector.load %arg7[%c0_18, %c0_19] : memref<1024x1xf32, #tpu.memory_space<vmem>>, vector<1024x1xf32>
      %27 = vector.broadcast %26 : vector<1024x1xf32> to vector<1024x128xf32>
      %28 = arith.addf %25, %27 : vector<1024x128xf32>
      %cst_20 = arith.constant 0.000000e+00 : f32
      %29 = vector.broadcast %cst_20 : f32 to vector<1024x128xf32>
      %30 = arith.maximumf %28, %29 : vector<1024x128xf32>
      %c0_21 = arith.constant 0 : index
      %c0_22 = arith.constant 0 : index
      %31 = vector.load %arg6[%c0_21, %c0_22] : memref<1024x128xf32, #tpu.memory_space<vmem>>, vector<1024x128xf32>
      %32 = arith.mulf %30, %31 : vector<1024x128xf32>
      %c0_23 = arith.constant 0 : index
      %c0_24 = arith.constant 0 : index
      %33 = vector.load %arg8[%c0_23, %c0_24] : memref<8x1024xf32, #tpu.memory_space<vmem>>, vector<8x1024xf32>
      %cst_25 = arith.constant dense<0.000000e+00> : vector<8x128xf32>
      %34 = tpu.matmul %33, %32, %cst_25 {dimension_numbers = #tpu.dot_dimension_numbers<[1], [0], [0], [1], [0, 0, 1, 1], [], []>} : vector<8x1024xf32>, vector<1024x128xf32>, vector<8x128xf32> -> vector<8x128xf32>
      %c0_26 = arith.constant 0 : index
      %c0_27 = arith.constant 0 : index
      %35 = vector.load %arg9[%c0_26, %c0_27] : memref<8x32xf32, #tpu.memory_space<vmem>>, vector<8x32xf32>
      %cst_28 = arith.constant dense<0.000000e+00> : vector<8x144xf32>
      %36 = tpu.matmul %35, %21, %cst_28 {dimension_numbers = #tpu.dot_dimension_numbers<[1], [0], [0], [1], [0, 0, 1, 1], [], []>} : vector<8x32xf32>, vector<32x144xf32>, vector<8x144xf32> -> vector<8x144xf32>
      %c0_29 = arith.constant 0 : index
      %c0_30 = arith.constant 0 : index
      %37 = vector.load %arg10[%c0_29, %c0_30] : memref<8x1xf32, #tpu.memory_space<vmem>>, vector<8x1xf32>
      %38 = vector.broadcast %37 : vector<8x1xf32> to vector<8x144xf32>
      %39 = arith.addf %36, %38 : vector<8x144xf32>
      %c0_31 = arith.constant 0 : index
      %c0_32 = arith.constant 0 : index
      %40 = vector.load %arg4[%c0_31, %c0_32] : memref<128x144xf32, #tpu.memory_space<vmem>>, vector<128x144xf32>
      %cst_33 = arith.constant dense<0.000000e+00> : vector<8x144xf32>
      %41 = tpu.matmul %34, %40, %cst_33 {dimension_numbers = #tpu.dot_dimension_numbers<[1], [0], [0], [1], [0, 0, 1, 1], [], []>} : vector<8x128xf32>, vector<128x144xf32>, vector<8x144xf32> -> vector<8x144xf32>
      %42 = arith.addf %39, %41 : vector<8x144xf32>
      %c0_34 = arith.constant 0 : index
      %c0_35 = arith.constant 0 : index
      %43 = vector.load %arg13[%c0_34, %c0_35] : memref<8x144xf32, #tpu.memory_space<vmem>>, vector<8x144xf32>
      tpu.vector_store %arg13[%c0_34, %c0_35], %42 {strides = array<i32>} : memref<8x144xf32, #tpu.memory_space<vmem>>, vector<8x144xf32>,
    } else {
    }
    %c0 = arith.constant 0 : index
    %c0_1 = arith.constant 0 : index
    %3 = vector.load %arg13[%c0, %c0_1] : memref<8x144xf32, #tpu.memory_space<vmem>>, vector<8x144xf32>
    %c0_2 = arith.constant 0 : index
    %c0_3 = arith.constant 0 : index
    %4 = vector.load %arg11[%c0_2, %c0_3] : memref<144x2304xf32, #tpu.memory_space<vmem>>, vector<144x2304xf32>
    %cst = arith.constant dense<0.000000e+00> : vector<8x2304xf32>
    %5 = tpu.matmul %3, %4, %cst {dimension_numbers = #tpu.dot_dimension_numbers<[1], [0], [0], [1], [0, 0, 1, 1], [], []>} : vector<8x144xf32>, vector<144x2304xf32>, vector<8x2304xf32> -> vector<8x2304xf32>
    %cst_4 = arith.constant dense<0xFF800000> : vector<2304xf32>
    %6 = vector.multi_reduction <maximumf>, %5, %cst_4 [0] : vector<8x2304xf32> to vector<2304xf32>
    %7 = vector.shape_cast %6 : vector<2304xf32> to vector<1x2304xf32>
    %8 = vector.broadcast %7 : vector<1x2304xf32> to vector<8x2304xf32>
    %9 = arith.subf %5, %8 : vector<8x2304xf32>
    %10 = math.exp %9 : vector<8x2304xf32>
    %cst_5 = arith.constant dense<0.000000e+00> : vector<2304xf32>
    %11 = vector.multi_reduction <add>, %10, %cst_5 [0] : vector<8x2304xf32> to vector<2304xf32>
    %12 = vector.shape_cast %11 : vector<2304xf32> to vector<1x2304xf32>
    %13 = math.log %12 : vector<1x2304xf32>
    %14 = arith.addf %7, %13 : vector<1x2304xf32>
    %15 = vector.broadcast %14 : vector<1x2304xf32> to vector<8x2304xf32>
    %16 = arith.subf %5, %15 : vector<8x2304xf32>
    %c0_6 = arith.constant 0 : index
    %c0_7 = arith.constant 0 : index
    %c0_8 = arith.constant 0 : index
    %17 = vector.load %arg12[%c0_6, %c0_7, %c0_8] : memref<1x8x2304xf32, #tpu.memory_space<vmem>>, vector<1x8x2304xf32>
    %18 = vector.shape_cast %17 : vector<1x8x2304xf32> to vector<8x2304xf32>
    %19 = vector.shape_cast %16 : vector<8x2304xf32> to vector<1x8x2304xf32>
    tpu.vector_store %arg12[%c0_6, %c0_7, %c0_8], %19 {strides = array<i32>} : memref<1x8x2304xf32, #tpu.memory_space<vmem>>, vector<1x8x2304xf32>,
    return
  }
  func.func @transform_0(%arg0: i32, %arg1: i32) -> (i32, i32, i32) {
    %c0_i32 = arith.constant 0 : i32
    %c0_i32_0 = arith.constant 0 : i32
    %c0_i32_1 = arith.constant 0 : i32
    return %arg0, %c0_i32, %c0_i32_0 : i32, i32, i32
  }
  func.func @transform_1(%arg0: i32, %arg1: i32) -> (i32, i32) {
    %c0_i32 = arith.constant 0 : i32
    %c0_i32_0 = arith.constant 0 : i32
    %c0_i32_1 = arith.constant 0 : i32
    return %c0_i32, %c0_i32_0 : i32, i32
  }
  func.func @transform_2(%arg0: i32, %arg1: i32) -> (i32, i32) {
    %c0_i32 = arith.constant 0 : i32
    %c0_i32_0 = arith.constant 0 : i32
    %c0_i32_1 = arith.constant 0 : i32
    return %c0_i32, %c0_i32_0 : i32, i32
  }
  func.func @transform_3(%arg0: i32, %arg1: i32) -> (i32, i32) {
    %c0_i32 = arith.constant 0 : i32
    %c0_i32_0 = arith.constant 0 : i32
    %c0_i32_1 = arith.constant 0 : i32
    return %c0_i32, %c0_i32_0 : i32, i32
  }
  func.func @transform_4(%arg0: i32, %arg1: i32) -> (i32, i32) {
    %c0_i32 = arith.constant 0 : i32
    %c0_i32_0 = arith.constant 0 : i32
    %c0_i32_1 = arith.constant 0 : i32
    return %c0_i32, %c0_i32_0 : i32, i32
  }
  func.func @transform_5(%arg0: i32, %arg1: i32) -> (i32, i32) {
    %c0_i32 = arith.constant 0 : i32
    %c0_i32_0 = arith.constant 0 : i32
    %c0_i32_1 = arith.constant 0 : i32
    return %c0_i32, %c0_i32_0 : i32, i32
  }
  func.func @transform_6(%arg0: i32, %arg1: i32) -> (i32, i32) {
    %c0_i32 = arith.constant 0 : i32
    %c0_i32_0 = arith.constant 0 : i32
    %c0_i32_1 = arith.constant 0 : i32
    return %c0_i32, %c0_i32_0 : i32, i32
  }
  func.func @transform_7(%arg0: i32, %arg1: i32) -> (i32, i32) {
    %c0_i32 = arith.constant 0 : i32
    %c0_i32_0 = arith.constant 0 : i32
    %c0_i32_1 = arith.constant 0 : i32
    return %c0_i32, %c0_i32_0 : i32, i32
  }
  func.func @transform_8(%arg0: i32, %arg1: i32) -> (i32, i32) {
    %c0_i32 = arith.constant 0 : i32
    %c0_i32_0 = arith.constant 0 : i32
    %c0_i32_1 = arith.constant 0 : i32
    return %c0_i32, %c0_i32_0 : i32, i32
  }
  func.func @transform_9(%arg0: i32, %arg1: i32) -> (i32, i32) {
    %c0_i32 = arith.constant 0 : i32
    %c0_i32_0 = arith.constant 0 : i32
    return %c0_i32, %arg1 : i32, i32
  }
  func.func @transform_10(%arg0: i32, %arg1: i32) -> (i32, i32, i32) {
    %c0_i32 = arith.constant 0 : i32
    %c0_i32_0 = arith.constant 0 : i32
    return %arg0, %c0_i32, %arg1 : i32, i32, i32
  }
}

</mosaic_0001>

<bundles_post_ra>
// kernel: tpu_custom_call.1
= control target key start
LH: loop header
LB: loop body
LE: loop exit
PB: predicated region body
PF: predicated region fallthrough
CT: control target
= control target key end

     0   :  { %s9551_s0 = inlined_call_operand.hbm [shape: f32[2,32,144], index: 0, kind: input, shape index: {}]   ;;  %s9552_s1 = inlined_call_operand.hbm [shape: f32[144,128], index: 1, kind: input, shape index: {}]   ;;  %s9553_s2 = inlined_call_operand.vmem [shape: f32[128,144], index: 2, kind: input, shape index: {}]   ;;  %s9554_s3 = inlined_call_operand.vmem [shape: f32[1024,32], index: 3, kind: input, shape index: {}]   ;;  %s9555_s4 = inlined_call_operand.hbm [shape: f32[1024,128], index: 4, kind: input, shape index: {}]   ;;  %s9556_s5 = inlined_call_operand.vmem [shape: f32[1024,1], index: 5, kind: input, shape index: {}]   ;;  %s9557_s6 = inlined_call_operand.hbm [shape: f32[8,1024], index: 6, kind: input, shape index: {}]   ;;  %s9558_s7 = inlined_call_operand.hbm [shape: f32[8,32], index: 7, kind: input, shape index: {}]   ;;  %s9559_s8 = inlined_call_operand.vmem [shape: f32[8,1], index: 8, kind: input, shape index: {}]   ;;  %s9560_s9 = inlined_call_operand.hbm [shape: f32[144,9216], index: 9, kind: input, shape index: {}]   ;;  %s9561_s10 = inlined_call_operand.hbm [shape: f32[2,8,9216], index: 10, kind: output, shape index: {}]  }
   0x1   :  { %9593 = sst [smem:[#allocation67_spill]] %s9551_s0 }
   0x2   :  { %9594 = sst [smem:[#allocation68_spill]] %s9552_s1 }
   0x3   :  { %9595 = sst [smem:[#allocation69_spill]] %s9553_s2 }
   0x4   :  { %9596 = sst [smem:[#allocation70_spill]] %s9554_s3 }
   0x5   :  { %9597 = sst [smem:[#allocation71_spill]] %s9555_s4 }
   0x6   :  { %9598 = sst [smem:[#allocation72_spill]] %s9556_s5 }
   0x7   :  { %9599 = sst [smem:[#allocation73_spill]] %s9557_s6 }
   0x8   :  { %9600 = sst [smem:[#allocation74_spill]] %s9559_s8 }
   0x9   :  { %9601 = sst [smem:[#allocation75_spill]] %s9561_s10 }
   0xa   :  { %15 = vsyncpa [#allocation4], 0 }
   0xb   :  { %17 = vsyncpa [#allocation4 + $0x1], 0 }
   0xc   :  { %18 = vsyncpa [#allocation7], 0 }
   0xd   :  { %19 = vsyncpa [#allocation10], 0 }
   0xe   :  { %20 = vsyncpa [#allocation13], 0 }
   0xf   :  { %22 = vsyncpa [#allocation13 + $0x1], 0 }
  0x10   :  { %23 = vsyncpa [#allocation5], 0 }
  0x11   :  { %25 = vsyncpa [#allocation5 + $0x1], 0  ;;  %s6792_s13 = smov 0   ;;  %s6794_s14 = smov 0  }
  0x12   :  { %s6796_s15 = smov 0   ;;  %s6798_s16 = smov 0  }
  0x13   :  { %s6800_s17 = smov 0   ;;  %s6802_s18 = smov 0  }
  0x14   :  { %s6804_s19 = smov 0   ;;  %s6806_s20 = smov 0  }
  0x15   :  { %s6808_s21 = smov 0   ;;  %s6810_s22 = smov 0  }
  0x16   :  { %s6812_s23 = smov 0   ;;  %s6814_s24 = smov 0  }
  0x17   :  { %s6816_s25 = smov 0   ;;  %s6818_s26 = smov 0  }
  0x18 LB: > { %9602 = sst [smem:[#allocation20_spill]] %s6666_s13  ;;  %s4953_s27 = sadd.s32 4294967295, %s6718_s26   ;;  %s6718_s26 = sphi %s6818_s26, %s31_s26   ;;  %s6714_s25 = sphi %s6816_s25, %s9764_s25   ;;  %s6710_s24 = sphi %s6814_s24, %s9763_s24   ;;  %s6706_s23 = sphi %s6812_s23, %s9762_s23   ;;  %s6702_s22 = sphi %s6810_s22, %s9761_s22   ;;  %s6698_s21 = sphi %s6808_s21, %s9760_s21   ;;  %s6694_s20 = sphi %s6806_s20, %s9759_s20   ;;  %s6690_s19 = sphi %s6804_s19, %s9758_s19   ;;  %s6686_s18 = sphi %s6802_s18, %s9757_s18   ;;  %s6682_s17 = sphi %s6800_s17, %s9756_s17   ;;  %s6678_s16 = sphi %s6798_s16, %s9755_s16   ;;  %s6674_s15 = sphi %s6796_s15, %s9754_s15   ;;  %s6670_s14 = sphi %s6794_s14, %s9753_s14   ;;  %s6666_s13 = sphi %s6792_s13, %s9752_s13  }
  0x19   : > { %9603 = sst [smem:[#allocation21_spill]] %s6670_s14  ;;  %s4954_s28 = sadd.s32 4294967294, %s6718_s26  }
  0x1a   : > { %9604 = sst [smem:[#allocation22_spill]] %s6702_s22  ;;  %p6862_p0 = scmp.eq.s32.totalorder %s4953_s27, 0 }
  0x1b   : > { %9605 = sst [smem:[#allocation23_spill]] %s6706_s23  ;;  %p257_p1 = scmp.ne.s32.totalorder %s6682_s17, %s6678_s16 }
  0x1c   : > { %s9606_s29 = scalar_select %p6862_p0, 1, 0 }
  0x1d   : > { %p282_p2 = scmp.ne.s32.totalorder %s6674_s15, %s6670_s14  ;;  %p283_p3 = scmp.eq.s32.totalorder %s4953_s27, 7 }
  0x1e   : > { %p6871_p4 = por %p257_p1, %p6862_p0  ;;  %p288_p5 = scmp.ne.s32.totalorder %s6670_s14, %s6666_s13 }
  0x1f   : > { %p6877_p6 = por %p283_p3, %p282_p2  ;;  %p289_p7 = scmp.eq.s32.totalorder %s4954_s28, 7 }
  0x20   : > { %s9607_s30 = scalar_select %p6871_p4, 1, 0 }
  0x21   : > { %s9609_s11 = scalar_select %p6877_p6, 1, 0 }
  0x22   : > { %9608 = sst [smem:[#allocation24_spill]] %s9607_s30  ;;  %p4955_p8 = scmp.ge.s32.totalorder %s6718_s26, 1 }
  0x23   : > { %9610 = sst [smem:[#allocation25_spill]] %s9609_s11  ;;  %p296_p9 = scmp.lt.s32.totalorder %s6718_s26, 9 }
  0x24   : > { %p6883_p10 = por %p289_p7, %p288_p5  ;;  %s6720_s27 = smov [#allocation6]  }
  0x25   : > { %p6887_p11 = pnand %p4955_p8, %p296_p9  ;;  %s308_s10 = sshll.u32 %s6720_s27, 4  ;;  %s309_s10 = int_to_ptr.vmem [resolvable:$true] %s308_s10 }
  0x26   : > { %s9611_s12 = scalar_select %p6883_p10, 1, 0 }
  0x27   : > { %s9613_s16 = scalar_select %p6887_p11, 1, 0 }
  0x28   : > { %9612 = sst [smem:[#allocation26_spill]] %s9611_s12  ;;  %p6152_p12 = pneg %p6887_p11 }
  0x29   : > { %9614 = sst [smem:[#allocation27_spill]] %s9613_s16  ;;  %s6721_s28 = smov [#allocation9]  }
  0x2a   : > { %p6895_p13 = pnand %p6152_p12, %p6862_p0  ;;  %s344_s11 = sshll.u32 %s6721_s28, 4  ;;  %s6899_s11 = int_to_ptr.vmem [resolvable:$true] %s344_s11 }
  0x2b   : > { %s9616_s1 = sld [smem:[#allocation68_spill]] }
  0x2c   : > { %p6909_p2 = pneg %p6895_p13 }
  0x31   : > { %s6388_s2 = scalar_lea.hbm %s9616_s1, 2304 }
  0x32   : > { %p6389_p1 = scmp.ne.s32.totalorder %s9616_s1, %s6388_s2  ;;  %p6395_p7 = scmp.lt.u32.totalorder %s6388_s2, %s9616_s1 }
  0x34   : > { %p6391_p3 = pnand %p6909_p2, %p6389_p1 }
  0x36   : > { %p6392_p5 = pneg %p6391_p3 }
  0x38   : > { %p6397_p8 = pnand %p6395_p7, %p6392_p5 }
  0x3a   : > { %6400 = shalt.err (!%p6397_p8)
}
  0x3b   : > { %s6401_s23 = scalar_lea.vmem %s309_s10, 2304  ;;  %p6409_p6 = scmp.lt.s32.totalorder %s309_s10, %s309_s10 }
  0x3c   : > { %p6402_p9 = scmp.ne.s32.totalorder %s309_s10, %s6401_s23  ;;  %p6410_p4 = scmp.lt.s32.totalorder %s6401_s23, %s6401_s23 }
  0x3e   : > { %p6404_p12 = pnand %p6402_p9, %p6909_p2  ;;  %p6411_p11 = por %p6410_p4, %p6409_p6 }
  0x40   : > { %p6405_p10 = pneg %p6404_p12 }
  0x42   : > { %p6412_p0 = pnand %p6411_p11, %p6405_p10 }
  0x44   : > { %6415 = shalt.err (!%p6412_p0)
}
  0x45   : > { %s9580_s3 = smov 128   ;;  %s9581_s8 = smov 8  }
  0x46   : > { %6155 = dma.hbm_to_vmem [thread:$0]  (!%p6895_p13), %s9616_s1, 2304, %s309_s10, [#allocation7], %s9580_s3, %s9580_s3, %s9581_s8  }
  0x47   : > { %s9618_s6 = sld [smem:[#allocation73_spill]] }
  0x4d   : > { %s6416_s22 = scalar_lea.hbm %s9618_s6, 1024 }
  0x4e   : > { %p6417_p0 = scmp.ne.s32.totalorder %s9618_s6, %s6416_s22  ;;  %p6423_p10 = scmp.lt.u32.totalorder %s6416_s22, %s9618_s6 }
  0x50   : > { %p6419_p4 = pnand %p6417_p0, %p6909_p2 }
  0x52   : > { %p6420_p6 = pneg %p6419_p4 }
  0x54   : > { %p6425_p11 = pnand %p6423_p10, %p6420_p6 }
  0x56   : > { %6428 = shalt.err (!%p6425_p11)
}
  0x57   : > { %s6429_s10 = scalar_lea.vmem %s6899_s11, 1024  ;;  %p6437_p7 = scmp.lt.s32.totalorder %s6899_s11, %s6899_s11 }
  0x58   : > { %p6430_p1 = scmp.ne.s32.totalorder %s6899_s11, %s6429_s10  ;;  %p6438_p8 = scmp.lt.s32.totalorder %s6429_s10, %s6429_s10 }
  0x5a   : > { %p6432_p3 = pnand %p6430_p1, %p6909_p2  ;;  %p6439_p9 = por %p6438_p8, %p6437_p7 }
  0x5c   : > { %p6433_p5 = pneg %p6432_p3 }
  0x5e   : > { %p6440_p12 = pnand %p6439_p9, %p6433_p5 }
  0x60   : > { %6443 = shalt.err (!%p6440_p12)
}
  0x61   : > { %6161 = dma.hbm_to_vmem [thread:$0]  (!%p6895_p13), %s9618_s6, 1024, %s6899_s11, [#allocation10]  }
  0x62   : > { %s6724_s30 = smov [#allocation8]   ;;  %s6725_s2 = smov [#allocation11]  }
  0x63   : > { %s327_s16 = sshll.u32 %s6724_s30, 4  ;;  %s355_s5 = sshll.u32 %s6725_s2, 4  ;;  %s328_s16 = int_to_ptr.vmem [resolvable:$true] %s327_s16  ;;  %s356_s5 = int_to_ptr.vmem [resolvable:$true] %s355_s5 }
  0x64   : > { %s9619_s4 = sld [smem:[#allocation71_spill]] }
  0x6a   : > { %s6444_s23 = scalar_lea.hbm %s9619_s4, 16384 }
  0x6b   : > { %p6445_p0 = scmp.ne.s32.totalorder %s9619_s4, %s6444_s23  ;;  %p6451_p10 = scmp.lt.u32.totalorder %s6444_s23, %s9619_s4 }
  0x6d   : > { %p6447_p4 = pnand %p6445_p0, %p6909_p2 }
  0x6f   : > { %p6448_p6 = pneg %p6447_p4 }
  0x71   : > { %p6453_p11 = pnand %p6451_p10, %p6448_p6 }
  0x73   : > { %6456 = shalt.err (!%p6453_p11)
}
  0x74   : > { %s6457_s11 = scalar_lea.vmem %s328_s16, 16384  ;;  %p6465_p7 = scmp.lt.s32.totalorder %s328_s16, %s328_s16 }
  0x75   : > { %p6458_p1 = scmp.ne.s32.totalorder %s328_s16, %s6457_s11  ;;  %p6466_p8 = scmp.lt.s32.totalorder %s6457_s11, %s6457_s11 }
  0x77   : > { %p6460_p3 = pnand %p6458_p1, %p6909_p2  ;;  %p6467_p9 = por %p6466_p8, %p6465_p7 }
  0x79   : > { %p6461_p5 = pneg %p6460_p3 }
  0x7b   : > { %p6468_p12 = pnand %p6467_p9, %p6461_p5 }
  0x7d   : > { %6471 = shalt.err (!%p6468_p12)
}
  0x7e   : > { %s9620_s3 = smov 8   ;;  %s9621_s22 = smov 128  }
  0x7f   : > { %6158 = dma.hbm_to_vmem [thread:$0]  (!%p6895_p13), %s9619_s4, 16384, %s328_s16, [#allocation7], %s9621_s22, %s9621_s22, %s9620_s3  }
  0x80   : > { %s6472_s28 = scalar_lea.hbm %s9558_s7, 128 }
  0x81   : > { %p6473_p0 = scmp.ne.s32.totalorder %s9558_s7, %s6472_s28  ;;  %p6479_p10 = scmp.lt.u32.totalorder %s6472_s28, %s9558_s7 }
  0x83   : > { %p6475_p4 = pnand %p6473_p0, %p6909_p2 }
  0x85   : > { %p6476_p6 = pneg %p6475_p4 }
  0x87   : > { %p6481_p11 = pnand %p6479_p10, %p6476_p6 }
  0x89   : > { %6484 = shalt.err (!%p6481_p11)
}
  0x8a   : > { %s6485_s8 = scalar_lea.vmem %s356_s5, 128  ;;  %p6493_p7 = scmp.lt.s32.totalorder %s356_s5, %s356_s5 }
  0x8b   : > { %p6486_p1 = scmp.ne.s32.totalorder %s356_s5, %s6485_s8  ;;  %p6494_p8 = scmp.lt.s32.totalorder %s6485_s8, %s6485_s8 }
  0x8d   : > { %p6488_p3 = pnand %p6486_p1, %p6909_p2  ;;  %p6495_p9 = por %p6494_p8, %p6493_p7 }
  0x8f   : > { %p6489_p5 = pneg %p6488_p3 }
  0x91   : > { %p6496_p12 = pnand %p6495_p9, %p6489_p5 }
  0x93   : > { %6499 = shalt.err (!%p6496_p12)
}
  0x94   : > { %6164 = dma.hbm_to_vmem [thread:$0]  (!%p6895_p13), %s9558_s7, 128, %s356_s5, [#allocation10]  }
  0x95   : > { %s43_s27 = sadd.s32 1, %s6714_s25  ;;  %s50_s22 = sadd.s32 1, %s6698_s21 }
  0x96   : > { %p57_p2 = scmp.ne.s32.totalorder %s6698_s21, %s6694_s20  ;;  %p9583_p0 = scmp.eq.s32.totalorder %s6718_s26, 0 }
  0x97   : > { %p63_p4 = scmp.ne.s32.totalorder %s6694_s20, %s6690_s19  ;;  %p9582_p6 = scmp.lt.s32.totalorder %s6718_s26, 8 }
  0x98   : > { %s369_s13 = sand.u32 1, %s6698_s21   ;;  %p59_p10 = por %p9583_p0, %p57_p2 }
  0x99   : > { %p9622_p11 = scmp.ne.s32.totalorder %s9606_s29, 0  ;;  %s4961_s2 = sshll.u32 %s369_s13, 6 }
  0x9a   : > { %s5117_s12 = sshll.u32 %s6714_s25, 10  ;;  %s9624_s0 = sld [smem:[#allocation67_spill]] }
  0x9b   : > { %p7003_p1 = por %p9622_p11, %p63_p4  ;;  %s373_s19 = scalar_lea.vmem [#allocation3], %s4961_s2 }
  0x9c   : > { %s380_s10 = sshll.u32 %s373_s19, 4  ;;  %p7017_p13 = pnand %p9582_p6, %p59_p10  ;;  %s7013_s10 = int_to_ptr.vmem [resolvable:$true] %s380_s10 }
  0x9d   : > { %s7021_s11 = scalar_lea.sflag [#allocation4], %s369_s13 }
  0x9e   : > { %p6502_p5 = pneg %p7017_p13 }
  0xa0   : > { %s7011_s5 = scalar_lea.hbm %s9624_s0, %s5117_s12  ;;  %s6505_s2 = scalar_lea.hbm %s9624_s0, 2048 }
  0xa1   : > { %s6500_s8 = scalar_lea.hbm %s7011_s5, 1024  ;;  %p6506_p9 = scmp.lt.u32.totalorder %s7011_s5, %s9624_s0 }
  0xa2   : > { %p6501_p3 = scmp.ne.s32.totalorder %s7011_s5, %s6500_s8  ;;  %p6507_p12 = scmp.lt.u32.totalorder %s6505_s2, %s6500_s8 }
  0xa3   : > { %p6509_p4 = scmp.lt.u32.totalorder %s6500_s8, %s7011_s5 }
  0xa4   : > { %p6503_p7 = pnand %p6502_p5, %p6501_p3  ;;  %p6508_p2 = por %p6507_p12, %p6506_p9 }
  0xa6   : > { %p6504_p8 = pneg %p6503_p7  ;;  %p6510_p10 = por %p6509_p4, %p6508_p2 }
  0xa8   : > { %p6511_p11 = pnand %p6510_p10, %p6504_p8 }
  0xaa   : > { %6514 = shalt.err (!%p6511_p11)
}
  0xab   : > { %s6515_s13 = scalar_lea.vmem %s7013_s10, 1024  ;;  %s6726_s23 = smov [#allocation3]  }
  0xac   : > { %p6516_p3 = scmp.ne.s32.totalorder %s7013_s10, %s6515_s13  ;;  %s6520_s19 = sshll.u32 %s6726_s23, 4  ;;  %s6521_s19 = int_to_ptr.vmem [resolvable:$false] %s6520_s19 }
  0xad   : > { %s6522_s16 = scalar_lea.vmem %s6521_s19, 2048  ;;  %p6523_p0 = scmp.lt.s32.totalorder %s7013_s10, %s6521_s19 }
  0xae   : > { %p6518_p7 = pnand %p6516_p3, %p6502_p5  ;;  %p6524_p9 = scmp.lt.s32.totalorder %s6522_s16, %s6515_s13 }
  0xb0   : > { %p6519_p6 = pneg %p6518_p7  ;;  %p6525_p12 = por %p6524_p9, %p6523_p0 }
  0xb2   : > { %p6526_p2 = pnand %p6525_p12, %p6519_p6 }
  0xb4   : > { %6529 = shalt.err (!%p6526_p2)
}
  0xb5   : > { %s6727_s8 = smov 256   ;;  %s6728_s3 = smov 16  }
  0xb6   : > { %6168 = dma.hbm_to_vmem [thread:$0]  (!%p7017_p13), %s7011_s5, 1024, %s7013_s10, %s7021_s11, %s6727_s8, %s6727_s8, %s6728_s3  }
  0xb7   : > { %s244_s2 = sadd.s32 1, %s6686_s18  ;;  %s40_s12 = sadd.s32 1, %s6710_s24 }
  0xb8   : > { %p251_p0 = scmp.ne.s32.totalorder %s6686_s18, %s6682_s17  ;;  %p41_p6 = scmp.ge.s32.totalorder %s40_s12, 4 }
  0xb9   : > { %s272_s28 = sadd.s32 1, %s6674_s15  ;;  %p9626_p5 = scmp.eq.s32.totalorder %s6718_s26, 0 }
  0xba   : > { %s390_s13 = sand.u32 1, %s6686_s18   ;;  %s9766_s12 = smov (%p41_p6, %s40_s12), 0 }
  0xbb   : > { %p253_p8 = por %p251_p0, %p9626_p5  ;;  %s9768_s27 = smov (!%p41_p6, %s43_s27), %s6714_s25 }
  0xbc   : > { %s241_s5 = ssub.s32 %s6710_s24, %s9766_s12  ;;  %p45_p13 = scmp.ge.s32.totalorder %s9768_s27, 2 }
  0xbd   : > { %p242_p4 = scmp.eq.s32.totalorder %s241_s5, 0  ;;  %s6126_s10 = smul.u32 2592, %s390_s13 }
  0xbe   : > { %p9627_p10 = scmp.lt.s32.totalorder %s6718_s26, 8  ;;  %s9770_s27 = smov (%p45_p13, %s9768_s27), 0 }
  0xbf   : > { %s7073_s11 = scalar_select %p242_p4, %s6686_s18, %s244_s2  }
  0xc0   : > { %p7066_p11 = pnand %p9627_p10, %p253_p8  ;;  %s47_s23 = ssub.s32 %s6714_s25, %s9770_s27 }
  0xc1   : > { %p48_p3 = scmp.eq.s32.totalorder %s47_s23, 0  ;;  %s269_s19 = sor.u32 %s241_s5, %s47_s23 }
  0xc2   : > { %p270_p7 = scmp.eq.s32.totalorder %s269_s19, 0  ;;  %s5118_s16 = smul.u32 2304, %s6710_s24 }
  0xc3   : > { %s7081_s8 = scalar_select %p48_p3, %s6698_s21, %s50_s22  }
  0xc4   : > { %s7084_s3 = scalar_select %p270_p7, %s6674_s15, %s272_s28  }
  0xc5   : > { %s7089_s4 = scalar_lea.hbm %s9560_s9, %s5118_s16  ;;  %s394_s2 = scalar_lea.vmem [#allocation12], %s6126_s10 }
  0xc6   : > { %s401_s6 = sshll.u32 %s394_s2, 4  ;;  %s7093_s5 = scalar_lea.sflag [#allocation13], %s390_s13  ;;  %s7091_s6 = int_to_ptr.vmem [resolvable:$true] %s401_s6 }
  0xc7   : > { %s6530_s23 = scalar_lea.hbm %s7089_s4, 41472  ;;  %p6532_p12 = pneg %p7066_p11 }
  0xc8   : > { %p6531_p9 = scmp.ne.s32.totalorder %s7089_s4, %s6530_s23  ;;  %s6535_s22 = scalar_lea.hbm %s9560_s9, 165888 }
  0xc9   : > { %p6536_p6 = scmp.lt.u32.totalorder %s7089_s4, %s9560_s9  ;;  %p6537_p5 = scmp.lt.u32.totalorder %s6535_s22, %s6530_s23 }
  0xca   : > { %p6533_p2 = pnand %p6532_p12, %p6531_p9  ;;  %p6539_p13 = scmp.lt.u32.totalorder %s6530_s23, %s7089_s4 }
  0xcb   : > { %p6538_p8 = por %p6537_p5, %p6536_p6 }
  0xcc   : > { %p6534_p0 = pneg %p6533_p2 }
  0xcd   : > { %p6540_p4 = por %p6539_p13, %p6538_p8 }
  0xcf   : > { %p6541_p10 = pnand %p6540_p4, %p6534_p0 }
  0xd1   : > { %6544 = shalt.err (!%p6541_p10)
}
  0xd2   : > { %s6545_s13 = scalar_lea.vmem %s7091_s6, 41472  ;;  %s6729_s10 = smov [#allocation12]  }
  0xd3   : > { %p6546_p3 = scmp.ne.s32.totalorder %s7091_s6, %s6545_s13  ;;  %s6550_s16 = sshll.u32 %s6729_s10, 4  ;;  %s6551_s16 = int_to_ptr.vmem [resolvable:$false] %s6550_s16 }
  0xd4   : > { %s6552_s2 = scalar_lea.vmem %s6551_s16, 82944  ;;  %p6553_p2 = scmp.lt.s32.totalorder %s7091_s6, %s6551_s16 }
  0xd5   : > { %p6548_p7 = pnand %p6546_p3, %p6532_p12  ;;  %p6554_p6 = scmp.lt.s32.totalorder %s6552_s2, %s6545_s13 }
  0xd7   : > { %p6549_p9 = pneg %p6548_p7  ;;  %p6555_p5 = por %p6554_p6, %p6553_p2 }
  0xd9   : > { %p6556_p8 = pnand %p6555_p5, %p6549_p9 }
  0xdb   : > { %6559 = shalt.err (!%p6556_p8)
}
  0xdc   : > { %s6730_s23 = smov 9216   ;;  %s6731_s0 = smov 2304  }
  0xdd   : > { %s6732_s1 = smov 144   ;;  %s9629_s22 = sld [smem:[#allocation27_spill]] }
  0xde   : > { %6171 = dma.hbm_to_vmem [thread:$0]  (!%p7066_p11), %s7089_s4, 41472, %s7091_s6, %s7093_s5, %s6730_s23, %s6731_s0, %s6732_s1  }
  0xe3   : > { %p9630_p12 = scmp.ne.s32.totalorder %s9629_s22, 0 }
  0xe4   : > { %s415_s28 = sand.u32 (!%p9630_p12), 1, %s6694_s20  }
  0xe5   : > { %413 = sbr.rel (%p9630_p12) target bundleno = 1874 (0x752), region = 60  ;;  %s4966_s19 = sshll.u32 (!%p9630_p12), %s415_s28, 6 }
  0xe6   : > { %s416_s13 = scalar_lea.sflag (!%p9630_p12), [#allocation4], %s415_s28  ;;  %s7124_s10 = scalar_lea.vmem (!%p9630_p12), [#allocation3], %s4966_s19 }
  0xec   : > { %6645 = dma.done.wait (%p7003_p1), %s416_s13, 1024  }
  0xed   : > { %6647 = vsyncadd (%p7003_p1), %s416_s13, 4294966272  ;;  %p9631_p0 = scmp.ne.s32.totalorder %s9606_s29, 0 }
  0xef   : > { %6649 = dma.done.wait (%p9631_p0), [#allocation7], 18688  }
  0xf0   : > { %6651 = vsyncadd (%p9631_p0), [#allocation7], 4294948608 }
  0xf1   : > { %6653 = dma.done.wait (%p9631_p0), [#allocation10], 1152  }
  0xf2   : > { %6655 = vsyncadd (%p9631_p0), [#allocation10], 4294966144  ;;  %s9632_s4 = sld [smem:[#allocation24_spill]]  ;;  %s440_s6 = sand.u32 1, %s6682_s17  }
  0xf3   : > { %s6127_s14 = smul.u32 2592, %s440_s6  ;;  %s441_s5 = scalar_lea.sflag [#allocation13], %s440_s6 }
  0xf5   : > { %s7139_s16 = scalar_lea.vmem [#allocation12], %s6127_s14 }
  0xf8   : > { %p9633_p1 = scmp.ne.s32.totalorder %s9632_s4, 0 }
  0xfa   : > { %6657 = dma.done.wait (%p9633_p1), %s441_s5, 41472  }
  0xfb   : > { %6659 = vsyncadd (%p9633_p1), %s441_s5, 4294925824  ;;  %s9634_s30 = sld [smem:[#allocation21_spill]]  ;;  %s9635_s29 = sld [smem:[#allocation22_spill]] }
 0x101   : > { %s9584_s2 = sand.u32 1, %s9634_s30   ;;  %p4971_p11 = scmp.ne.s32.totalorder %s9635_s29, 0 }
 0x102   : > { %s6128_s23 = smul.u32 144, %s9584_s2 }
 0x103   : > { %491 = sbr.rel (%p4971_p11) target bundleno = 1408 (0x580), region = 88 }
 0x104   : > { %s7148_s0 = scalar_lea.vmem [#allocation14], %s6128_s23 }
 0x10a   : > { %v500_v0 = vld [vmem:[#allocation6] sm:$0xff]  ;;  %v501_v1 = vld [vmem:[#allocation6 + $0x8] sm:$0xff]  ;;  %v502_v2 = vld [vmem:[#allocation6 + $0x10] sm:$0xff]  ;;  %v6733_v3 = vmov 0.0|0.0   ;;  %v6734_v6 = vmov 0   ;;  %vm518_vm0 = vcmask 130048  }
 0x10b   : > { %5591 = vmatprep.subr.bf16.mxu0 %v6733_v3  ;;  %v5592_v4 = vpack.c.bf16 %v501_v1, %v500_v0  ;;  %v503_v5 = vld [vmem:[#allocation6 + $0x18] sm:$0xff]  ;;  %6312 = vset.pattern.permute.xlu0 %v6734_v6  ;;  %v504_v8 = vld [vmem:[#allocation6 + $0x20] sm:$0xff]  ;;  %v505_v9 = vld [vmem:[#allocation6 + $0x28] sm:$0xff]  ;;  %s9642_s28 = sld [smem:[#allocation72_spill]]  ;;  %s9643_s19 = sld [smem:[#allocation70_spill]]  ;;  %vm1512_vm1 = vcmask 261120  }
 0x10c   : > { %6313 = vset.pattern.permute.xlu1 %v6734_v6  ;;  %v5595_v7 = vpack.c.bf16 %v503_v5, %v502_v2  ;;  %v506_v10 = vld [vmem:[#allocation6 + $0x30] sm:$0xff]  ;;  %v7154_v11 = vld [vmem:[%s7124_s10 + $0x8] sm:$0xff]  ;;  %v7157_v12 = vld [vmem:[%s7124_s10 + $0x18] sm:$0xff]  ;;  %v5598_v13 = vpack.c.bf16 %v505_v9, %v504_v8  ;;  %s9645_s29 = sld [smem:[#allocation74_spill]]  ;;  %s9737_s1 = sld [smem:[#allocation69_spill]] }
 0x10d   : > { %5593 = vmatpush1.bf16.msra.mxu0 %v5592_v4  ;;  %9636 = vst [vmem:[#allocation28_spill] sm:$0xff] %v7154_v11  ;;  %9637 = vst [vmem:[#allocation29_spill] sm:$0xff] %v7157_v12  ;;  %v507_v14 = vld [vmem:[#allocation6 + $0x38] sm:$0xff]  ;;  %4972 = vmatprep.mubr.msk.f32.mxu0 %vm518_vm0, %v7154_v11  ;;  %v7164_v16 = vld [vmem:[%s7124_s10] sm:$0xff] }
 0x10e   : > { %5594 = vmatprep.subr.bf16.mxu0 %v6733_v3  ;;  %9638 = vst [vmem:[#allocation30_spill] sm:$0xff] %v7164_v16  ;;  %v7167_v17 = vld [vmem:[%s7124_s10 + $0x10] sm:$0xff]  ;;  %v7173_v19 = vld [vmem:[%s7124_s10 + $0x20] sm:$0xff]  ;;  %v5601_v25 = vpack.c.bf16 %v507_v14, %v506_v10  ;;  %v509_v28 = vld [vmem:[#allocation6 + $0x48] sm:$0xff] }
 0x10f   : > { %9639 = vst [vmem:[#allocation31_spill] sm:$0xff] %v7167_v17  ;;  %9640 = vst [vmem:[#allocation32_spill] sm:$0xff] %v7173_v19  ;;  %v7176_v20 = vld [vmem:[%s7124_s10 + $0x30] sm:$0xff]  ;;  %v508_v27 = vld [vmem:[#allocation6 + $0x40] sm:$0xff] }
 0x110   : > { %9641 = vst [vmem:[#allocation33_spill] sm:$0xff] %v7176_v20  ;;  %v5604_v30 = vpack.c.bf16 %v509_v28, %v508_v27  ;;  %v510_v32 = vld [vmem:[#allocation6 + $0x50] sm:$0xff]  ;;  %v511_v33 = vld [vmem:[#allocation6 + $0x58] sm:$0xff]  ;;  %v512_v37 = vld [vmem:[#allocation6 + $0x60] sm:$0xff] }
 0x111   : > { %5596 = vmatpush1.bf16.msra.mxu0 %v5595_v7  ;;  %v760_v21 = vld [vmem:[%s9642_s28 + $0x80] sm:$0xff]  ;;  %v761_v24 = vld [vmem:[%s9642_s28 + $0x88] sm:$0xff]  ;;  %v762_v29 = vld [vmem:[%s9642_s28 + $0x90] sm:$0xff]  ;;  %v5607_v35 = vpack.c.bf16 %v511_v33, %v510_v32  ;;  %s9644_s4 = smov %s9643_s19 }
 0x112   : > { %5597 = vmatprep.subr.bf16.mxu0 %v6733_v3  ;;  %954 = vperm.xlu0 %6312, %v760_v21   ;;  %v744_v23 = vld [vmem:[%s9642_s28] sm:$0xff]  ;;  %v745_v26 = vld [vmem:[%s9642_s28 + $0x8] sm:$0xff]  ;;  %v763_v31 = vld [vmem:[%s9642_s28 + $0x98] sm:$0xff] }
 0x113   : > { %874 = vperm.xlu1 %6313, %v744_v23   ;;  %v746_v34 = vld [vmem:[%s9642_s28 + $0x10] sm:$0xff]  ;;  %v747_v36 = vld [vmem:[%s9642_s28 + $0x18] sm:$0xff]  ;;  %v764_v39 = vld [vmem:[%s9642_s28 + $0xa0] sm:$0xff] }
 0x114   : > { %v513_v38 = vld [vmem:[#allocation6 + $0x68] sm:$0xff]  ;;  %v765_v41 = vld [vmem:[%s9642_s28 + $0xa8] sm:$0xff]  ;;  %v514_v42 = vld [vmem:[#allocation6 + $0x70] sm:$0xff] }
 0x115   : > { %5599 = vmatpush1.bf16.msra.mxu0 %v5598_v13  ;;  %v5610_v40 = vpack.c.bf16 %v513_v38, %v512_v37  ;;  %v515_v43 = vld [vmem:[#allocation6 + $0x78] sm:$0xff]  ;;  %v748_v44 = vld [vmem:[%s9642_s28 + $0x20] sm:$0xff]  ;;  %v516_v47 = vld [vmem:[#allocation6 + $0x80] sm:$0xff] }
 0x116   : > { %5600 = vmatprep.subr.bf16.mxu0 %v6733_v3  ;;  %959 = vperm.xlu0 %6312, %v761_v24   ;;  %v5613_v45 = vpack.c.bf16 %v515_v43, %v514_v42  ;;  %v749_v46 = vld [vmem:[%s9642_s28 + $0x28] sm:$0xff]  ;;  %v517_v48 = vld [vmem:[#allocation6 + $0x88] sm:$0xff]  ;;  %v766_v49 = vld [vmem:[%s9642_s28 + $0xb0] sm:$0xff] }
 0x117   : > { %879 = vperm.xlu1 %6313, %v745_v26   ;;  %v5616_v50 = vpack.c.bf16 %v517_v48, %v516_v47  ;;  %v767_v51 = vld [vmem:[%s9642_s28 + $0xb8] sm:$0xff]  ;;  %v750_v52 = vld [vmem:[%s9642_s28 + $0x30] sm:$0xff]  ;;  %v768_v54 = vld [vmem:[%s9642_s28 + $0xc0] sm:$0xff] }
 0x118   : > { %v751_v53 = vld [vmem:[%s9642_s28 + $0x38] sm:$0xff]  ;;  %v769_v55 = vld [vmem:[%s9642_s28 + $0xc8] sm:$0xff]  ;;  %v752_v57 = vld [vmem:[%s9642_s28 + $0x40] sm:$0xff] }
 0x119   : > { %5602 = vmatpush1.bf16.msra.mxu0 %v5601_v25  ;;  %v497_v56 = vld [vmem:[%s7124_s10 + $0x28] sm:$0xff]  ;;  %v753_v58 = vld [vmem:[%s9642_s28 + $0x48] sm:$0xff]  ;;  %v770_v60 = vld [vmem:[%s9642_s28 + $0xd0] sm:$0xff] }
 0x11a   : > { %5603 = vmatprep.subr.bf16.mxu0 %v6733_v3  ;;  %964 = vperm.xlu0 %6312, %v762_v29   ;;  %v499_v59 = vld [vmem:[%s7124_s10 + $0x38] sm:$0xff]  ;;  %v771_v61 = vld [vmem:[%s9642_s28 + $0xd8] sm:$0xff]  ;;  %v754_v62 = vld [vmem:[%s9642_s28 + $0x50] sm:$0xff] }
 0x11b   : > { %969 = vperm.xlu1 %6313, %v763_v31   ;;  %v755_v63 = vld [vmem:[%s9642_s28 + $0x58] sm:$0xff]  ;;  %v772_v0 = vld [vmem:[%s9642_s28 + $0xe0] sm:$0xff]  ;;  %v773_v1 = vld [vmem:[%s9642_s28 + $0xe8] sm:$0xff] }
 0x11c   : > { %v756_v2 = vld [vmem:[%s9642_s28 + $0x60] sm:$0xff]  ;;  %v774_v4 = vld [vmem:[%s9642_s28 + $0xf0] sm:$0xff]  ;;  %v775_v5 = vld [vmem:[%s9642_s28 + $0xf8] sm:$0xff] }
 0x11d   : > { %5605 = vmatpush1.bf16.msra.mxu0 %v5604_v30  ;;  %v758_v6 = vld [vmem:[%s9642_s28 + $0x70] sm:$0xff]  ;;  %v759_v7 = vld [vmem:[%s9642_s28 + $0x78] sm:$0xff]  ;;  %v792_v8 = vld [vmem:[%s9642_s28 + $0x180] sm:$0xff] }
 0x11e   : > { %5606 = vmatprep.subr.bf16.mxu0 %v6733_v3  ;;  %884 = vperm.xlu0 %6312, %v746_v34   ;;  %v793_v9 = vld [vmem:[%s9642_s28 + $0x188] sm:$0xff]  ;;  %v776_v10 = vld [vmem:[%s9642_s28 + $0x100] sm:$0xff]  ;;  %v794_v14 = vld [vmem:[%s9642_s28 + $0x190] sm:$0xff] }
 0x11f   : > { %889 = vperm.xlu1 %6313, %v747_v36   ;;  %v777_v13 = vld [vmem:[%s9642_s28 + $0x108] sm:$0xff]  ;;  %v795_v21 = vld [vmem:[%s9642_s28 + $0x198] sm:$0xff]  ;;  %v778_v23 = vld [vmem:[%s9642_s28 + $0x110] sm:$0xff] }
 0x120   : > { %v779_v24 = vld [vmem:[%s9642_s28 + $0x118] sm:$0xff]  ;;  %v796_v25 = vld [vmem:[%s9642_s28 + $0x1a0] sm:$0xff]  ;;  %v797_v26 = vld [vmem:[%s9642_s28 + $0x1a8] sm:$0xff] }
 0x121   : > { %5608 = vmatpush1.bf16.msra.mxu0 %v5607_v35  ;;  %v780_v27 = vld [vmem:[%s9642_s28 + $0x120] sm:$0xff]  ;;  %v781_v28 = vld [vmem:[%s9642_s28 + $0x128] sm:$0xff]  ;;  %v798_v29 = vld [vmem:[%s9642_s28 + $0x1b0] sm:$0xff] }
 0x122   : > { %5609 = vmatprep.subr.bf16.mxu0 %v6733_v3  ;;  %974 = vperm.xlu0 %6312, %v764_v39   ;;  %v799_v30 = vld [vmem:[%s9642_s28 + $0x1b8] sm:$0xff]  ;;  %v782_v31 = vld [vmem:[%s9642_s28 + $0x130] sm:$0xff]  ;;  %v800_v33 = vld [vmem:[%s9642_s28 + $0x1c0] sm:$0xff] }
 0x123   : > { %979 = vperm.xlu1 %6313, %v765_v41   ;;  %v783_v32 = vld [vmem:[%s9642_s28 + $0x138] sm:$0xff]  ;;  %v801_v34 = vld [vmem:[%s9642_s28 + $0x1c8] sm:$0xff]  ;;  %v784_v35 = vld [vmem:[%s9642_s28 + $0x140] sm:$0xff] }
 0x124   : > { %v785_v36 = vld [vmem:[%s9642_s28 + $0x148] sm:$0xff]  ;;  %v802_v37 = vld [vmem:[%s9642_s28 + $0x1d0] sm:$0xff]  ;;  %v803_v38 = vld [vmem:[%s9642_s28 + $0x1d8] sm:$0xff] }
 0x125   : > { %5611 = vmatpush1.bf16.msra.mxu0 %v5610_v40  ;;  %v786_v39 = vld [vmem:[%s9642_s28 + $0x150] sm:$0xff]  ;;  %v787_v40 = vld [vmem:[%s9642_s28 + $0x158] sm:$0xff]  ;;  %v804_v41 = vld [vmem:[%s9642_s28 + $0x1e0] sm:$0xff] }
 0x126   : > { %5612 = vmatprep.subr.bf16.mxu0 %v6733_v3  ;;  %894 = vperm.xlu0 %6312, %v748_v44   ;;  %v805_v42 = vld [vmem:[%s9642_s28 + $0x1e8] sm:$0xff]  ;;  %v788_v43 = vld [vmem:[%s9642_s28 + $0x160] sm:$0xff]  ;;  %v790_v47 = vld [vmem:[%s9642_s28 + $0x170] sm:$0xff] }
 0x127   : > { %899 = vperm.xlu1 %6313, %v749_v46   ;;  %v789_v44 = vld [vmem:[%s9642_s28 + $0x168] sm:$0xff]  ;;  %v807_v46 = vld [vmem:[%s9642_s28 + $0x1f8] sm:$0xff] }
 0x128   : > { %v791_v48 = vld [vmem:[%s9642_s28 + $0x178] sm:$0xff] }
 0x129   : > { %5614 = vmatpush1.bf16.msra.mxu0 %v5613_v45  ;;  %v806_v45 = vld [vmem:[%s9642_s28 + $0x1f0] sm:$0xff] }
 0x12a   : > { %5615 = vmatprep.subr.bf16.mxu0 %v6733_v3  ;;  %984 = vperm.xlu0 %6312, %v766_v49   ;;  %v757_v3 = vld [vmem:[%s9642_s28 + $0x68] sm:$0xff]  ;;  %v824_v49 = vld [vmem:[%s9642_s28 + $0x280] sm:$0xff] }
 0x12b   : > { %989 = vperm.xlu1 %6313, %v767_v51   ;;  %v616_v51 = vld [vmem:[%s9643_s19] sm:$0xff] }
 0x12d   : > { %5617 = vmatpush1.bf16.msra.mxu0 %v5616_v50  ;;  %v825_v50 = vld [vmem:[%s9642_s28 + $0x288] sm:$0xff] }
 0x12e   : > { %904 = vperm.xlu0 %6312, %v750_v52   ;;  %v808_v52 = vld [vmem:[%s9642_s28 + $0x200] sm:$0xff] }
 0x12f   : > { %909 = vperm.xlu1 %6313, %v751_v53   ;;  %v634_v53 = vld [vmem:[%s9644_s4 + $0x90] sm:$0xff] }
 0x130   : > { %596 = vmatmul.mubr.f32.vlgmr.msra.gmra.mrb[0].mxu0 %v7164_v16  ;;  %5426 = vmatprep.mubr.msk.f32.mxu1 %vm1512_vm1, %v634_v53  ;;  %v844_v53 = vld [vmem:[%s9642_s28 + $0x320] sm:$0xff]  ;;  %v725_v16 = vld [vmem:[%s9644_s4 + $0x368] sm:$0xff] }
 0x131   : > { %4973 = vmatprep.mubr.msk.f32.mxu0 %vm518_vm0, %v7157_v12 }
 0x132   : > { %994 = vperm.xlu0 %6312, %v768_v54   ;;  %v809_v54 = vld [vmem:[%s9642_s28 + $0x208] sm:$0xff] }
 0x133   : > { %999 = vperm.xlu1 %6313, %v769_v55   ;;  %v826_v55 = vld [vmem:[%s9642_s28 + $0x290] sm:$0xff] }
 0x134   : > { %601 = vmatmul.mubr.f32.gmra.mrb[2].mxu0 %v7167_v17 }
 0x135   : > { %4974 = vmatprep.mubr.msk.f32.mxu0 %vm518_vm0, %v497_v56  ;;  %v827_v56 = vld [vmem:[%s9642_s28 + $0x298] sm:$0xff] }
 0x136   : > { %914 = vperm.xlu0 %6312, %v752_v57   ;;  %v810_v57 = vld [vmem:[%s9642_s28 + $0x210] sm:$0xff] }
 0x137   : > { %919 = vperm.xlu1 %6313, %v753_v58   ;;  %v811_v58 = vld [vmem:[%s9642_s28 + $0x218] sm:$0xff] }
 0x138   : > { %606 = vmatmul.mubr.f32.gmra.mrb[4].mxu0 %v7173_v19 }
 0x139   : > { %4975 = vmatprep.mubr.msk.f32.mxu0 %vm518_vm0, %v499_v59  ;;  %v828_v59 = vld [vmem:[%s9642_s28 + $0x2a0] sm:$0xff] }
 0x13a   : > { %1004 = vperm.xlu0 %6312, %v770_v60   ;;  %v829_v60 = vld [vmem:[%s9642_s28 + $0x2a8] sm:$0xff] }
 0x13b   : > { %1009 = vperm.xlu1 %6313, %v771_v61   ;;  %v812_v61 = vld [vmem:[%s9642_s28 + $0x220] sm:$0xff] }
 0x13c   : > { %611 = vmatmul.mubr.f32.gmra.mrb[6].mxu0 %v7176_v20 }
 0x13d   : > { %5399 = vmatprep.mubr.msk.f32.mxu0 %vm1512_vm1, %v616_v51  ;;  %v861_v51 = vld [vmem:[%s9642_s28 + $0x3a8] sm:$0xff] }
 0x13e   : > { %924 = vperm.xlu0 %6312, %v754_v62   ;;  %v813_v62 = vld [vmem:[%s9642_s28 + $0x228] sm:$0xff] }
 0x13f   : > { %929 = vperm.xlu1 %6313, %v755_v63   ;;  %v830_v63 = vld [vmem:[%s9642_s28 + $0x2b0] sm:$0xff] }
 0x142   : > { %1014 = vperm.xlu0 %6312, %v772_v0   ;;  %v831_v0 = vld [vmem:[%s9642_s28 + $0x2b8] sm:$0xff] }
 0x143   : > { %1019 = vperm.xlu1 %6313, %v773_v1   ;;  %v814_v1 = vld [vmem:[%s9642_s28 + $0x230] sm:$0xff] }
 0x146   : > { %934 = vperm.xlu0 %6312, %v756_v2   ;;  %v815_v2 = vld [vmem:[%s9642_s28 + $0x238] sm:$0xff] }
 0x147   : > { %939 = vperm.xlu1 %6313, %v757_v3   ;;  %v832_v3 = vld [vmem:[%s9642_s28 + $0x2c0] sm:$0xff] }
 0x14a   : > { %1024 = vperm.xlu0 %6312, %v774_v4   ;;  %v833_v4 = vld [vmem:[%s9642_s28 + $0x2c8] sm:$0xff] }
 0x14b   : > { %1029 = vperm.xlu1 %6313, %v775_v5   ;;  %v816_v5 = vld [vmem:[%s9642_s28 + $0x240] sm:$0xff] }
 0x14e   : > { %944 = vperm.xlu0 %6312, %v758_v6   ;;  %v817_v6 = vld [vmem:[%s9642_s28 + $0x248] sm:$0xff] }
 0x14f   : > { %949 = vperm.xlu1 %6313, %v759_v7   ;;  %v834_v7 = vld [vmem:[%s9642_s28 + $0x2d0] sm:$0xff] }
 0x152   : > { %1114 = vperm.xlu0 %6312, %v792_v8   ;;  %v835_v8 = vld [vmem:[%s9642_s28 + $0x2d8] sm:$0xff] }
 0x153   : > { %1119 = vperm.xlu1 %6313, %v793_v9  }
 0x156   : > { %1034 = vperm.xlu0 %6312, %v776_v10  }
 0x157   : > { %1039 = vperm.xlu1 %6313, %v777_v13   ;;  %v818_v13 = vld [vmem:[%s9642_s28 + $0x250] sm:$0xff] }
 0x15a   : > { %1124 = vperm.xlu0 %6312, %v794_v14   ;;  %v819_v14 = vld [vmem:[%s9642_s28 + $0x258] sm:$0xff] }
 0x15b   : > { %1129 = vperm.xlu1 %6313, %v795_v21  }
 0x15e   : > { %1044 = vperm.xlu0 %6312, %v778_v23   ;;  %v836_v23 = vld [vmem:[%s9642_s28 + $0x2e0] sm:$0xff] }
 0x15f   : > { %1049 = vperm.xlu1 %6313, %v779_v24   ;;  %v837_v24 = vld [vmem:[%s9642_s28 + $0x2e8] sm:$0xff] }
 0x162   : > { %1134 = vperm.xlu0 %6312, %v796_v25  }
 0x163   : > { %1139 = vperm.xlu1 %6313, %v797_v26   ;;  %v820_v26 = vld [vmem:[%s9642_s28 + $0x260] sm:$0xff] }
 0x166   : > { %1054 = vperm.xlu0 %6312, %v780_v27   ;;  %v821_v27 = vld [vmem:[%s9642_s28 + $0x268] sm:$0xff] }
 0x167   : > { %1059 = vperm.xlu1 %6313, %v781_v28  }
 0x16a   : > { %1144 = vperm.xlu0 %6312, %v798_v29  }
 0x16b   : > { %1149 = vperm.xlu1 %6313, %v799_v30   ;;  %v838_v30 = vld [vmem:[%s9642_s28 + $0x2f0] sm:$0xff] }
 0x16e   : > { %1064 = vperm.xlu0 %6312, %v782_v31   ;;  %v839_v31 = vld [vmem:[%s9642_s28 + $0x2f8] sm:$0xff] }
 0x16f   : > { %1069 = vperm.xlu1 %6313, %v783_v32  }
 0x172   : > { %1154 = vperm.xlu0 %6312, %v800_v33   ;;  %v822_v33 = vld [vmem:[%s9642_s28 + $0x270] sm:$0xff] }
 0x173   : > { %1159 = vperm.xlu1 %6313, %v801_v34   ;;  %v823_v34 = vld [vmem:[%s9642_s28 + $0x278] sm:$0xff] }
 0x176   : > { %1074 = vperm.xlu0 %6312, %v784_v35  }
 0x177   : > { %1079 = vperm.xlu1 %6313, %v785_v36   ;;  %v856_v36 = vld [vmem:[%s9642_s28 + $0x380] sm:$0xff] }
 0x17a   : > { %1164 = vperm.xlu0 %6312, %v802_v37   ;;  %v857_v37 = vld [vmem:[%s9642_s28 + $0x388] sm:$0xff] }
 0x17b   : > { %1169 = vperm.xlu1 %6313, %v803_v38  }
 0x17e   : > { %1084 = vperm.xlu0 %6312, %v786_v39  }
 0x17f   : > { %1089 = vperm.xlu1 %6313, %v787_v40   ;;  %v840_v40 = vld [vmem:[%s9642_s28 + $0x300] sm:$0xff] }
 0x182   : > { %1174 = vperm.xlu0 %6312, %v804_v41   ;;  %v841_v41 = vld [vmem:[%s9642_s28 + $0x308] sm:$0xff] }
 0x183   : > { %1179 = vperm.xlu1 %6313, %v805_v42  }
 0x186   : > { %1094 = vperm.xlu0 %6312, %v788_v43   ;;  %v858_v43 = vld [vmem:[%s9642_s28 + $0x390] sm:$0xff] }
 0x187   : > { %1099 = vperm.xlu1 %6313, %v789_v44   ;;  %v859_v44 = vld [vmem:[%s9642_s28 + $0x398] sm:$0xff] }
 0x18a   : > { %1184 = vperm.xlu0 %6312, %v806_v45  }
 0x18b   : > { %1189 = vperm.xlu1 %6313, %v807_v46   ;;  %v842_v46 = vld [vmem:[%s9642_s28 + $0x310] sm:$0xff] }
 0x18e   : > { %1104 = vperm.xlu0 %6312, %v790_v47   ;;  %v843_v47 = vld [vmem:[%s9642_s28 + $0x318] sm:$0xff] }
 0x18f   : > { %1109 = vperm.xlu1 %6313, %v791_v48  }
 0x191   : > { %v7462_v9 = vpop.permute.xlu0 %954 }
 0x192   : > { %1274 = vperm.xlu0 %6312, %v824_v49   ;;  %v7464_v10 = vpop.permute.xlu1 %874 }
 0x193   : > { %1279 = vperm.xlu1 %6313, %v825_v50   ;;  %v860_v50 = vld [vmem:[%s9642_s28 + $0x3a0] sm:$0xff] }
 0x195   : > { %v7472_v21 = vpop.permute.xlu0 %959 }
 0x196   : > { %1194 = vperm.xlu0 %6312, %v808_v52   ;;  %v7480_v25 = vpop.permute.xlu1 %879 }
 0x197   : > { %1199 = vperm.xlu1 %6313, %v809_v54   ;;  %v845_v54 = vld [vmem:[%s9642_s28 + $0x328] sm:$0xff] }
 0x199   : > { %v7488_v28 = vpop.permute.xlu0 %964 }
 0x19a   : > { %1284 = vperm.xlu0 %6312, %v826_v55   ;;  %v7490_v29 = vpop.permute.xlu1 %969 }
 0x19b   : > { %1289 = vperm.xlu1 %6313, %v827_v56   ;;  %v862_v56 = vld [vmem:[%s9642_s28 + $0x3b0] sm:$0xff] }
 0x19d   : > { %v7498_v32 = vpop.permute.xlu0 %884 }
 0x19e   : > { %1204 = vperm.xlu0 %6312, %v810_v57   ;;  %v7506_v35 = vpop.permute.xlu1 %889  ;;  %v863_v57 = vld [vmem:[%s9642_s28 + $0x3b8] sm:$0xff] }
 0x19f   : > { %1209 = vperm.xlu1 %6313, %v811_v58  }
 0x1a1   : > { %v7514_v38 = vpop.permute.xlu0 %974 }
 0x1a2   : > { %1294 = vperm.xlu0 %6312, %v828_v59   ;;  %v7516_v39 = vpop.permute.xlu1 %979 }
 0x1a3   : > { %1299 = vperm.xlu1 %6313, %v829_v60   ;;  %v846_v60 = vld [vmem:[%s9642_s28 + $0x330] sm:$0xff] }
 0x1a5   : > { %v7524_v42 = vpop.permute.xlu0 %894 }
 0x1a6   : > { %1214 = vperm.xlu0 %6312, %v812_v61   ;;  %v7532_v45 = vpop.permute.xlu1 %899  ;;  %v847_v61 = vld [vmem:[%s9642_s28 + $0x338] sm:$0xff] }
 0x1a7   : > { %1219 = vperm.xlu1 %6313, %v813_v62  }
 0x1a9   : > { %v7540_v48 = vpop.permute.xlu0 %984 }
 0x1aa   : > { %1304 = vperm.xlu0 %6312, %v830_v63   ;;  %v7542_v49 = vpop.permute.xlu1 %989  ;;  %v864_v63 = vld [vmem:[%s9642_s28 + $0x3c0] sm:$0xff] }
 0x1ab   : > { %1309 = vperm.xlu1 %6313, %v831_v0   ;;  %v865_v0 = vld [vmem:[%s9642_s28 + $0x3c8] sm:$0xff] }
 0x1ad   : > { %v7550_v52 = vpop.permute.xlu0 %904 }
 0x1ae   : > { %1224 = vperm.xlu0 %6312, %v814_v1   ;;  %v7558_v55 = vpop.permute.xlu1 %909 }
 0x1af   : > { %1229 = vperm.xlu1 %6313, %v815_v2   ;;  %v848_v2 = vld [vmem:[%s9642_s28 + $0x340] sm:$0xff] }
 0x1b1   : > { %v7566_v58 = vpop.permute.xlu0 %994 }
 0x1b2   : > { %1314 = vperm.xlu0 %6312, %v832_v3   ;;  %v7568_v59 = vpop.permute.xlu1 %999  ;;  %v849_v3 = vld [vmem:[%s9642_s28 + $0x348] sm:$0xff] }
 0x1b3   : > { %1319 = vperm.xlu1 %6313, %v833_v4  }
 0x1b5   : > { %v7576_v62 = vpop.permute.xlu0 %914 }
 0x1b6   : > { %1234 = vperm.xlu0 %6312, %v816_v5   ;;  %v7584_v1 = vpop.permute.xlu1 %919 }
 0x1b7   : > { %1239 = vperm.xlu1 %6313, %v817_v6   ;;  %v866_v6 = vld [vmem:[%s9642_s28 + $0x3d0] sm:$0xff] }
 0x1b9   : > { %v7592_v4 = vpop.permute.xlu0 %1004 }
 0x1ba   : > { %1324 = vperm.xlu0 %6312, %v834_v7   ;;  %v7594_v5 = vpop.permute.xlu1 %1009  ;;  %v867_v7 = vld [vmem:[%s9642_s28 + $0x3d8] sm:$0xff] }
 0x1bb   : > { %1329 = vperm.xlu1 %6313, %v835_v8  }
 0x1bd   : > { %v7602_v8 = vpop.permute.xlu0 %924 }
 0x1be   : > { %1244 = vperm.xlu0 %6312, %v818_v13   ;;  %v850_v13 = vld [vmem:[%s9642_s28 + $0x350] sm:$0xff] }
 0x1bf   : > { %1249 = vperm.xlu1 %6313, %v819_v14   ;;  %v851_v14 = vld [vmem:[%s9642_s28 + $0x358] sm:$0xff] }
 0x1c2   : > { %1334 = vperm.xlu0 %6312, %v836_v23   ;;  %v7610_v23 = vpop.permute.xlu1 %929 }
 0x1c3   : > { %1339 = vperm.xlu1 %6313, %v837_v24   ;;  %v868_v24 = vld [vmem:[%s9642_s28 + $0x3e0] sm:$0xff] }
 0x1c6   : > { %1254 = vperm.xlu0 %6312, %v820_v26   ;;  %v869_v26 = vld [vmem:[%s9642_s28 + $0x3e8] sm:$0xff] }
 0x1c7   : > { %1259 = vperm.xlu1 %6313, %v821_v27   ;;  %v7618_v27 = vpop.permute.xlu0 %1014 }
 0x1ca   : > { %1344 = vperm.xlu0 %6312, %v838_v30  }
 0x1cb   : > { %1349 = vperm.xlu1 %6313, %v839_v31   ;;  %v7620_v31 = vpop.permute.xlu1 %1019 }
 0x1ce   : > { %1264 = vperm.xlu0 %6312, %v822_v33  }
 0x1cf   : > { %1269 = vperm.xlu1 %6313, %v823_v34   ;;  %v852_v34 = vld [vmem:[%s9642_s28 + $0x360] sm:$0xff] }
 0x1d2   : > { %1434 = vperm.xlu0 %6312, %v856_v36   ;;  %v853_v36 = vld [vmem:[%s9642_s28 + $0x368] sm:$0xff] }
 0x1d3   : > { %1439 = vperm.xlu1 %6313, %v857_v37  }
 0x1d6   : > { %1354 = vperm.xlu0 %6312, %v840_v40   ;;  %v7628_v40 = vpop.permute.xlu0 %934 }
 0x1d7   : > { %1359 = vperm.xlu1 %6313, %v841_v41  }
 0x1da   : > { %1444 = vperm.xlu0 %6312, %v858_v43  }
 0x1db   : > { %1449 = vperm.xlu1 %6313, %v859_v44   ;;  %v870_v44 = vld [vmem:[%s9642_s28 + $0x3f0] sm:$0xff] }
 0x1de   : > { %1364 = vperm.xlu0 %6312, %v842_v46   ;;  %v871_v46 = vld [vmem:[%s9642_s28 + $0x3f8] sm:$0xff] }
 0x1df   : > { %1369 = vperm.xlu1 %6313, %v843_v47   ;;  %v7636_v47 = vpop.permute.xlu1 %939 }
 0x1e2   : > { %1454 = vperm.xlu0 %6312, %v860_v50  }
 0x1e3   : > { %1459 = vperm.xlu1 %6313, %v861_v51  }
 0x1e6   : > { %1374 = vperm.xlu0 %6312, %v844_v53   ;;  %v854_v53 = vld [vmem:[%s9642_s28 + $0x370] sm:$0xff] }
 0x1e7   : > { %1379 = vperm.xlu1 %6313, %v845_v54   ;;  %v855_v54 = vld [vmem:[%s9642_s28 + $0x378] sm:$0xff] }
 0x1ea   : > { %1464 = vperm.xlu0 %6312, %v862_v56   ;;  %v7644_v56 = vpop.permute.xlu0 %1024 }
 0x1eb   : > { %1469 = vperm.xlu1 %6313, %v863_v57  }
 0x1ee   : > { %1384 = vperm.xlu0 %6312, %v846_v60   ;;  %v7646_v60 = vpop.permute.xlu1 %1029 }
 0x1ef   : > { %1389 = vperm.xlu1 %6313, %v847_v61  }
 0x1f2   : > { %1474 = vperm.xlu0 %6312, %v864_v63  }
 0x1f3   : > { %1479 = vperm.xlu1 %6313, %v865_v0   ;;  %v3275_v0 = vld [vmem:[%s9645_s29] sm:$0xff] }
 0x1f6   : > { %1394 = vperm.xlu0 %6312, %v848_v2   ;;  %v617_v2 = vld [vmem:[%s9644_s4 + $0x8] sm:$0xff] }
 0x1f7   : > { %1399 = vperm.xlu1 %6313, %v849_v3   ;;  %v635_v3 = vld [vmem:[%s9644_s4 + $0x98] sm:$0xff] }
 0x1fa   : > { %1484 = vperm.xlu0 %6312, %v866_v6   ;;  %v7657_v6 = vpop.permute.xlu0 %944 }
 0x1fb   : > { %1489 = vperm.xlu1 %6313, %v867_v7   ;;  %v618_v7 = vld [vmem:[%s9644_s4 + $0x10] sm:$0xff] }
 0x1fe   : > { %1404 = vperm.xlu0 %6312, %v850_v13   ;;  %v636_v13 = vld [vmem:[%s9644_s4 + $0xa0] sm:$0xff] }
 0x1ff   : > { %1409 = vperm.xlu1 %6313, %v851_v14   ;;  %v619_v14 = vld [vmem:[%s9644_s4 + $0x18] sm:$0xff] }
 0x202   : > { %1494 = vperm.xlu0 %6312, %v868_v24   ;;  %v637_v24 = vld [vmem:[%s9644_s4 + $0xa8] sm:$0xff] }
 0x203   : > { %v597_v30 = vpop.f32.mrb[0].mxu0  ;;  %1499 = vperm.xlu1 %6313, %v869_v26   ;;  %v620_v26 = vld [vmem:[%s9644_s4 + $0x20] sm:$0xff] }
 0x204   : > { %v599_v33 = vpop.f32.mrb[1].mxu0 }
 0x205   : > { %v621_v33 = vld [vmem:[%s9644_s4 + $0x28] sm:$0xff] }
 0x206   : > { %1414 = vperm.xlu0 %6312, %v852_v34   ;;  %v639_v34 = vld [vmem:[%s9644_s4 + $0xb8] sm:$0xff] }
 0x207   : > { %v602_v37 = vpop.f32.mrb[2].mxu0  ;;  %1419 = vperm.xlu1 %6313, %v853_v36   ;;  %v622_v36 = vld [vmem:[%s9644_s4 + $0x30] sm:$0xff] }
 0x208   : > { %v5618_v41 = vpack.c.bf16 %v602_v37, %v597_v30  ;;  %v604_v43 = vpop.f32.mrb[3].mxu0  ;;  %v638_v30 = vld [vmem:[%s9644_s4 + $0xb0] sm:$0xff]  ;;  %v640_v37 = vld [vmem:[%s9644_s4 + $0xc0] sm:$0xff] }
 0x209   : > { %v641_v43 = vld [vmem:[%s9644_s4 + $0xc8] sm:$0xff] }
 0x20a   : > { %5619 = vmatprep.subr.bf16.mxu0 %v5618_v41  ;;  %6118 = vmatprep.subr.bf16.mxu1 %v5618_v41 }
 0x20b   : > { %v607_v50 = vpop.f32.mrb[4].mxu0  ;;  %5621 = vmatpush3.bf16.msra.mxu0 %v5618_v41  ;;  %6120 = vmatpush3.bf16.msra.mxu1 %v5618_v41  ;;  %v623_v41 = vld [vmem:[%s9644_s4 + $0x38] sm:$0xff] }
 0x20c   : > { %v609_v51 = vpop.f32.mrb[5].mxu0  ;;  %1504 = vperm.xlu0 %6312, %v870_v44   ;;  %1509 = vperm.xlu1 %6313, %v871_v46   ;;  %v624_v44 = vld [vmem:[%s9644_s4 + $0x40] sm:$0xff]  ;;  %v642_v46 = vld [vmem:[%s9644_s4 + $0xd0] sm:$0xff] }
 0x20d   : > { %v643_v51 = vld [vmem:[%s9644_s4 + $0xd8] sm:$0xff] }
 0x20f   : > { %v612_v57 = vpop.f32.mrb[6].mxu0 }
 0x210   : > { %v5622_v61 = vpack.c.bf16 %v612_v57, %v607_v50  ;;  %v614_v63 = vpop.f32.mrb[7].mxu0  ;;  %1424 = vperm.xlu0 %6312, %v854_v53   ;;  %1429 = vperm.xlu1 %6313, %v855_v54   ;;  %v625_v50 = vld [vmem:[%s9644_s4 + $0x48] sm:$0xff]  ;;  %v626_v53 = vld [vmem:[%s9644_s4 + $0x50] sm:$0xff]  ;;  %v644_v54 = vld [vmem:[%s9644_s4 + $0xe0] sm:$0xff] }
 0x211   : > { %v627_v57 = vld [vmem:[%s9644_s4 + $0x58] sm:$0xff]  ;;  %v628_v63 = vld [vmem:[%s9644_s4 + $0x60] sm:$0xff] }
 0x212   : > { %5623 = vmatprep.subr.bf16.mxu0 %v5622_v61  ;;  %6119 = vmatprep.subr.bf16.mxu1 %v5622_v61 }
 0x213   : > { %5625 = vmatpush3.bf16.msra.mxu0 %v5622_v61  ;;  %6121 = vmatpush3.bf16.msra.mxu1 %v5622_v61  ;;  %v645_v61 = vld [vmem:[%s9644_s4 + $0xe8] sm:$0xff] }
 0x214   : > { %3278 = vperm.xlu0 %6312, %v3275_v0   ;;  %v646_v0 = vld [vmem:[%s9644_s4 + $0xf0] sm:$0xff] }
 0x216   : > { %5400 = vmatmul.mubr.msk.f32.vlgmr.msra.gmra.mrb[8].mxu0 %vm1512_vm1, %v617_v2  ;;  %5427 = vmatmul.mubr.msk.f32.vlgmr.msra.gmra.mrb[0].mxu1 %vm1512_vm1, %v635_v3  ;;  %v629_v2 = vld [vmem:[%s9644_s4 + $0x68] sm:$0xff]  ;;  %v647_v3 = vld [vmem:[%s9644_s4 + $0xf8] sm:$0xff] }
 0x217   : > { %5402 = vmatprep.mubr.msk.f32.mxu0 %vm1512_vm1, %v618_v7  ;;  %5429 = vmatprep.mubr.msk.f32.mxu1 %vm1512_vm1, %v636_v13  ;;  %v630_v7 = vld [vmem:[%s9644_s4 + $0x70] sm:$0xff]  ;;  %v648_v13 = vld [vmem:[%s9644_s4 + $0x100] sm:$0xff] }
 0x21a   : > { %5403 = vmatmul.mubr.msk.f32.gmra.mrb[10].mxu0 %vm1512_vm1, %v619_v14  ;;  %5430 = vmatmul.mubr.msk.f32.gmra.mrb[2].mxu1 %vm1512_vm1, %v637_v24  ;;  %v631_v14 = vld [vmem:[%s9644_s4 + $0x78] sm:$0xff]  ;;  %v649_v24 = vld [vmem:[%s9644_s4 + $0x108] sm:$0xff] }
 0x21b   : > { %5405 = vmatprep.mubr.msk.f32.mxu0 %vm1512_vm1, %v620_v26  ;;  %5432 = vmatprep.mubr.msk.f32.mxu1 %vm1512_vm1, %v638_v30  ;;  %v632_v26 = vld [vmem:[%s9644_s4 + $0x80] sm:$0xff]  ;;  %v650_v30 = vld [vmem:[%s9644_s4 + $0x110] sm:$0xff] }
 0x21e   : > { %5406 = vmatmul.mubr.msk.f32.gmra.mrb[12].mxu0 %vm1512_vm1, %v621_v33  ;;  %5433 = vmatmul.mubr.msk.f32.gmra.mrb[4].mxu1 %vm1512_vm1, %v639_v34  ;;  %v633_v33 = vld [vmem:[%s9644_s4 + $0x88] sm:$0xff]  ;;  %v651_v34 = vld [vmem:[%s9644_s4 + $0x118] sm:$0xff] }
 0x21f   : > { %5408 = vmatprep.mubr.msk.f32.mxu0 %vm1512_vm1, %v622_v36  ;;  %5435 = vmatprep.mubr.msk.f32.mxu1 %vm1512_vm1, %v640_v37  ;;  %v652_v36 = vld [vmem:[%s9644_s4 + $0x120] sm:$0xff]  ;;  %v653_v37 = vld [vmem:[%s9644_s4 + $0x128] sm:$0xff] }
 0x222   : > { %5409 = vmatmul.mubr.msk.f32.gmra.mrb[14].mxu0 %vm1512_vm1, %v623_v41  ;;  %5436 = vmatmul.mubr.msk.f32.gmra.mrb[6].mxu1 %vm1512_vm1, %v641_v43  ;;  %v654_v41 = vld [vmem:[%s9644_s4 + $0x130] sm:$0xff]  ;;  %v655_v43 = vld [vmem:[%s9644_s4 + $0x138] sm:$0xff] }
 0x223   : > { %5411 = vmatprep.mubr.msk.f32.mxu0 %vm1512_vm1, %v624_v44  ;;  %5438 = vmatprep.mubr.msk.f32.mxu1 %vm1512_vm1, %v642_v46  ;;  %v656_v44 = vld [vmem:[%s9644_s4 + $0x140] sm:$0xff]  ;;  %v657_v46 = vld [vmem:[%s9644_s4 + $0x148] sm:$0xff] }
 0x226   : > { %5412 = vmatmul.mubr.msk.f32.gmra.mrb[16].mxu0 %vm1512_vm1, %v625_v50  ;;  %5439 = vmatmul.mubr.msk.f32.gmra.mrb[8].mxu1 %vm1512_vm1, %v643_v51  ;;  %v658_v50 = vld [vmem:[%s9644_s4 + $0x150] sm:$0xff]  ;;  %v659_v51 = vld [vmem:[%s9644_s4 + $0x158] sm:$0xff] }
 0x227   : > { %5414 = vmatprep.mubr.msk.f32.mxu0 %vm1512_vm1, %v626_v53  ;;  %5441 = vmatprep.mubr.msk.f32.mxu1 %vm1512_vm1, %v644_v54  ;;  %v660_v53 = vld [vmem:[%s9644_s4 + $0x160] sm:$0xff]  ;;  %v661_v54 = vld [vmem:[%s9644_s4 + $0x168] sm:$0xff] }
 0x22a   : > { %5415 = vmatmul.mubr.msk.f32.gmra.mrb[18].mxu0 %vm1512_vm1, %v627_v57  ;;  %5442 = vmatmul.mubr.msk.f32.gmra.mrb[10].mxu1 %vm1512_vm1, %v645_v61  ;;  %v662_v57 = vld [vmem:[%s9644_s4 + $0x170] sm:$0xff]  ;;  %v663_v61 = vld [vmem:[%s9644_s4 + $0x178] sm:$0xff] }
 0x22b   : > { %5417 = vmatprep.mubr.msk.f32.mxu0 %vm1512_vm1, %v628_v63  ;;  %5444 = vmatprep.mubr.msk.f32.mxu1 %vm1512_vm1, %v646_v0  ;;  %v664_v63 = vld [vmem:[%s9644_s4 + $0x180] sm:$0xff]  ;;  %v665_v0 = vld [vmem:[%s9644_s4 + $0x188] sm:$0xff] }
 0x22e   : > { %5418 = vmatmul.mubr.msk.f32.gmra.mrb[20].mxu0 %vm1512_vm1, %v629_v2  ;;  %5445 = vmatmul.mubr.msk.f32.gmra.mrb[12].mxu1 %vm1512_vm1, %v647_v3  ;;  %v666_v2 = vld [vmem:[%s9644_s4 + $0x190] sm:$0xff]  ;;  %v667_v3 = vld [vmem:[%s9644_s4 + $0x198] sm:$0xff] }
 0x22f   : > { %5420 = vmatprep.mubr.msk.f32.mxu0 %vm1512_vm1, %v630_v7  ;;  %5447 = vmatprep.mubr.msk.f32.mxu1 %vm1512_vm1, %v648_v13  ;;  %v668_v7 = vld [vmem:[%s9644_s4 + $0x1a0] sm:$0xff]  ;;  %v669_v13 = vld [vmem:[%s9644_s4 + $0x1a8] sm:$0xff] }
 0x232   : > { %5421 = vmatmul.mubr.msk.f32.gmra.mrb[22].mxu0 %vm1512_vm1, %v631_v14  ;;  %5448 = vmatmul.mubr.msk.f32.gmra.mrb[14].mxu1 %vm1512_vm1, %v649_v24  ;;  %v670_v14 = vld [vmem:[%s9644_s4 + $0x1b0] sm:$0xff]  ;;  %v671_v24 = vld [vmem:[%s9644_s4 + $0x1b8] sm:$0xff] }
 0x233   : > { %5423 = vmatprep.mubr.msk.f32.mxu0 %vm1512_vm1, %v632_v26  ;;  %5450 = vmatprep.mubr.msk.f32.mxu1 %vm1512_vm1, %v650_v30  ;;  %v672_v26 = vld [vmem:[%s9644_s4 + $0x1c0] sm:$0xff]  ;;  %v673_v30 = vld [vmem:[%s9644_s4 + $0x1c8] sm:$0xff] }
 0x236   : > { %5424 = vmatmul.mubr.msk.f32.gmra.mrb[24].mxu0 %vm1512_vm1, %v633_v33  ;;  %5451 = vmatmul.mubr.msk.f32.gmra.mrb[16].mxu1 %vm1512_vm1, %v651_v34  ;;  %v674_v33 = vld [vmem:[%s9644_s4 + $0x1d0] sm:$0xff]  ;;  %v675_v34 = vld [vmem:[%s9644_s4 + $0x1d8] sm:$0xff] }
 0x237   : > { %5453 = vmatprep.mubr.msk.f32.mxu1 %vm1512_vm1, %v652_v36  ;;  %v676_v36 = vld [vmem:[%s9644_s4 + $0x1e0] sm:$0xff] }
 0x23a   : > { %5454 = vmatmul.mubr.msk.f32.gmra.mrb[18].mxu1 %vm1512_vm1, %v653_v37  ;;  %v677_v37 = vld [vmem:[%s9644_s4 + $0x1e8] sm:$0xff] }
 0x23b   : > { %5456 = vmatprep.mubr.msk.f32.mxu1 %vm1512_vm1, %v654_v41  ;;  %v678_v41 = vld [vmem:[%s9644_s4 + $0x1f0] sm:$0xff] }
 0x23e   : > { %5457 = vmatmul.mubr.msk.f32.gmra.mrb[20].mxu1 %vm1512_vm1, %v655_v43  ;;  %v679_v43 = vld [vmem:[%s9644_s4 + $0x1f8] sm:$0xff] }
 0x23f   : > { %5459 = vmatprep.mubr.msk.f32.mxu1 %vm1512_vm1, %v656_v44  ;;  %v680_v44 = vld [vmem:[%s9644_s4 + $0x200] sm:$0xff] }
 0x242   : > { %5460 = vmatmul.mubr.msk.f32.gmra.mrb[22].mxu1 %vm1512_vm1, %v657_v46  ;;  %v681_v46 = vld [vmem:[%s9644_s4 + $0x208] sm:$0xff] }
 0x243   : > { %5462 = vmatprep.mubr.msk.f32.mxu1 %vm1512_vm1, %v658_v50  ;;  %v682_v50 = vld [vmem:[%s9644_s4 + $0x210] sm:$0xff] }
 0x246   : > { %5463 = vmatmul.mubr.msk.f32.gmra.mrb[24].mxu1 %vm1512_vm1, %v659_v51  ;;  %v683_v51 = vld [vmem:[%s9644_s4 + $0x218] sm:$0xff] }
 0x247   : > { %5465 = vmatprep.mubr.msk.f32.mxu1 %vm1512_vm1, %v660_v53  ;;  %v684_v53 = vld [vmem:[%s9644_s4 + $0x220] sm:$0xff] }
 0x24a   : > { %5466 = vmatmul.mubr.msk.f32.gmra.mrb[26].mxu1 %vm1512_vm1, %v661_v54  ;;  %v685_v54 = vld [vmem:[%s9644_s4 + $0x228] sm:$0xff] }
 0x24b   : > { %5468 = vmatprep.mubr.msk.f32.mxu1 %vm1512_vm1, %v662_v57  ;;  %v686_v57 = vld [vmem:[%s9644_s4 + $0x230] sm:$0xff] }
 0x24e   : > { %5469 = vmatmul.mubr.msk.f32.gmra.mrb[28].mxu1 %vm1512_vm1, %v663_v61  ;;  %v7927_v61 = vpop.permute.xlu1 %949 }
 0x24f   : > { %5471 = vmatprep.mubr.msk.f32.mxu1 %vm1512_vm1, %v664_v63  ;;  %v687_v63 = vld [vmem:[%s9644_s4 + $0x238] sm:$0xff] }
 0x252   : > { %5472 = vmatmul.mubr.msk.f32.gmra.mrb[30].mxu1 %vm1512_vm1, %v665_v0  ;;  %v688_v0 = vld [vmem:[%s9644_s4 + $0x240] sm:$0xff] }
 0x253   : > { %5474 = vmatprep.mubr.msk.f32.mxu1 %vm1512_vm1, %v666_v2  ;;  %v689_v2 = vld [vmem:[%s9644_s4 + $0x248] sm:$0xff] }
 0x256   : > { %5475 = vmatmul.mubr.msk.f32.gmra.mrb[32].mxu1 %vm1512_vm1, %v667_v3  ;;  %v7942_v3 = vpop.permute.xlu0 %1114 }
 0x257   : > { %5477 = vmatprep.mubr.msk.f32.mxu1 %vm1512_vm1, %v668_v7  ;;  %9646 = vst [vmem:[#allocation34_spill] sm:$0xff] %v7942_v3  ;;  %v7944_v7 = vpop.permute.xlu1 %1119 }
 0x258   : > { %9647 = vst [vmem:[#allocation35_spill] sm:$0xff] %v7944_v7 }
 0x25a   : > { %5478 = vmatmul.mubr.msk.f32.gmra.mrb[34].mxu1 %vm1512_vm1, %v669_v13  ;;  %v690_v13 = vld [vmem:[%s9644_s4 + $0x250] sm:$0xff] }
 0x25b   : > { %5480 = vmatprep.mubr.msk.f32.mxu1 %vm1512_vm1, %v670_v14  ;;  %v691_v14 = vld [vmem:[%s9644_s4 + $0x258] sm:$0xff] }
 0x25e   : > { %5481 = vmatmul.mubr.msk.f32.gmra.mrb[36].mxu1 %vm1512_vm1, %v671_v24  ;;  %v692_v24 = vld [vmem:[%s9644_s4 + $0x260] sm:$0xff] }
 0x25f   : > { %5483 = vmatprep.mubr.msk.f32.mxu1 %vm1512_vm1, %v672_v26  ;;  %v7957_v26 = vpop.permute.xlu0 %1034 }
 0x262   : > { %5484 = vmatmul.mubr.msk.f32.gmra.mrb[38].mxu1 %vm1512_vm1, %v673_v30  ;;  %v7959_v30 = vpop.permute.xlu1 %1039 }
 0x263   : > { %5486 = vmatprep.mubr.msk.f32.mxu1 %vm1512_vm1, %v674_v33  ;;  %v693_v33 = vld [vmem:[%s9644_s4 + $0x268] sm:$0xff] }
 0x266   : > { %5487 = vmatmul.mubr.msk.f32.gmra.mrb[40].mxu1 %vm1512_vm1, %v675_v34  ;;  %v694_v34 = vld [vmem:[%s9644_s4 + $0x270] sm:$0xff] }
 0x267   : > { %5489 = vmatprep.mubr.msk.f32.mxu1 %vm1512_vm1, %v676_v36  ;;  %v695_v36 = vld [vmem:[%s9644_s4 + $0x278] sm:$0xff] }
 0x26a   : > { %5490 = vmatmul.mubr.msk.f32.gmra.mrb[42].mxu1 %vm1512_vm1, %v677_v37  ;;  %v7974_v37 = vpop.permute.xlu0 %1124 }
 0x26b   : > { %5492 = vmatprep.mubr.msk.f32.mxu1 %vm1512_vm1, %v678_v41  ;;  %9648 = vst [vmem:[#allocation36_spill] sm:$0xff] %v7974_v37  ;;  %v7976_v41 = vpop.permute.xlu1 %1129  ;;  %v743_v37 = vld [vmem:[%s9644_s4 + $0x3f8] sm:$0xff] }
 0x26c   : > { %9649 = vst [vmem:[#allocation37_spill] sm:$0xff] %v7976_v41 }
 0x26e   : > { %5493 = vmatmul.mubr.msk.f32.gmra.mrb[44].mxu1 %vm1512_vm1, %v679_v43  ;;  %v696_v43 = vld [vmem:[%s9644_s4 + $0x280] sm:$0xff] }
 0x26f   : > { %5495 = vmatprep.mubr.msk.f32.mxu1 %vm1512_vm1, %v680_v44  ;;  %v697_v44 = vld [vmem:[%s9644_s4 + $0x288] sm:$0xff] }
 0x272   : > { %5496 = vmatmul.mubr.msk.f32.gmra.mrb[46].mxu1 %vm1512_vm1, %v681_v46  ;;  %v698_v46 = vld [vmem:[%s9644_s4 + $0x290] sm:$0xff] }
 0x273   : > { %5498 = vmatprep.mubr.msk.f32.mxu1 %vm1512_vm1, %v682_v50  ;;  %v7989_v50 = vpop.permute.xlu0 %1044 }
 0x276   : > { %5499 = vmatmul.mubr.msk.f32.gmra.mrb[48].mxu1 %vm1512_vm1, %v683_v51  ;;  %v7991_v51 = vpop.permute.xlu1 %1049 }
 0x277   : > { %5501 = vmatprep.mubr.msk.f32.mxu1 %vm1512_vm1, %v684_v53  ;;  %v699_v53 = vld [vmem:[%s9644_s4 + $0x298] sm:$0xff] }
 0x27a   : > { %5502 = vmatmul.mubr.msk.f32.gmra.mrb[50].mxu1 %vm1512_vm1, %v685_v54  ;;  %v700_v54 = vld [vmem:[%s9644_s4 + $0x2a0] sm:$0xff] }
 0x27b   : > { %5504 = vmatprep.mubr.msk.f32.mxu1 %vm1512_vm1, %v686_v57  ;;  %v701_v57 = vld [vmem:[%s9644_s4 + $0x2a8] sm:$0xff] }
 0x27e   : > { %5505 = vmatmul.mubr.msk.f32.gmra.mrb[52].mxu1 %vm1512_vm1, %v687_v63  ;;  %v8006_v63 = vpop.permute.xlu0 %1134 }
 0x27f   : > { %5507 = vmatprep.mubr.msk.f32.mxu1 %vm1512_vm1, %v688_v0  ;;  %9650 = vst [vmem:[#allocation38_spill] sm:$0xff] %v8006_v63  ;;  %v8008_v0 = vpop.permute.xlu1 %1139 }
 0x280   : > { %9651 = vst [vmem:[#allocation39_spill] sm:$0xff] %v8008_v0 }
 0x282   : > { %5508 = vmatmul.mubr.msk.f32.gmra.mrb[54].mxu1 %vm1512_vm1, %v689_v2  ;;  %v702_v2 = vld [vmem:[%s9644_s4 + $0x2b0] sm:$0xff] }
 0x283   : > { %5510 = vmatprep.mubr.msk.f32.mxu1 %vm1512_vm1, %v690_v13  ;;  %v703_v13 = vld [vmem:[%s9644_s4 + $0x2b8] sm:$0xff] }
 0x286   : > { %5511 = vmatmul.mubr.msk.f32.gmra.mrb[56].mxu1 %vm1512_vm1, %v691_v14  ;;  %v704_v14 = vld [vmem:[%s9644_s4 + $0x2c0] sm:$0xff] }
 0x287   : > { %5513 = vmatprep.mubr.msk.f32.mxu1 %vm1512_vm1, %v692_v24  ;;  %v8021_v24 = vpop.permute.xlu0 %1054 }
 0x28a   : > { %5514 = vmatmul.mubr.msk.f32.gmra.mrb[58].mxu1 %vm1512_vm1, %v693_v33  ;;  %v8023_v33 = vpop.permute.xlu1 %1059 }
 0x28b   : > { %5516 = vmatprep.mubr.msk.f32.mxu1 %vm1512_vm1, %v694_v34  ;;  %v705_v34 = vld [vmem:[%s9644_s4 + $0x2c8] sm:$0xff] }
 0x28e   : > { %5517 = vmatmul.mubr.msk.f32.gmra.mrb[60].mxu1 %vm1512_vm1, %v695_v36  ;;  %v706_v36 = vld [vmem:[%s9644_s4 + $0x2d0] sm:$0xff] }
 0x28f   : > { %5519 = vmatprep.mubr.msk.f32.mxu1 %vm1512_vm1, %v696_v43  ;;  %v707_v43 = vld [vmem:[%s9644_s4 + $0x2d8] sm:$0xff] }
 0x292   : > { %5520 = vmatmul.mubr.msk.f32.gmra.mrb[62].mxu1 %vm1512_vm1, %v697_v44  ;;  %v8038_v44 = vpop.permute.xlu0 %1144 }
 0x293   : > { %5522 = vmatprep.mubr.msk.f32.mxu1 %vm1512_vm1, %v698_v46  ;;  %9652 = vst [vmem:[#allocation40_spill] sm:$0xff] %v8038_v44  ;;  %v8040_v46 = vpop.permute.xlu1 %1149 }
 0x294   : > { %9653 = vst [vmem:[#allocation41_spill] sm:$0xff] %v8040_v46 }
 0x296   : > { %5523 = vmatmul.mubr.msk.f32.gmra.mrb[64].mxu1 %vm1512_vm1, %v699_v53  ;;  %v708_v53 = vld [vmem:[%s9644_s4 + $0x2e0] sm:$0xff] }
 0x297   : > { %5525 = vmatprep.mubr.msk.f32.mxu1 %vm1512_vm1, %v700_v54  ;;  %v709_v54 = vld [vmem:[%s9644_s4 + $0x2e8] sm:$0xff] }
 0x29a   : > { %5526 = vmatmul.mubr.msk.f32.gmra.mrb[66].mxu1 %vm1512_vm1, %v701_v57  ;;  %v710_v57 = vld [vmem:[%s9644_s4 + $0x2f0] sm:$0xff] }
 0x29b   : > { %5528 = vmatprep.mubr.msk.f32.mxu1 %vm1512_vm1, %v702_v2  ;;  %v8053_v2 = vpop.permute.xlu0 %1064 }
 0x29e   : > { %5529 = vmatmul.mubr.msk.f32.gmra.mrb[68].mxu1 %vm1512_vm1, %v703_v13  ;;  %v8055_v13 = vpop.permute.xlu1 %1069 }
 0x29f   : > { %5531 = vmatprep.mubr.msk.f32.mxu1 %vm1512_vm1, %v704_v14  ;;  %v711_v14 = vld [vmem:[%s9644_s4 + $0x2f8] sm:$0xff] }
 0x2a2   : > { %5532 = vmatmul.mubr.msk.f32.gmra.mrb[70].mxu1 %vm1512_vm1, %v705_v34  ;;  %v712_v34 = vld [vmem:[%s9644_s4 + $0x300] sm:$0xff] }
 0x2a3   : > { %5534 = vmatprep.mubr.msk.f32.mxu1 %vm1512_vm1, %v706_v36  ;;  %v713_v36 = vld [vmem:[%s9644_s4 + $0x308] sm:$0xff] }
 0x2a6   : > { %5535 = vmatmul.mubr.msk.f32.gmra.mrb[72].mxu1 %vm1512_vm1, %v707_v43  ;;  %v8070_v43 = vpop.permute.xlu0 %1154 }
 0x2a7   : > { %5537 = vmatprep.mubr.msk.f32.mxu1 %vm1512_vm1, %v708_v53  ;;  %9654 = vst [vmem:[#allocation42_spill] sm:$0xff] %v8070_v43  ;;  %v8072_v53 = vpop.permute.xlu1 %1159 }
 0x2a8   : > { %9655 = vst [vmem:[#allocation43_spill] sm:$0xff] %v8072_v53 }
 0x2aa   : > { %5538 = vmatmul.mubr.msk.f32.gmra.mrb[74].mxu1 %vm1512_vm1, %v709_v54  ;;  %v714_v54 = vld [vmem:[%s9644_s4 + $0x310] sm:$0xff]  ;;  %v8085_v22 = vpop.permute.xlu0 %1074 }
 0x2ab   : > { %5540 = vmatprep.mubr.msk.f32.mxu1 %vm1512_vm1, %v710_v57  ;;  %v2987_v57 = vld [vmem:[#allocation9 + $0x8] sm:$0xff]  ;;  %v8087_v18 = vpop.permute.xlu1 %1079 }
 0x2ac   : > { %3058 = vmatprep.mubr.f32.mxu0 %v2987_v57  ;;  %v719_v57 = vld [vmem:[%s9644_s4 + $0x338] sm:$0xff] }
 0x2ae   : > { %5541 = vmatmul.mubr.msk.f32.gmra.mrb[76].mxu1 %vm1512_vm1, %v711_v14  ;;  %v715_v14 = vld [vmem:[%s9644_s4 + $0x318] sm:$0xff]  ;;  %v8102_v15 = vpop.permute.xlu0 %1164 }
 0x2af   : > { %5543 = vmatprep.mubr.msk.f32.mxu1 %vm1512_vm1, %v712_v34  ;;  %v716_v34 = vld [vmem:[%s9644_s4 + $0x320] sm:$0xff]  ;;  %9656 = vst [vmem:[#allocation44_spill] sm:$0xff] %v8102_v15 }
 0x2b2   : > { %5544 = vmatmul.mubr.msk.f32.gmra.mrb[78].mxu1 %vm1512_vm1, %v713_v36  ;;  %v717_v36 = vld [vmem:[%s9644_s4 + $0x328] sm:$0xff]  ;;  %v8117_v19 = vpop.permute.xlu0 %1084 }
 0x2b3   : > { %5546 = vmatprep.mubr.msk.f32.mxu1 %vm1512_vm1, %v714_v54  ;;  %v718_v54 = vld [vmem:[%s9644_s4 + $0x330] sm:$0xff] }
 0x2b6   : > { %5547 = vmatmul.mubr.msk.f32.gmra.mrb[80].mxu1 %vm1512_vm1, %v715_v14  ;;  %v8104_v14 = vpop.permute.xlu1 %1169  ;;  %v8134_v17 = vpop.permute.xlu0 %1174 }
 0x2b7   : > { %5549 = vmatprep.mubr.msk.f32.mxu1 %vm1512_vm1, %v716_v34  ;;  %9657 = vst [vmem:[#allocation45_spill] sm:$0xff] %v8104_v14  ;;  %v720_v34 = vld [vmem:[%s9644_s4 + $0x340] sm:$0xff]  ;;  %9658 = vst [vmem:[#allocation46_spill] sm:$0xff] %v8134_v17  ;;  %v731_v17 = vld [vmem:[%s9644_s4 + $0x398] sm:$0xff] }
 0x2ba   : > { %5550 = vmatmul.mubr.msk.f32.gmra.mrb[82].mxu1 %vm1512_vm1, %v717_v36  ;;  %v721_v36 = vld [vmem:[%s9644_s4 + $0x348] sm:$0xff]  ;;  %v8119_v20 = vpop.permute.xlu1 %1089  ;;  %v8149_v11 = vpop.permute.xlu0 %1094 }
 0x2bb   : > { %5552 = vmatprep.mubr.msk.f32.mxu1 %vm1512_vm1, %v718_v54  ;;  %v722_v54 = vld [vmem:[%s9644_s4 + $0x350] sm:$0xff] }
 0x2be   : > { %5553 = vmatmul.mubr.msk.f32.gmra.mrb[84].mxu1 %vm1512_vm1, %v719_v57  ;;  %v723_v57 = vld [vmem:[%s9644_s4 + $0x358] sm:$0xff] }
 0x2bf   : > { %5555 = vmatprep.mubr.msk.f32.mxu1 %vm1512_vm1, %v720_v34  ;;  %v724_v34 = vld [vmem:[%s9644_s4 + $0x360] sm:$0xff] }
 0x2c2   : > { %5556 = vmatmul.mubr.msk.f32.gmra.mrb[86].mxu1 %vm1512_vm1, %v721_v36  ;;  %v8136_v36 = vpop.permute.xlu1 %1179 }
 0x2c3   : > { %5558 = vmatprep.mubr.msk.f32.mxu1 %vm1512_vm1, %v722_v54  ;;  %9659 = vst [vmem:[#allocation47_spill] sm:$0xff] %v8136_v36  ;;  %v726_v54 = vld [vmem:[%s9644_s4 + $0x370] sm:$0xff]  ;;  %v8166_v36 = vpop.permute.xlu0 %1184 }
 0x2c4   : > { %9660 = vst [vmem:[#allocation48_spill] sm:$0xff] %v8166_v36 }
 0x2c6   : > { %5559 = vmatmul.mubr.msk.f32.gmra.mrb[88].mxu1 %vm1512_vm1, %v723_v57  ;;  %v727_v57 = vld [vmem:[%s9644_s4 + $0x378] sm:$0xff]  ;;  %v8151_v12 = vpop.permute.xlu1 %1099 }
 0x2c7   : > { %5561 = vmatprep.mubr.msk.f32.mxu1 %vm1512_vm1, %v724_v34  ;;  %v728_v34 = vld [vmem:[%s9644_s4 + $0x380] sm:$0xff]  ;;  %v8181_v15 = vpop.permute.xlu0 %1104 }
 0x2c8   : > { %9662 = vst [vmem:[#allocation50_spill] sm:$0xff] %v8181_v15 }
 0x2ca   : > { %5562 = vmatmul.mubr.msk.f32.gmra.mrb[90].mxu1 %vm1512_vm1, %v725_v16  ;;  %v729_v16 = vld [vmem:[%s9644_s4 + $0x388] sm:$0xff] }
 0x2cb   : > { %5564 = vmatprep.mubr.msk.f32.mxu1 %vm1512_vm1, %v726_v54  ;;  %v730_v54 = vld [vmem:[%s9644_s4 + $0x390] sm:$0xff]  ;;  %v8198_v14 = vpop.permute.xlu0 %1274 }
 0x2cc   : > { %9664 = vst [vmem:[#allocation52_spill] sm:$0xff] %v8198_v14 }
 0x2ce   : > { %5565 = vmatmul.mubr.msk.f32.gmra.mrb[92].mxu1 %vm1512_vm1, %v727_v57  ;;  %v8168_v57 = vpop.permute.xlu1 %1189 }
 0x2cf   : > { %5567 = vmatprep.mubr.msk.f32.mxu1 %vm1512_vm1, %v728_v34  ;;  %9661 = vst [vmem:[#allocation49_spill] sm:$0xff] %v8168_v57  ;;  %v732_v34 = vld [vmem:[%s9644_s4 + $0x3a0] sm:$0xff]  ;;  %v737_v57 = vld [vmem:[%s9644_s4 + $0x3c8] sm:$0xff]  ;;  %v8213_v43 = vpop.permute.xlu0 %1194 }
 0x2d0   : > { %9666 = vst [vmem:[#allocation54_spill] sm:$0xff] %v8213_v43 }
 0x2d2   : > { %5568 = vmatmul.mubr.msk.f32.gmra.mrb[94].mxu1 %vm1512_vm1, %v729_v16  ;;  %v733_v16 = vld [vmem:[%s9644_s4 + $0x3a8] sm:$0xff]  ;;  %v8183_v36 = vpop.permute.xlu1 %1109 }
 0x2d3   : > { %5570 = vmatprep.mubr.msk.f32.mxu1 %vm1512_vm1, %v730_v54  ;;  %v734_v54 = vld [vmem:[%s9644_s4 + $0x3b0] sm:$0xff]  ;;  %9663 = vst [vmem:[#allocation51_spill] sm:$0xff] %v8183_v36  ;;  %v8234_v41 = vpop.permute.xlu0 %1284 }
 0x2d4   : > { %9668 = vst [vmem:[#allocation56_spill] sm:$0xff] %v8234_v41 }
 0x2d6   : > { %5571 = vmatmul.mubr.msk.f32.gmra.mrb[96].mxu1 %vm1512_vm1, %v731_v17  ;;  %v735_v17 = vld [vmem:[%s9644_s4 + $0x3b8] sm:$0xff] }
 0x2d7   : > { %5573 = vmatprep.mubr.msk.f32.mxu1 %vm1512_vm1, %v732_v34  ;;  %v736_v34 = vld [vmem:[%s9644_s4 + $0x3c0] sm:$0xff] }
 0x2da   : > { %5574 = vmatmul.mubr.msk.f32.gmra.mrb[98].mxu1 %vm1512_vm1, %v733_v16  ;;  %v8200_v16 = vpop.permute.xlu1 %1279 }
 0x2db   : > { %5576 = vmatprep.mubr.msk.f32.mxu1 %vm1512_vm1, %v734_v54  ;;  %9665 = vst [vmem:[#allocation53_spill] sm:$0xff] %v8200_v16  ;;  %v738_v54 = vld [vmem:[%s9644_s4 + $0x3d0] sm:$0xff] }
 0x2de   : > { %5577 = vmatmul.mubr.msk.f32.gmra.mrb[100].mxu1 %vm1512_vm1, %v735_v17  ;;  %v739_v17 = vld [vmem:[%s9644_s4 + $0x3d8] sm:$0xff]  ;;  %v8215_v14 = vpop.permute.xlu1 %1199 }
 0x2df   : > { %5579 = vmatprep.mubr.msk.f32.mxu1 %vm1512_vm1, %v736_v34  ;;  %v740_v34 = vld [vmem:[%s9644_s4 + $0x3e0] sm:$0xff]  ;;  %9667 = vst [vmem:[#allocation55_spill] sm:$0xff] %v8215_v14 }
 0x2e2   : > { %5580 = vmatmul.mubr.msk.f32.gmra.mrb[102].mxu1 %vm1512_vm1, %v737_v57  ;;  %v741_v57 = vld [vmem:[%s9644_s4 + $0x3e8] sm:$0xff] }
 0x2e3   : > { %5582 = vmatprep.mubr.msk.f32.mxu1 %vm1512_vm1, %v738_v54  ;;  %v742_v54 = vld [vmem:[%s9644_s4 + $0x3f0] sm:$0xff] }
 0x2e6   : > { %5583 = vmatmul.mubr.msk.f32.gmra.mrb[104].mxu1 %vm1512_vm1, %v739_v17  ;;  %v2731_v17 = vld [vmem:[#allocation8 + $0x8] sm:$0xff] }
 0x2e7   : > { %5585 = vmatprep.mubr.msk.f32.mxu1 %vm1512_vm1, %v740_v34  ;;  %v2749_v34 = vld [vmem:[#allocation8 + $0x98] sm:$0xff] }
 0x2e9   : > { %v5401_v16 = vpop.f32.mrb[8].mxu0  ;;  %v5428_v53 = vpop.f32.mrb[0].mxu1 }
 0x2ea   : > { %v1969_v44 = vadd.f32 %v5401_v16, %v7480_v25  ;;  %v2059_v43 = vadd.f32 %v5428_v53, %v7490_v29  ;;  %v1963_v46 = vpop.f32.mrb[9].mxu0  ;;  %v2053_v14 = vpop.f32.mrb[1].mxu1  ;;  %5586 = vmatmul.mubr.msk.f32.gmra.mrb[106].mxu1 %vm1512_vm1, %v741_v57  ;;  %v2730_v16 = vld [vmem:[#allocation8] sm:$0xff]  ;;  %v2748_v57 = vld [vmem:[#allocation8 + $0x90] sm:$0xff] }
 0x2eb   : > { %v1964_v63 = vadd.f32 %v1963_v46, %v7464_v10  ;;  %v2054_v0 = vadd.f32 %v2053_v14, %v7488_v28  ;;  %5588 = vmatprep.mubr.msk.f32.mxu1 %vm1512_vm1, %v742_v54  ;;  %v8236_v25 = vpop.permute.xlu1 %1289 }
 0x2ec   : > { %9669 = vst [vmem:[#allocation57_spill] sm:$0xff] %v8236_v25  ;;  %v2603_v29 = vmax.f32 %v1969_v44, 0.0  ;;  %v2621_v53 = vmax.f32 %v2059_v43, 0.0 }
 0x2ed   : > { %v2602_v3 = vmax.f32 %v1964_v63, 0.0  ;;  %v2620_v7 = vmax.f32 %v2054_v0, 0.0  ;;  %v5404_v15 = vpop.f32.mrb[10].mxu0  ;;  %v5431_v10 = vpop.f32.mrb[2].mxu1  ;;  %v2733_v63 = vld [vmem:[#allocation8 + $0x18] sm:$0xff]  ;;  %v2751_v0 = vld [vmem:[#allocation8 + $0xa8] sm:$0xff] }
 0x2ee   : > { %v8238_v46 = vmul.f32 %v2731_v17, %v2603_v29  ;;  %v8240_v28 = vmul.f32 %v2749_v34, %v2621_v53  ;;  %v1979_v14 = vadd.f32 %v5404_v15, %v7506_v35  ;;  %v2069_v54 = vadd.f32 %v5431_v10, %v7516_v39  ;;  %v1973_v36 = vpop.f32.mrb[11].mxu0  ;;  %v2063_v41 = vpop.f32.mrb[3].mxu1  ;;  %5589 = vmatmul.mubr.msk.f32.gmra.mrb[108].mxu1 %vm1512_vm1, %v743_v37  ;;  %v2732_v53 = vld [vmem:[#allocation8 + $0x10] sm:$0xff]  ;;  %v2750_v15 = vld [vmem:[#allocation8 + $0xa0] sm:$0xff] }
 0x2ef   : > { %v8245_v44 = vmul.f32 %v2730_v16, %v2602_v3  ;;  %v8247_v43 = vmul.f32 %v2748_v57, %v2620_v7  ;;  %v1974_v25 = vadd.f32 %v1973_v36, %v7498_v32  ;;  %v2064_v17 = vadd.f32 %v2063_v41, %v7514_v38 }
 0x2f0   : > { %v2605_v34 = vmax.f32 %v1979_v14, 0.0  ;;  %v2623_v29 = vmax.f32 %v2069_v54, 0.0 }
 0x2f1   : > { %v2604_v39 = vmax.f32 %v1974_v25, 0.0  ;;  %v2622_v10 = vmax.f32 %v2064_v17, 0.0  ;;  %v5407_v37 = vpop.f32.mrb[12].mxu0  ;;  %v5434_v3 = vpop.f32.mrb[4].mxu1  ;;  %v2735_v25 = vld [vmem:[#allocation8 + $0x28] sm:$0xff]  ;;  %v2753_v17 = vld [vmem:[#allocation8 + $0xb8] sm:$0xff] }
 0x2f2   : > { %v8255_v16 = vmul.f32 %v2733_v63, %v2605_v34  ;;  %v8257_v57 = vmul.f32 %v2751_v0, %v2623_v29  ;;  %v1989_v32 = vadd.f32 %v5407_v37, %v7532_v45  ;;  %v2079_v38 = vadd.f32 %v5434_v3, %v7542_v49  ;;  %v1983_v41 = vpop.f32.mrb[13].mxu0  ;;  %v2073_v36 = vpop.f32.mrb[5].mxu1  ;;  %v2734_v29 = vld [vmem:[#allocation8 + $0x20] sm:$0xff]  ;;  %v2752_v49 = vld [vmem:[#allocation8 + $0xb0] sm:$0xff] }
 0x2f3   : > { %v8261_v14 = vmul.f32 %v2732_v53, %v2604_v39  ;;  %v8263_v54 = vmul.f32 %v2750_v15, %v2622_v10  ;;  %v1984_v35 = vadd.f32 %v1983_v41, %v7524_v42  ;;  %v2074_v7 = vadd.f32 %v2073_v36, %v7540_v48  ;;  %v8267_v63 = vpop.permute.xlu0 %1204  ;;  %v8269_v0 = vpop.permute.xlu1 %1209 }
 0x2f4   : > { %9670 = vst [vmem:[#allocation58_spill] sm:$0xff] %v8267_v63  ;;  %9671 = vst [vmem:[#allocation59_spill] sm:$0xff] %v8269_v0  ;;  %v2607_v34 = vmax.f32 %v1989_v32, 0.0  ;;  %v2625_v45 = vmax.f32 %v2079_v38, 0.0 }
 0x2f5   : > { %v2606_v39 = vmax.f32 %v1984_v35, 0.0  ;;  %v2624_v15 = vmax.f32 %v2074_v7, 0.0  ;;  %v5410_v10 = vpop.f32.mrb[14].mxu0  ;;  %v5437_v37 = vpop.f32.mrb[6].mxu1  ;;  %v2737_v35 = vld [vmem:[#allocation8 + $0x38] sm:$0xff]  ;;  %v2755_v7 = vld [vmem:[#allocation8 + $0xc8] sm:$0xff] }
 0x2f6   : > { %v8275_v3 = vmul.f32 %v2735_v25, %v2607_v34  ;;  %v8277_v48 = vmul.f32 %v2753_v17, %v2625_v45  ;;  %v1999_v41 = vadd.f32 %v5410_v10, %v7558_v55  ;;  %v2089_v32 = vadd.f32 %v5437_v37, %v7568_v59  ;;  %v1993_v38 = vpop.f32.mrb[15].mxu0  ;;  %v2083_v36 = vpop.f32.mrb[7].mxu1  ;;  %v2736_v17 = vld [vmem:[#allocation8 + $0x30] sm:$0xff]  ;;  %v2754_v45 = vld [vmem:[#allocation8 + $0xc0] sm:$0xff] }
 0x2f7   : > { %v8281_v63 = vmul.f32 %v2734_v29, %v2606_v39  ;;  %v8283_v53 = vmul.f32 %v2752_v49, %v2624_v15  ;;  %v1994_v0 = vadd.f32 %v1993_v38, %v7550_v52  ;;  %v2084_v42 = vadd.f32 %v2083_v36, %v7566_v58 }
 0x2f8   : > { %v2609_v25 = vmax.f32 %v1999_v41, 0.0  ;;  %v2627_v34 = vmax.f32 %v2089_v32, 0.0 }
 0x2f9   : > { %v2608_v59 = vmax.f32 %v1994_v0, 0.0  ;;  %v2626_v10 = vmax.f32 %v2084_v42, 0.0  ;;  %v5413_v37 = vpop.f32.mrb[16].mxu0  ;;  %v5440_v29 = vpop.f32.mrb[8].mxu1  ;;  %v2739_v0 = vld [vmem:[#allocation8 + $0x48] sm:$0xff]  ;;  %v2757_v42 = vld [vmem:[#allocation8 + $0xd8] sm:$0xff] }
 0x2fa   : > { %v8291_v39 = vmul.f32 %v2737_v35, %v2609_v25  ;;  %v8293_v15 = vmul.f32 %v2755_v7, %v2627_v34  ;;  %v2009_v52 = vadd.f32 %v5413_v37, %v7584_v1  ;;  %v2099_v58 = vadd.f32 %v5440_v29, %v7594_v5  ;;  %v2003_v41 = vpop.f32.mrb[17].mxu0  ;;  %v2093_v32 = vpop.f32.mrb[9].mxu1  ;;  %v2738_v34 = vld [vmem:[#allocation8 + $0x40] sm:$0xff]  ;;  %v2756_v5 = vld [vmem:[#allocation8 + $0xd0] sm:$0xff] }
 0x2fb   : > { %v8297_v38 = vmul.f32 %v2736_v17, %v2608_v59  ;;  %v8299_v36 = vmul.f32 %v2754_v45, %v2626_v10  ;;  %v2004_v55 = vadd.f32 %v2003_v41, %v7576_v62  ;;  %v2094_v49 = vadd.f32 %v2093_v32, %v7592_v4  ;;  %v8303_v35 = vpop.permute.xlu0 %1294  ;;  %v8305_v7 = vpop.permute.xlu1 %1299 }
 0x2fc   : > { %9672 = vst [vmem:[#allocation60_spill] sm:$0xff] %v8303_v35  ;;  %9673 = vst [vmem:[#allocation61_spill] sm:$0xff] %v8305_v7  ;;  %v2611_v25 = vmax.f32 %v2009_v52, 0.0  ;;  %v2629_v1 = vmax.f32 %v2099_v58, 0.0 }
 0x2fd   : > { %v2610_v59 = vmax.f32 %v2004_v55, 0.0  ;;  %v2628_v45 = vmax.f32 %v2094_v49, 0.0  ;;  %v5416_v10 = vpop.f32.mrb[18].mxu0  ;;  %v5443_v37 = vpop.f32.mrb[10].mxu1  ;;  %v2741_v55 = vld [vmem:[#allocation8 + $0x58] sm:$0xff]  ;;  %v2759_v49 = vld [vmem:[#allocation8 + $0xe8] sm:$0xff] }
 0x2fe   : > { %v8311_v29 = vmul.f32 %v2739_v0, %v2611_v25  ;;  %v8313_v4 = vmul.f32 %v2757_v42, %v2629_v1  ;;  %v2019_v41 = vadd.f32 %v5416_v10, %v7610_v23  ;;  %v2109_v52 = vadd.f32 %v5443_v37, %v7620_v31  ;;  %v2013_v58 = vpop.f32.mrb[19].mxu0  ;;  %v2103_v32 = vpop.f32.mrb[11].mxu1  ;;  %v2740_v42 = vld [vmem:[#allocation8 + $0x50] sm:$0xff]  ;;  %v2758_v1 = vld [vmem:[#allocation8 + $0xe0] sm:$0xff] }
 0x2ff   : > { %v8317_v35 = vmul.f32 %v2738_v34, %v2610_v59  ;;  %v8319_v17 = vmul.f32 %v2756_v5, %v2628_v45  ;;  %v2014_v7 = vadd.f32 %v2013_v58, %v7602_v8  ;;  %v2104_v62 = vadd.f32 %v2103_v32, %v7618_v27 }
 0x300   : > { %v2613_v0 = vmax.f32 %v2019_v41, 0.0  ;;  %v2631_v25 = vmax.f32 %v2109_v52, 0.0 }
 0x301   : > { %v2612_v31 = vmax.f32 %v2014_v7, 0.0  ;;  %v2630_v10 = vmax.f32 %v2104_v62, 0.0  ;;  %v5419_v37 = vpop.f32.mrb[20].mxu0  ;;  %v5446_v34 = vpop.f32.mrb[12].mxu1  ;;  %v2743_v7 = vld [vmem:[#allocation8 + $0x68] sm:$0xff]  ;;  %v2761_v62 = vld [vmem:[#allocation8 + $0xf8] sm:$0xff] }
 0x302   : > { %v8327_v59 = vmul.f32 %v2741_v55, %v2613_v0  ;;  %v8329_v45 = vmul.f32 %v2759_v49, %v2631_v25  ;;  %v2029_v8 = vadd.f32 %v5419_v37, %v7636_v47  ;;  %v2119_v27 = vadd.f32 %v5446_v34, %v7646_v60  ;;  %v2023_v41 = vpop.f32.mrb[21].mxu0  ;;  %v2113_v52 = vpop.f32.mrb[13].mxu1  ;;  %v2742_v25 = vld [vmem:[#allocation8 + $0x60] sm:$0xff]  ;;  %v2760_v60 = vld [vmem:[#allocation8 + $0xf0] sm:$0xff] }
 0x303   : > { %v8333_v58 = vmul.f32 %v2740_v42, %v2612_v31  ;;  %v8335_v32 = vmul.f32 %v2758_v1, %v2630_v10  ;;  %v2024_v23 = vadd.f32 %v2023_v41, %v7628_v40  ;;  %v2114_v5 = vadd.f32 %v2113_v52, %v7644_v56  ;;  %v8339_v55 = vpop.permute.xlu0 %1214  ;;  %v8341_v49 = vpop.permute.xlu1 %1219 }
 0x304   : > { %9674 = vst [vmem:[#allocation62_spill] sm:$0xff] %v8339_v55  ;;  %9675 = vst [vmem:[#allocation63_spill] sm:$0xff] %v8341_v49  ;;  %v2615_v0 = vmax.f32 %v2029_v8, 0.0  ;;  %v2633_v47 = vmax.f32 %v2119_v27, 0.0 }
 0x305   : > { %v2614_v31 = vmax.f32 %v2024_v23, 0.0  ;;  %v2632_v1 = vmax.f32 %v2114_v5, 0.0  ;;  %v5422_v10 = vpop.f32.mrb[22].mxu0  ;;  %v5449_v37 = vpop.f32.mrb[14].mxu1  ;;  %v2745_v23 = vld [vmem:[#allocation8 + $0x78] sm:$0xff]  ;;  %v2763_v5 = vld [vmem:[#allocation8 + $0x108] sm:$0xff] }
 0x306   : > { %v8347_v34 = vmul.f32 %v2743_v7, %v2615_v0  ;;  %v8349_v56 = vmul.f32 %v2761_v62, %v2633_v47  ;;  %v2039_v41 = vadd.f32 %v5422_v10, %v7927_v61  ;;  %v2129_v8 = vadd.f32 %v5449_v37, %v7959_v30  ;;  %v2033_v27 = vpop.f32.mrb[23].mxu0  ;;  %v2123_v52 = vpop.f32.mrb[15].mxu1  ;;  %v2744_v62 = vld [vmem:[#allocation8 + $0x70] sm:$0xff]  ;;  %v2762_v47 = vld [vmem:[#allocation8 + $0x100] sm:$0xff]  ;;  %v2765_v61 = vld [vmem:[#allocation8 + $0x118] sm:$0xff] }
 0x307   : > { %v8353_v55 = vmul.f32 %v2742_v25, %v2614_v31  ;;  %v8355_v42 = vmul.f32 %v2760_v60, %v2632_v1  ;;  %v2034_v49 = vadd.f32 %v2033_v27, %v7657_v6  ;;  %v2124_v40 = vadd.f32 %v2123_v52, %v7957_v26  ;;  %v8369_v27 = vpop.permute.xlu1 %1309 }
 0x308   : > { %v2617_v7 = vmax.f32 %v2039_v41, 0.0  ;;  %v2635_v0 = vmax.f32 %v2129_v8, 0.0  ;;  %9676 = vst [vmem:[#allocation64_spill] sm:$0xff] %v8369_v27 }
 0x309   : > { %v2616_v30 = vmax.f32 %v2034_v49, 0.0  ;;  %v2634_v10 = vmax.f32 %v2124_v40, 0.0  ;;  %v5425_v37 = vpop.f32.mrb[24].mxu0  ;;  %v5452_v25 = vpop.f32.mrb[16].mxu1  ;;  %v2747_v40 = vld [vmem:[#allocation8 + $0x88] sm:$0xff] }
 0x30a   : > { %v8363_v31 = vmul.f32 %v2745_v23, %v2617_v7  ;;  %v8365_v1 = vmul.f32 %v2763_v5, %v2635_v0  ;;  %v2049_v6 = vadd.f32 %v5425_v37, %v7472_v21  ;;  %v2139_v26 = vadd.f32 %v5452_v25, %v7991_v51  ;;  %v2043_v41 = vpop.f32.mrb[25].mxu0  ;;  %v2133_v8 = vpop.f32.mrb[17].mxu1  ;;  %v2746_v0 = vld [vmem:[#allocation8 + $0x80] sm:$0xff]  ;;  %v2764_v51 = vld [vmem:[#allocation8 + $0x110] sm:$0xff] }
 0x30b   : > { %v8371_v52 = vmul.f32 %v2744_v62, %v2616_v30  ;;  %v8373_v49 = vmul.f32 %v2762_v47, %v2634_v10  ;;  %v2044_v60 = vadd.f32 %v2043_v41, %v7462_v9  ;;  %v2134_v23 = vadd.f32 %v2133_v8, %v7989_v50  ;;  %v8377_v5 = vpop.permute.xlu0 %1304  ;;  %v2766_v37 = vld [vmem:[#allocation8 + $0x120] sm:$0xff] }
 0x30c   : > { %9678 = vst [vmem:[#allocation66_spill] sm:$0xff] %v8377_v5  ;;  %v2619_v7 = vmax.f32 %v2049_v6, 0.0  ;;  %v2637_v21 = vmax.f32 %v2139_v26, 0.0  ;;  %v2767_v26 = vld [vmem:[#allocation8 + $0x128] sm:$0xff] }
 0x30d   : > { %9677 = vst [vmem:[#allocation65_spill] sm:$0xff] %v8371_v52  ;;  %v5660_v62 = vpack.c.bf16 %v8365_v1, %v8373_v49  ;;  %v2618_v47 = vmax.f32 %v2044_v60, 0.0  ;;  %v2636_v30 = vmax.f32 %v2134_v23, 0.0  ;;  %v5455_v10 = vpop.f32.mrb[18].mxu1  ;;  %v8389_v52 = vpop.permute.xlu1 %1229  ;;  %v2786_v1 = vld [vmem:[#allocation8 + $0x1c0] sm:$0xff] }
 0x30e   : > { %v2875_v25 = vmul.f32 %v2747_v40, %v2619_v7  ;;  %v8383_v27 = vmul.f32 %v2765_v61, %v2637_v21  ;;  %v2149_v9 = vadd.f32 %v5455_v10, %v8023_v33  ;;  %v2143_v50 = vpop.f32.mrb[19].mxu1  ;;  %v2768_v10 = vld [vmem:[#allocation8 + $0x130] sm:$0xff] }
 0x30f   : > { %v2874_v41 = vmul.f32 %v2746_v0, %v2618_v47  ;;  %v8386_v6 = vmul.f32 %v2764_v51, %v2636_v30  ;;  %v2144_v8 = vadd.f32 %v2143_v50, %v8021_v24  ;;  %v8393_v7 = vpop.permute.xlu0 %1224  ;;  %v2769_v24 = vld [vmem:[#allocation8 + $0x138] sm:$0xff] }
 0x310   : > { %v2639_v5 = vmax.f32 %v2149_v9, 0.0  ;;  %v9679_v9 = vpack.c.bf16 %v8238_v46, %v8245_v44  ;;  %v2771_v46 = vld [vmem:[#allocation8 + $0x148] sm:$0xff] }
 0x311   : > { %v5664_v60 = vpack.c.bf16 %v8383_v27, %v8386_v6  ;;  %v2638_v23 = vmax.f32 %v2144_v8, 0.0  ;;  %v5458_v40 = vpop.f32.mrb[20].mxu1  ;;  %v5626_v61 = vpack.c.bf16 %v2875_v25, %v2874_v41 }
 0x312   : > { %v8395_v33 = vmul.f32 %v2767_v26, %v2639_v5  ;;  %v2159_v21 = vadd.f32 %v5458_v40, %v8055_v13  ;;  %v2153_v0 = vpop.f32.mrb[21].mxu1  ;;  %v9680_v13 = vpack.c.bf16 %v8240_v28, %v8247_v43  ;;  %v8412_v26 = vpop.permute.xlu1 %1319  ;;  %v9681_v28 = vpack.c.bf16 %v8255_v16, %v8261_v14 }
 0x313   : > { %v8398_v51 = vmul.f32 %v2766_v37, %v2638_v23  ;;  %v2154_v47 = vadd.f32 %v2153_v0, %v8053_v2  ;;  %5627 = vmatprep.subr.bf16.mxu0 %v5626_v61  ;;  %v8417_v23 = vpop.permute.xlu0 %1314  ;;  %v2770_v61 = vld [vmem:[#allocation8 + $0x140] sm:$0xff]  ;;  %v9682_v0 = vpack.c.bf16 %v8257_v57, %v8263_v54 }
 0x314   : > { %v2641_v30 = vmax.f32 %v2159_v21, 0.0  ;;  %5629 = vmatpush3.bf16.msra.mxu0 %v9679_v9  ;;  %v2772_v9 = vld [vmem:[#allocation8 + $0x150] sm:$0xff] }
 0x315   : > { %v5668_v25 = vpack.c.bf16 %v8395_v33, %v8398_v51  ;;  %v2640_v5 = vmax.f32 %v2154_v47, 0.0  ;;  %v5461_v50 = vpop.f32.mrb[22].mxu1  ;;  %5631 = vmatprep.subr.bf16.mxu0 %v9680_v13 }
 0x316   : > { %v8409_v37 = vmul.f32 %v2769_v24, %v2641_v30  ;;  %v2169_v2 = vadd.f32 %v5461_v50, %v8087_v18  ;;  %v2163_v41 = vpop.f32.mrb[23].mxu1  ;;  %v8436_v50 = vpop.permute.xlu1 %1239 }
 0x317   : > { %v8414_v8 = vmul.f32 %v2768_v10, %v2640_v5  ;;  %v2164_v44 = vadd.f32 %v2163_v41, %v8085_v22  ;;  %v2773_v10 = vld [vmem:[#allocation8 + $0x158] sm:$0xff]  ;;  %v9683_v5 = vpack.c.bf16 %v8275_v3, %v8281_v63  ;;  %v2775_v3 = vld [vmem:[#allocation8 + $0x168] sm:$0xff] }
 0x318   : > { %v2643_v40 = vmax.f32 %v2169_v2, 0.0  ;;  %5633 = vmatpush3.bf16.msra.mxu0 %v9681_v28  ;;  %v8443_v2 = vpop.permute.xlu0 %1234  ;;  %v9685_v28 = vpack.c.bf16 %v8291_v39, %v8297_v38  ;;  %v2777_v39 = vld [vmem:[#allocation8 + $0x178] sm:$0xff] }
 0x319   : > { %v5672_v43 = vpack.c.bf16 %v8409_v37, %v8414_v8  ;;  %v2642_v18 = vmax.f32 %v2164_v44, 0.0  ;;  %v5464_v21 = vpop.f32.mrb[24].mxu1  ;;  %5635 = vmatprep.subr.bf16.mxu0 %v9682_v0  ;;  %v9687_v0 = vld [vmem:[#allocation51_spill] sm:$0xff]  ;;  %v9688_v38 = vld [vmem:[#allocation50_spill] sm:$0xff] }
 0x31a   : > { %v8427_v24 = vmul.f32 %v2771_v46, %v2643_v40  ;;  %v2179_v22 = vadd.f32 %v5464_v21, %v8119_v20  ;;  %v2173_v47 = vpop.f32.mrb[25].mxu1  ;;  %v9684_v20 = vpack.c.bf16 %v8277_v48, %v8283_v53 }
 0x31b   : > { %v8430_v30 = vmul.f32 %v2770_v61, %v2642_v18  ;;  %v2174_v16 = vadd.f32 %v2173_v47, %v8117_v19  ;;  %v2774_v61 = vld [vmem:[#allocation8 + $0x160] sm:$0xff]  ;;  %v8462_v47 = vpop.permute.xlu1 %1329 }
 0x31c   : > { %v2645_v14 = vmax.f32 %v2179_v22, 0.0  ;;  %5637 = vmatpush3.bf16.msra.mxu0 %v9683_v5  ;;  %v2776_v5 = vld [vmem:[#allocation8 + $0x170] sm:$0xff] }
 0x31d   : > { %v5676_v57 = vpack.c.bf16 %v8427_v24, %v8430_v30  ;;  %v2644_v54 = vmax.f32 %v2174_v16, 0.0  ;;  %v5467_v13 = vpop.f32.mrb[26].mxu1  ;;  %5639 = vmatprep.subr.bf16.mxu0 %v9684_v20  ;;  %v9690_v20 = vpack.c.bf16 %v8313_v4, %v8319_v17 }
 0x31e   : > { %v8445_v19 = vmul.f32 %v2773_v10, %v2645_v14  ;;  %v2189_v41 = vadd.f32 %v5467_v13, %v8151_v12  ;;  %v2183_v46 = vpop.f32.mrb[27].mxu1  ;;  %v9686_v12 = vpack.c.bf16 %v8293_v15, %v8299_v36  ;;  %v8467_v14 = vpop.permute.xlu0 %1324  ;;  %v9689_v15 = vpack.c.bf16 %v8311_v29, %v8317_v35 }
 0x31f   : > { %v8448_v63 = vmul.f32 %v2772_v9, %v2644_v54  ;;  %v2184_v44 = vadd.f32 %v2183_v46, %v8149_v11  ;;  %v9691_v46 = vld [vmem:[#allocation35_spill] sm:$0xff] }
 0x320   : > { %v2647_v40 = vmax.f32 %v2189_v41, 0.0  ;;  %5641 = vmatpush3.bf16.msra.mxu0 %v9685_v28  ;;  %v9692_v28 = vld [vmem:[#allocation34_spill] sm:$0xff] }
 0x321   : > { %v5680_v53 = vpack.c.bf16 %v8445_v19, %v8448_v63  ;;  %v2646_v48 = vmax.f32 %v2184_v44, 0.0  ;;  %v5470_v18 = vpop.f32.mrb[28].mxu1  ;;  %5643 = vmatprep.subr.bf16.mxu0 %v9686_v12  ;;  %v8486_v12 = vpop.permute.xlu1 %1249 }
 0x322   : > { %v8459_v21 = vmul.f32 %v2775_v3, %v2647_v40  ;;  %v2199_v22 = vadd.f32 %v5470_v18, %v9687_v0  ;;  %v2193_v11 = vpop.f32.mrb[29].mxu1  ;;  %v9693_v18 = vpack.c.bf16 %v8327_v59, %v8333_v58  ;;  %v2781_v59 = vld [vmem:[#allocation8 + $0x198] sm:$0xff]  ;;  %v9696_v58 = vld [vmem:[#allocation36_spill] sm:$0xff] }
 0x323   : > { %v8464_v10 = vmul.f32 %v2774_v61, %v2646_v48  ;;  %v2194_v16 = vadd.f32 %v2193_v11, %v9688_v38  ;;  %v2779_v61 = vld [vmem:[#allocation8 + $0x188] sm:$0xff]  ;;  %v2778_v48 = vld [vmem:[#allocation8 + $0x180] sm:$0xff]  ;;  %v8493_v11 = vpop.permute.xlu0 %1244  ;;  %v9695_v38 = vld [vmem:[#allocation37_spill] sm:$0xff] }
 0x324   : > { %v2649_v9 = vmax.f32 %v2199_v22, 0.0  ;;  %5645 = vmatpush3.bf16.msra.mxu0 %v9689_v15  ;;  %v9694_v22 = vpack.c.bf16 %v8329_v45, %v8335_v32  ;;  %v9698_v45 = vpack.c.bf16 %v8349_v56, %v8355_v42  ;;  %v2986_v42 = vld [vmem:[#allocation9] sm:$0xff] }
 0x325   : > { %v5684_v36 = vpack.c.bf16 %v8459_v21, %v8464_v10  ;;  %v2648_v54 = vmax.f32 %v2194_v16, 0.0  ;;  %v5473_v13 = vpop.f32.mrb[30].mxu1  ;;  %5647 = vmatprep.subr.bf16.mxu0 %v9690_v20  ;;  %v9697_v20 = vpack.c.bf16 %v8347_v34, %v8353_v55  ;;  %v2782_v34 = vld [vmem:[#allocation8 + $0x1a0] sm:$0xff]  ;;  %v9718_v21 = vld [vmem:[#allocation62_spill] sm:$0xff] }
 0x326   : > { %v8477_v41 = vmul.f32 %v2777_v39, %v2649_v9  ;;  %v2209_v3 = vadd.f32 %v5473_v13, %v9691_v46  ;;  %v2203_v44 = vpop.f32.mrb[31].mxu1  ;;  %v2780_v13 = vld [vmem:[#allocation8 + $0x190] sm:$0xff] }
 0x327   : > { %v8480_v40 = vmul.f32 %v2776_v5, %v2648_v54  ;;  %v2204_v35 = vadd.f32 %v2203_v44, %v9692_v28 }
 0x328   : > { %v2651_v29 = vmax.f32 %v2209_v3, 0.0  ;;  %5649 = vmatpush3.bf16.msra.mxu0 %v9693_v18  ;;  %v2783_v18 = vld [vmem:[#allocation8 + $0x1a8] sm:$0xff] }
 0x329   : > { %v5688_v17 = vpack.c.bf16 %v8477_v41, %v8480_v40  ;;  %v2650_v4 = vmax.f32 %v2204_v35, 0.0  ;;  %v5476_v0 = vpop.f32.mrb[32].mxu1  ;;  %5651 = vmatprep.subr.bf16.mxu0 %v9694_v22  ;;  %v8507_v22 = vpop.permute.xlu0 %1334 }
 0x32a   : > { %v2907_v39 = vmul.f32 %v2779_v61, %v2651_v29  ;;  %v2219_v16 = vadd.f32 %v5476_v0, %v9695_v38  ;;  %v2213_v9 = vpop.f32.mrb[33].mxu1  ;;  %v9699_v61 = vld [vmem:[#allocation39_spill] sm:$0xff]  ;;  %v8504_v29 = vpop.permute.xlu1 %1339  ;;  %v9701_v38 = vld [vmem:[#allocation65_spill] sm:$0xff] }
 0x32b   : > { %v2906_v5 = vmul.f32 %v2778_v48, %v2650_v4  ;;  %v2214_v15 = vadd.f32 %v2213_v9, %v9696_v58  ;;  %v9700_v4 = vld [vmem:[#allocation38_spill] sm:$0xff]  ;;  %v9703_v58 = vld [vmem:[#allocation41_spill] sm:$0xff] }
 0x32c   : > { %v2653_v54 = vmax.f32 %v2219_v16, 0.0  ;;  %5653 = vmatpush3.bf16.msra.mxu0 %v9697_v20  ;;  %v9702_v16 = vpack.c.bf16 %v8363_v31, %v9701_v38  ;;  %v2785_v20 = vld [vmem:[#allocation8 + $0x1b8] sm:$0xff] }
 0x32d   : > { %v2652_v46 = vmax.f32 %v2214_v15, 0.0  ;;  %v5479_v3 = vpop.f32.mrb[34].mxu1  ;;  %5655 = vmatprep.subr.bf16.mxu0 %v9698_v45  ;;  %v5658_v32 = vpack.c.bf16 %v2907_v39, %v2906_v5  ;;  %v2989_v5 = vld [vmem:[#allocation9 + $0x18] sm:$0xff] }
 0x32e   : > { %v2909_v44 = vmul.f32 %v2781_v59, %v2653_v54  ;;  %v2229_v28 = vadd.f32 %v5479_v3, %v9699_v61  ;;  %v2223_v35 = vpop.f32.mrb[35].mxu1  ;;  %v2784_v61 = vld [vmem:[#allocation8 + $0x1b0] sm:$0xff]  ;;  %v8517_v31 = vpop.permute.xlu1 %1259  ;;  %v9706_v38 = vld [vmem:[#allocation42_spill] sm:$0xff] }
 0x32f   : > { %v2908_v48 = vmul.f32 %v2780_v13, %v2652_v46  ;;  %v2224_v0 = vadd.f32 %v2223_v35, %v9700_v4  ;;  %v9704_v46 = vld [vmem:[#allocation40_spill] sm:$0xff]  ;;  %v8519_v35 = vpop.permute.xlu0 %1254 }
 0x330   : > { %v2655_v55 = vmax.f32 %v2229_v28, 0.0  ;;  %5657 = vmatpush3.bf16.msra.mxu0 %v9702_v16 }
 0x331   : > { %v2654_v56 = vmax.f32 %v2224_v0, 0.0  ;;  %v5482_v39 = vpop.f32.mrb[36].mxu1  ;;  %5659 = vmatprep.subr.bf16.mxu0 %v5658_v32  ;;  %v5662_v9 = vpack.c.bf16 %v2909_v44, %v2908_v48 }
 0x332   : > { %v2911_v59 = vmul.f32 %v2783_v18, %v2655_v55  ;;  %v2239_v15 = vadd.f32 %v5482_v39, %v9703_v58  ;;  %v2233_v54 = vpop.f32.mrb[37].mxu1  ;;  %v9705_v18 = vld [vmem:[#allocation43_spill] sm:$0xff]  ;;  %v8527_v58 = vpop.permute.xlu1 %1349 }
 0x333   : > { %v2910_v13 = vmul.f32 %v2782_v34, %v2654_v56  ;;  %v2234_v3 = vadd.f32 %v2233_v54, %v9704_v46  ;;  %3059 = vmatmul.mubr.f32.vlgmr.msra.gmra.mrb[26].mxu0 %v2986_v42  ;;  %v2787_v34 = vld [vmem:[#allocation8 + $0x1c8] sm:$0xff]  ;;  %v2789_v54 = vld [vmem:[#allocation8 + $0x1d8] sm:$0xff]  ;;  %v8530_v46 = vpop.permute.xlu0 %1344 }
 0x334   : > { %v2657_v45 = vmax.f32 %v2239_v15, 0.0  ;;  %5661 = vmatpush3.bf16.msra.mxu0 %v5660_v62  ;;  %3128 = vmatprep.mubr.f32.mxu0 %v2989_v5 }
 0x335   : > { %v2656_v32 = vmax.f32 %v2234_v3, 0.0  ;;  %v5485_v44 = vpop.f32.mrb[38].mxu1  ;;  %5663 = vmatprep.subr.bf16.mxu0 %v5662_v9  ;;  %v5666_v28 = vpack.c.bf16 %v2911_v59, %v2910_v13  ;;  %v9707_v9 = vld [vmem:[#allocation45_spill] sm:$0xff]  ;;  %v9708_v13 = vld [vmem:[#allocation44_spill] sm:$0xff] }
 0x336   : > { %v2913_v48 = vmul.f32 %v2785_v20, %v2657_v45  ;;  %v2249_v4 = vadd.f32 %v5485_v44, %v9705_v18  ;;  %v2243_v0 = vpop.f32.mrb[39].mxu1  ;;  %v2788_v45 = vld [vmem:[#allocation8 + $0x1d0] sm:$0xff]  ;;  %v2791_v18 = vld [vmem:[#allocation8 + $0x1e8] sm:$0xff]  ;;  %v8540_v33 = vpop.permute.xlu1 %1269 }
 0x337   : > { %v2912_v55 = vmul.f32 %v2784_v61, %v2656_v32  ;;  %v2244_v16 = vadd.f32 %v2243_v0, %v9706_v38  ;;  %v9709_v32 = vld [vmem:[#allocation47_spill] sm:$0xff] }
 0x338   : > { %v2659_v42 = vmax.f32 %v2249_v4, 0.0  ;;  %5665 = vmatpush3.bf16.msra.mxu0 %v5664_v60  ;;  %v9710_v4 = vld [vmem:[#allocation46_spill] sm:$0xff] }
 0x339   : > { %v2658_v49 = vmax.f32 %v2244_v16, 0.0  ;;  %v5488_v62 = vpop.f32.mrb[40].mxu1  ;;  %5667 = vmatprep.subr.bf16.mxu0 %v5666_v28  ;;  %v5670_v56 = vpack.c.bf16 %v2913_v48, %v2912_v55  ;;  %v8542_v16 = vpop.permute.xlu0 %1264 }
 0x33a   : > { %v2915_v39 = vmul.f32 %v2787_v34, %v2659_v42  ;;  %v2259_v5 = vadd.f32 %v5488_v62, %v9707_v9  ;;  %v2253_v59 = vpop.f32.mrb[41].mxu1  ;;  %v2790_v34 = vld [vmem:[#allocation8 + $0x1e0] sm:$0xff]  ;;  %v9712_v9 = vld [vmem:[#allocation48_spill] sm:$0xff] }
 0x33b   : > { %v2914_v15 = vmul.f32 %v2786_v1, %v2658_v49  ;;  %v2254_v20 = vadd.f32 %v2253_v59, %v9708_v13  ;;  %v9711_v1 = vld [vmem:[#allocation49_spill] sm:$0xff]  ;;  %v9713_v13 = vld [vmem:[#allocation55_spill] sm:$0xff] }
 0x33c   : > { %v2661_v3 = vmax.f32 %v2259_v5, 0.0  ;;  %5669 = vmatpush3.bf16.msra.mxu0 %v5668_v25 }
 0x33d   : > { %v2660_v27 = vmax.f32 %v2254_v20, 0.0  ;;  %v5491_v6 = vpop.f32.mrb[42].mxu1  ;;  %5671 = vmatprep.subr.bf16.mxu0 %v5670_v56  ;;  %v5674_v60 = vpack.c.bf16 %v2915_v39, %v2914_v15  ;;  %v2793_v39 = vld [vmem:[#allocation8 + $0x1f8] sm:$0xff]  ;;  %v2792_v15 = vld [vmem:[#allocation8 + $0x1f0] sm:$0xff] }
 0x33e   : > { %v2917_v61 = vmul.f32 %v2789_v54, %v2661_v3  ;;  %v2269_v44 = vadd.f32 %v5491_v6, %v9709_v32  ;;  %v2263_v28 = vpop.f32.mrb[43].mxu1  ;;  %v2795_v6 = vld [vmem:[#allocation8 + $0x208] sm:$0xff]  ;;  %v8553_v32 = vpop.permute.xlu0 %1434 }
 0x33f   : > { %v2916_v48 = vmul.f32 %v2788_v45, %v2660_v27  ;;  %v2264_v0 = vadd.f32 %v2263_v28, %v9710_v4  ;;  %v8550_v45 = vpop.permute.xlu1 %1439  ;;  %v2794_v28 = vld [vmem:[#allocation8 + $0x200] sm:$0xff] }
 0x340   : > { %v2663_v55 = vmax.f32 %v2269_v44, 0.0  ;;  %5673 = vmatpush3.bf16.msra.mxu0 %v5672_v43 }
 0x341   : > { %v2662_v51 = vmax.f32 %v2264_v0, 0.0  ;;  %v5494_v25 = vpop.f32.mrb[44].mxu1  ;;  %5675 = vmatprep.subr.bf16.mxu0 %v5674_v60  ;;  %v5678_v38 = vpack.c.bf16 %v2917_v61, %v2916_v48  ;;  %v9714_v60 = vld [vmem:[#allocation54_spill] sm:$0xff] }
 0x342   : > { %v2919_v42 = vmul.f32 %v2791_v18, %v2663_v55  ;;  %v2279_v49 = vadd.f32 %v5494_v25, %v9711_v1  ;;  %v2273_v62 = vpop.f32.mrb[45].mxu1  ;;  %v9715_v18 = vld [vmem:[#allocation59_spill] sm:$0xff] }
 0x343   : > { %v2918_v56 = vmul.f32 %v2790_v34, %v2662_v51  ;;  %v2274_v5 = vadd.f32 %v2273_v62, %v9712_v9  ;;  %v2797_v34 = vld [vmem:[#allocation8 + $0x218] sm:$0xff]  ;;  %v8567_v19 = vpop.permute.xlu1 %1359 }
 0x344   : > { %v2665_v59 = vmax.f32 %v2279_v49, 0.0  ;;  %5677 = vmatpush3.bf16.msra.mxu0 %v5676_v57  ;;  %v9716_v51 = vld [vmem:[#allocation58_spill] sm:$0xff]  ;;  %v8571_v49 = vpop.permute.xlu0 %1354 }
 0x345   : > { %v2664_v37 = vmax.f32 %v2274_v5, 0.0  ;;  %v5497_v8 = vpop.f32.mrb[46].mxu1  ;;  %5679 = vmatprep.subr.bf16.mxu0 %v5678_v38  ;;  %v5682_v43 = vpack.c.bf16 %v2919_v42, %v2918_v56  ;;  %v2796_v42 = vld [vmem:[#allocation8 + $0x210] sm:$0xff]  ;;  %v9717_v56 = vld [vmem:[#allocation63_spill] sm:$0xff] }
 0x346   : > { %v2921_v54 = vmul.f32 %v2793_v39, %v2665_v59  ;;  %v2289_v20 = vadd.f32 %v5497_v8, %v9713_v13  ;;  %v2283_v3 = vpop.f32.mrb[47].mxu1  ;;  %v2799_v59 = vld [vmem:[#allocation8 + $0x228] sm:$0xff] }
 0x347   : > { %v2920_v27 = vmul.f32 %v2792_v15, %v2664_v37  ;;  %v2284_v61 = vadd.f32 %v2283_v3, %v9714_v60  ;;  %v2798_v15 = vld [vmem:[#allocation8 + $0x220] sm:$0xff]  ;;  %v2988_v37 = vld [vmem:[#allocation9 + $0x10] sm:$0xff]  ;;  %v2991_v13 = vld [vmem:[#allocation9 + $0x28] sm:$0xff] }
 0x348   : > { %v2667_v44 = vmax.f32 %v2289_v20, 0.0  ;;  %5681 = vmatpush3.bf16.msra.mxu0 %v5680_v53  ;;  %v8592_v40 = vpop.permute.xlu0 %1444 }
 0x349   : > { %v2666_v24 = vmax.f32 %v2284_v61, 0.0  ;;  %v5500_v30 = vpop.f32.mrb[48].mxu1  ;;  %5683 = vmatprep.subr.bf16.mxu0 %v5682_v43  ;;  %v5686_v57 = vpack.c.bf16 %v2921_v54, %v2920_v27  ;;  %v2801_v61 = vld [vmem:[#allocation8 + $0x238] sm:$0xff] }
 0x34a   : > { %v8558_v48 = vmul.f32 %v2795_v6, %v2667_v44  ;;  %v2299_v4 = vadd.f32 %v5500_v30, %v9715_v18  ;;  %v2293_v0 = vpop.f32.mrb[49].mxu1  ;;  %v8587_v6 = vpop.permute.xlu1 %1449  ;;  %v2800_v44 = vld [vmem:[#allocation8 + $0x230] sm:$0xff] }
 0x34b   : > { %v8561_v55 = vmul.f32 %v2794_v28, %v2666_v24  ;;  %v2294_v25 = vadd.f32 %v2293_v0, %v9716_v51  ;;  %v2803_v0 = vld [vmem:[#allocation8 + $0x248] sm:$0xff]  ;;  %v2802_v51 = vld [vmem:[#allocation8 + $0x240] sm:$0xff] }
 0x34c   : > { %v2669_v38 = vmax.f32 %v2299_v4, 0.0  ;;  %5685 = vmatpush3.bf16.msra.mxu0 %v5684_v36 }
 0x34d   : > { %v5692_v63 = vpack.c.bf16 %v8558_v48, %v8561_v55  ;;  %v2668_v53 = vmax.f32 %v2294_v25, 0.0  ;;  %v5503_v1 = vpop.f32.mrb[50].mxu1  ;;  %5687 = vmatprep.subr.bf16.mxu0 %v5686_v57 }
 0x34e   : > { %v8573_v62 = vmul.f32 %v2797_v34, %v2669_v38  ;;  %v2309_v39 = vadd.f32 %v5503_v1, %v9717_v56  ;;  %v2303_v9 = vpop.f32.mrb[51].mxu1  ;;  %v8602_v25 = vpop.permute.xlu1 %1369 }
 0x34f   : > { %v8576_v5 = vmul.f32 %v2796_v42, %v2668_v53  ;;  %v2304_v10 = vadd.f32 %v2303_v9, %v9718_v21  ;;  %v8606_v1 = vpop.permute.xlu0 %1364 }
 0x350   : > { %v2671_v36 = vmax.f32 %v2309_v39, 0.0  ;;  %5689 = vmatpush3.bf16.msra.mxu0 %v5688_v17 }
 0x351   : > { %v5696_v8 = vpack.c.bf16 %v8573_v62, %v8576_v5  ;;  %v2670_v43 = vmax.f32 %v2304_v10, 0.0  ;;  %v5506_v54 = vpop.f32.mrb[52].mxu1  ;;  %v2804_v10 = vld [vmem:[#allocation8 + $0x250] sm:$0xff] }
 0x352   : > { %v8584_v20 = vmul.f32 %v2799_v59, %v2671_v36  ;;  %v2319_v3 = vadd.f32 %v5506_v54, %v8389_v52  ;;  %v2313_v27 = vpop.f32.mrb[53].mxu1  ;;  %v2805_v59 = vld [vmem:[#allocation8 + $0x258] sm:$0xff] }
 0x353   : > { %v8589_v60 = vmul.f32 %v2798_v15, %v2670_v43  ;;  %v2314_v41 = vadd.f32 %v2313_v27, %v8393_v7  ;;  %3129 = vmatmul.mubr.f32.vlgmr.msra.gmra.mrb[28].mxu0 %v2988_v37  ;;  %v2807_v27 = vld [vmem:[#allocation8 + $0x268] sm:$0xff] }
 0x354   : > { %v2673_v17 = vmax.f32 %v2319_v3, 0.0  ;;  %3198 = vmatprep.mubr.f32.mxu0 %v2991_v13  ;;  %v8619_v3 = vpop.permute.xlu1 %1459 }
 0x355   : > { %v5700_v28 = vpack.c.bf16 %v8584_v20, %v8589_v60  ;;  %v2672_v24 = vmax.f32 %v2314_v41, 0.0  ;;  %v5509_v30 = vpop.f32.mrb[54].mxu1 }
 0x356   : > { %v8596_v52 = vmul.f32 %v2801_v61, %v2673_v17  ;;  %v2329_v57 = vadd.f32 %v5509_v30, %v8436_v50  ;;  %v2323_v18 = vpop.f32.mrb[55].mxu1  ;;  %v2806_v17 = vld [vmem:[#allocation8 + $0x260] sm:$0xff] }
 0x357   : > { %v8599_v4 = vmul.f32 %v2800_v44, %v2672_v24  ;;  %v2324_v7 = vadd.f32 %v2323_v18, %v8443_v2 }
 0x358   : > { %v2675_v34 = vmax.f32 %v2329_v57, 0.0 }
 0x359   : > { %v5704_v38 = vpack.c.bf16 %v8596_v52, %v8599_v4  ;;  %v2674_v42 = vmax.f32 %v2324_v7, 0.0  ;;  %v5512_v53 = vpop.f32.mrb[56].mxu1  ;;  %v2809_v7 = vld [vmem:[#allocation8 + $0x278] sm:$0xff] }
 0x35a   : > { %v8608_v56 = vmul.f32 %v2803_v0, %v2675_v34  ;;  %v2339_v50 = vadd.f32 %v5512_v53, %v8486_v12  ;;  %v2333_v39 = vpop.f32.mrb[57].mxu1 }
 0x35b   : > { %v8611_v9 = vmul.f32 %v2802_v51, %v2674_v42  ;;  %v2334_v2 = vadd.f32 %v2333_v39, %v8493_v11  ;;  %v8624_v11 = vpop.permute.xlu0 %1454  ;;  %v2808_v51 = vld [vmem:[#allocation8 + $0x270] sm:$0xff]  ;;  %v8634_v42 = vpop.permute.xlu1 %1379 }
 0x35c   : > { %v2677_v21 = vmax.f32 %v2339_v50, 0.0 }
 0x35d   : > { %v2676_v15 = vmax.f32 %v2334_v2, 0.0  ;;  %v5515_v37 = vpop.f32.mrb[58].mxu1  ;;  %v9727_v52 = vpack.c.bf16 %v8608_v56, %v8611_v9 }
 0x35e   : > { %v8616_v43 = vmul.f32 %v2805_v59, %v2677_v21  ;;  %v2349_v54 = vadd.f32 %v5515_v37, %v8517_v31  ;;  %v2343_v13 = vpop.f32.mrb[59].mxu1  ;;  %v2811_v37 = vld [vmem:[#allocation8 + $0x288] sm:$0xff] }
 0x35f   : > { %v8621_v12 = vmul.f32 %v2804_v10, %v2676_v15  ;;  %v2344_v61 = vadd.f32 %v2343_v13, %v8519_v35  ;;  %v8638_v59 = vpop.permute.xlu0 %1374 }
 0x360   : > { %v2679_v41 = vmax.f32 %v2349_v54, 0.0 }
 0x361   : > { %v2678_v24 = vmax.f32 %v2344_v61, 0.0  ;;  %v5518_v30 = vpop.f32.mrb[60].mxu1  ;;  %v9728_v56 = vpack.c.bf16 %v8616_v43, %v8621_v12 }
 0x362   : > { %v8628_v57 = vmul.f32 %v2807_v27, %v2679_v41  ;;  %v2359_v31 = vadd.f32 %v5518_v30, %v8540_v33  ;;  %v2353_v18 = vpop.f32.mrb[61].mxu1  ;;  %v9719_v33 = vld [vmem:[#allocation53_spill] sm:$0xff]  ;;  %v2810_v27 = vld [vmem:[#allocation8 + $0x280] sm:$0xff] }
 0x363   : > { %v8631_v0 = vmul.f32 %v2806_v17, %v2678_v24  ;;  %v2354_v34 = vadd.f32 %v2353_v18, %v8542_v16  ;;  %v9720_v16 = vld [vmem:[#allocation52_spill] sm:$0xff]  ;;  %v9721_v30 = vld [vmem:[#allocation57_spill] sm:$0xff] }
 0x364   : > { %v2681_v35 = vmax.f32 %v2359_v31, 0.0 }
 0x365   : > { %v2680_v50 = vmax.f32 %v2354_v34, 0.0  ;;  %v5521_v39 = vpop.f32.mrb[62].mxu1 }
 0x366   : > { %v8640_v2 = vmul.f32 %v2809_v7, %v2681_v35  ;;  %v2369_v21 = vadd.f32 %v5521_v39, %v9719_v33  ;;  %v2363_v10 = vpop.f32.mrb[63].mxu1  ;;  %v8649_v7 = vpop.permute.xlu1 %1469  ;;  %v2813_v35 = vld [vmem:[#allocation8 + $0x298] sm:$0xff] }
 0x367   : > { %v8643_v15 = vmul.f32 %v2808_v51, %v2680_v50  ;;  %v2364_v54 = vadd.f32 %v2363_v10, %v9720_v16  ;;  %v9722_v51 = vld [vmem:[#allocation56_spill] sm:$0xff]  ;;  %v8652_v39 = vpop.permute.xlu0 %1464 }
 0x368   : > { %v2683_v13 = vmax.f32 %v2369_v21, 0.0  ;;  %v2812_v21 = vld [vmem:[#allocation8 + $0x290] sm:$0xff] }
 0x369   : > { %v2682_v41 = vmax.f32 %v2364_v54, 0.0  ;;  %v5524_v17 = vpop.f32.mrb[64].mxu1  ;;  %v9723_v54 = vld [vmem:[#allocation61_spill] sm:$0xff] }
 0x36a   : > { %v2939_v24 = vmul.f32 %v2811_v37, %v2683_v13  ;;  %v2379_v31 = vadd.f32 %v5524_v17, %v9721_v30  ;;  %v2373_v18 = vpop.f32.mrb[65].mxu1  ;;  %v2815_v17 = vld [vmem:[#allocation8 + $0x2a8] sm:$0xff] }
 0x36b   : > { %v2938_v34 = vmul.f32 %v2810_v27, %v2682_v41  ;;  %v2374_v50 = vadd.f32 %v2373_v18, %v9722_v51  ;;  %v9724_v30 = vld [vmem:[#allocation60_spill] sm:$0xff]  ;;  %v2814_v41 = vld [vmem:[#allocation8 + $0x2a0] sm:$0xff] }
 0x36c   : > { %v2685_v33 = vmax.f32 %v2379_v31, 0.0  ;;  %v8659_v31 = vpop.permute.xlu1 %1389 }
 0x36d   : > { %v2684_v10 = vmax.f32 %v2374_v50, 0.0  ;;  %v5527_v16 = vpop.f32.mrb[66].mxu1  ;;  %v5690_v53 = vpack.c.bf16 %v2939_v24, %v2938_v34  ;;  %v8661_v34 = vpop.permute.xlu0 %1384  ;;  %v9725_v50 = vld [vmem:[#allocation64_spill] sm:$0xff] }
 0x36e   : > { %v2941_v61 = vmul.f32 %v2813_v35, %v2685_v33  ;;  %v2389_v44 = vadd.f32 %v5527_v16, %v9723_v54  ;;  %v2383_v37 = vpop.f32.mrb[67].mxu1  ;;  %v2817_v16 = vld [vmem:[#allocation8 + $0x2b8] sm:$0xff] }
 0x36f   : > { %v2940_v13 = vmul.f32 %v2812_v21, %v2684_v10  ;;  %v2384_v36 = vadd.f32 %v2383_v37, %v9724_v30  ;;  %5691 = vmatprep.subr.bf16.mxu0 %v5690_v53  ;;  %v9726_v53 = vld [vmem:[#allocation66_spill] sm:$0xff]  ;;  %v2816_v37 = vld [vmem:[#allocation8 + $0x2b0] sm:$0xff] }
 0x370   : > { %v2687_v27 = vmax.f32 %v2389_v44, 0.0  ;;  %5693 = vmatpush3.bf16.msra.mxu0 %v5692_v63 }
 0x371   : > { %v2686_v18 = vmax.f32 %v2384_v36, 0.0  ;;  %v5530_v51 = vpop.f32.mrb[68].mxu1  ;;  %v5694_v24 = vpack.c.bf16 %v2941_v61, %v2940_v13 }
 0x372   : > { %v2943_v35 = vmul.f32 %v2815_v17, %v2687_v27  ;;  %v2399_v33 = vadd.f32 %v5530_v51, %v9725_v50  ;;  %v2393_v21 = vpop.f32.mrb[69].mxu1  ;;  %v8669_v17 = vpop.permute.xlu1 %1479  ;;  %v2819_v27 = vld [vmem:[#allocation8 + $0x2c8] sm:$0xff] }
 0x373   : > { %v2942_v10 = vmul.f32 %v2814_v41, %v2686_v18  ;;  %v2394_v44 = vadd.f32 %v2393_v21, %v9726_v53  ;;  %5695 = vmatprep.subr.bf16.mxu0 %v5694_v24  ;;  %v8672_v18 = vpop.permute.xlu0 %1474  ;;  %v2818_v24 = vld [vmem:[#allocation8 + $0x2c0] sm:$0xff]  ;;  %v2821_v21 = vld [vmem:[#allocation8 + $0x2d8] sm:$0xff] }
 0x374   : > { %v2689_v54 = vmax.f32 %v2399_v33, 0.0  ;;  %5697 = vmatpush3.bf16.msra.mxu0 %v5696_v8 }
 0x375   : > { %v2688_v48 = vmax.f32 %v2394_v44, 0.0  ;;  %v5533_v55 = vpop.f32.mrb[70].mxu1  ;;  %v5698_v63 = vpack.c.bf16 %v2943_v35, %v2942_v10 }
 0x376   : > { %v2945_v36 = vmul.f32 %v2817_v16, %v2689_v54  ;;  %v2409_v61 = vadd.f32 %v5533_v55, %v8412_v26  ;;  %v2403_v13 = vpop.f32.mrb[71].mxu1  ;;  %v2820_v16 = vld [vmem:[#allocation8 + $0x2d0] sm:$0xff]  ;;  %v8682_v20 = vpop.permute.xlu1 %1399 }
 0x377   : > { %v2944_v30 = vmul.f32 %v2816_v37, %v2688_v48  ;;  %v2404_v41 = vadd.f32 %v2403_v13, %v8417_v23  ;;  %5699 = vmatprep.subr.bf16.mxu0 %v5698_v63  ;;  %v8684_v44 = vpop.permute.xlu0 %1394 }
 0x378   : > { %v2691_v51 = vmax.f32 %v2409_v61, 0.0  ;;  %5701 = vmatpush3.bf16.msra.mxu0 %v5700_v28 }
 0x379   : > { %v2690_v62 = vmax.f32 %v2404_v41, 0.0  ;;  %v5536_v5 = vpop.f32.mrb[72].mxu1  ;;  %v5702_v8 = vpack.c.bf16 %v2945_v36, %v2944_v30  ;;  %v2822_v36 = vld [vmem:[#allocation8 + $0x2e0] sm:$0xff] }
 0x37a   : > { %v2947_v26 = vmul.f32 %v2819_v27, %v2691_v51  ;;  %v2419_v35 = vadd.f32 %v5536_v5, %v8462_v47  ;;  %v2413_v50 = vpop.f32.mrb[73].mxu1  ;;  %v2825_v51 = vld [vmem:[#allocation8 + $0x2f8] sm:$0xff]  ;;  %v2824_v5 = vld [vmem:[#allocation8 + $0x2f0] sm:$0xff] }
 0x37b   : > { %v2946_v33 = vmul.f32 %v2818_v24, %v2690_v62  ;;  %v2414_v23 = vadd.f32 %v2413_v50, %v8467_v14  ;;  %5703 = vmatprep.subr.bf16.mxu0 %v5702_v8  ;;  %v2823_v14 = vld [vmem:[#allocation8 + $0x2e8] sm:$0xff]  ;;  %v8695_v24 = vpop.permute.xlu0 %1484 }
 0x37c   : > { %v2693_v10 = vmax.f32 %v2419_v35, 0.0  ;;  %5705 = vmatpush3.bf16.msra.mxu0 %v5704_v38 }
 0x37d   : > { %v2692_v60 = vmax.f32 %v2414_v23, 0.0  ;;  %v5539_v28 = vpop.f32.mrb[74].mxu1  ;;  %v5706_v53 = vpack.c.bf16 %v2947_v26, %v2946_v33 }
 0x37e   : > { %v2949_v47 = vmul.f32 %v2821_v21, %v2693_v10  ;;  %v2429_v54 = vadd.f32 %v5539_v28, %v8504_v29  ;;  %v2423_v37 = vpop.f32.mrb[75].mxu1  ;;  %v8692_v29 = vpop.permute.xlu1 %1489  ;;  %v2827_v21 = vld [vmem:[#allocation8 + $0x308] sm:$0xff]  ;;  %v2826_v10 = vld [vmem:[#allocation8 + $0x300] sm:$0xff] }
 0x37f   : > { %v2948_v48 = vmul.f32 %v2820_v16, %v2692_v60  ;;  %v2424_v55 = vadd.f32 %v2423_v37, %v8507_v22  ;;  %5707 = vmatprep.subr.bf16.mxu0 %v5706_v53  ;;  %v9729_v16 = vpack.c.bf16 %v8628_v57, %v8631_v0  ;;  %v1405_v53 = vpop.permute.xlu0 %1404  ;;  %v9730_v57 = vpack.c.bf16 %v8640_v2, %v8643_v15  ;;  %v2990_v0 = vld [vmem:[#allocation9 + $0x20] sm:$0xff] }
 0x380   : > { %v2695_v63 = vmax.f32 %v2429_v54, 0.0  ;;  %5709 = vmatpush3.bf16.msra.mxu0 %v9727_v52 }
 0x381   : > { %v2694_v4 = vmax.f32 %v2424_v55, 0.0  ;;  %v5542_v38 = vpop.f32.mrb[76].mxu1  ;;  %v5710_v61 = vpack.c.bf16 %v2949_v47, %v2948_v48  ;;  %v2828_v55 = vld [vmem:[#allocation8 + $0x310] sm:$0xff] }
 0x382   : > { %v2951_v13 = vmul.f32 %v2823_v14, %v2695_v63  ;;  %v2439_v30 = vadd.f32 %v5542_v38, %v8527_v58  ;;  %v2433_v27 = vpop.f32.mrb[77].mxu1  ;;  %v1410_v43 = vpop.permute.xlu1 %1409 }
 0x383   : > { %v2950_v41 = vmul.f32 %v2822_v36, %v2694_v4  ;;  %v2434_v22 = vadd.f32 %v2433_v27, %v8530_v46  ;;  %5711 = vmatprep.subr.bf16.mxu0 %v5710_v61  ;;  %v8724_v15 = vpop.permute.xlu0 %1494 }
 0x384   : > { %v2697_v62 = vmax.f32 %v2439_v30, 0.0  ;;  %5713 = vmatpush3.bf16.msra.mxu0 %v9728_v56  ;;  %v2831_v30 = vld [vmem:[#allocation8 + $0x328] sm:$0xff] }
 0x385   : > { %v2696_v9 = vmax.f32 %v2434_v22, 0.0  ;;  %v5545_v8 = vpop.f32.mrb[78].mxu1  ;;  %v5714_v26 = vpack.c.bf16 %v2951_v13, %v2950_v41  ;;  %v2830_v41 = vld [vmem:[#allocation8 + $0x320] sm:$0xff] }
 0x386   : > { %v2953_v58 = vmul.f32 %v2825_v51, %v2697_v62  ;;  %v2449_v35 = vadd.f32 %v5545_v8, %v8567_v19  ;;  %v2443_v50 = vpop.f32.mrb[79].mxu1  ;;  %v2833_v8 = vld [vmem:[#allocation8 + $0x338] sm:$0xff] }
 0x387   : > { %v2952_v33 = vmul.f32 %v2824_v5, %v2696_v9  ;;  %v2444_v46 = vadd.f32 %v2443_v50, %v8571_v49  ;;  %5715 = vmatprep.subr.bf16.mxu0 %v5714_v26  ;;  %v2829_v49 = vld [vmem:[#allocation8 + $0x318] sm:$0xff] }
 0x388   : > { %v2699_v23 = vmax.f32 %v2449_v35, 0.0  ;;  %5717 = vmatpush3.bf16.msra.mxu0 %v9729_v16 }
 0x389   : > { %v2698_v12 = vmax.f32 %v2444_v46, 0.0  ;;  %v5548_v60 = vpop.f32.mrb[80].mxu1  ;;  %v5718_v28 = vpack.c.bf16 %v2953_v58, %v2952_v33  ;;  %v2832_v58 = vld [vmem:[#allocation8 + $0x330] sm:$0xff]  ;;  %v1415_v46 = vpop.permute.xlu0 %1414 }
 0x38a   : > { %v8705_v47 = vmul.f32 %v2827_v21, %v2699_v23  ;;  %v2459_v19 = vadd.f32 %v5548_v60, %v8602_v25  ;;  %v2453_v54 = vpop.f32.mrb[81].mxu1  ;;  %v2993_v25 = vld [vmem:[#allocation9 + $0x38] sm:$0xff] }
 0x38b   : > { %v8708_v37 = vmul.f32 %v2826_v10, %v2698_v12  ;;  %v2454_v48 = vadd.f32 %v2453_v54, %v8606_v1  ;;  %5719 = vmatprep.subr.bf16.mxu0 %v5718_v28  ;;  %v8719_v1 = vpop.permute.xlu1 %1499  ;;  %v2835_v12 = vld [vmem:[#allocation8 + $0x348] sm:$0xff]  ;;  %v2834_v28 = vld [vmem:[#allocation8 + $0x340] sm:$0xff] }
 0x38c   : > { %v2701_v14 = vmax.f32 %v2459_v19, 0.0  ;;  %5721 = vmatpush3.bf16.msra.mxu0 %v9730_v57 }
 0x38d   : > { %v5724_v63 = vpack.c.bf16 %v8705_v47, %v8708_v37  ;;  %v2700_v36 = vmax.f32 %v2454_v48, 0.0  ;;  %v5551_v52 = vpop.f32.mrb[82].mxu1 }
 0x38e   : > { %v8716_v4 = vmul.f32 %v2829_v49, %v2701_v14  ;;  %v2469_v38 = vadd.f32 %v5551_v52, %v8634_v42  ;;  %v2463_v61 = vpop.f32.mrb[83].mxu1  ;;  %v8750_v52 = vpop.permute.xlu0 %1504 }
 0x38f   : > { %v8721_v13 = vmul.f32 %v2828_v55, %v2700_v36  ;;  %v2464_v2 = vadd.f32 %v2463_v61, %v8638_v59  ;;  %3199 = vmatmul.mubr.f32.vlgmr.msra.gmra.mrb[30].mxu0 %v2990_v0  ;;  %v1420_v35 = vpop.permute.xlu1 %1419  ;;  %v2837_v0 = vld [vmem:[#allocation8 + $0x358] sm:$0xff] }
 0x390   : > { %v2703_v27 = vmax.f32 %v2469_v38, 0.0  ;;  %3268 = vmatprep.mubr.f32.mxu0 %v2993_v25  ;;  %v2836_v25 = vld [vmem:[#allocation8 + $0x350] sm:$0xff] }
 0x391   : > { %v5728_v51 = vpack.c.bf16 %v8716_v4, %v8721_v13  ;;  %v2702_v22 = vmax.f32 %v2464_v2, 0.0  ;;  %v5554_v62 = vpop.f32.mrb[84].mxu1 }
 0x392   : > { %v8728_v42 = vmul.f32 %v2831_v30, %v2703_v27  ;;  %v2479_v5 = vadd.f32 %v5554_v62, %v8659_v31  ;;  %v2473_v56 = vpop.f32.mrb[85].mxu1 }
 0x393   : > { %v8731_v9 = vmul.f32 %v2830_v41, %v2702_v22  ;;  %v2474_v59 = vadd.f32 %v2473_v56, %v8661_v34  ;;  %v8746_v57 = vpop.permute.xlu1 %1509  ;;  %v2839_v22 = vld [vmem:[#allocation8 + $0x368] sm:$0xff]  ;;  %v2838_v56 = vld [vmem:[#allocation8 + $0x360] sm:$0xff] }
 0x394   : > { %v2705_v26 = vmax.f32 %v2479_v5, 0.0 }
 0x395   : > { %v5732_v50 = vpack.c.bf16 %v8728_v42, %v8731_v9  ;;  %v2704_v33 = vmax.f32 %v2474_v59, 0.0  ;;  %v5557_v21 = vpop.f32.mrb[86].mxu1 }
 0x396   : > { %v8736_v23 = vmul.f32 %v2833_v8, %v2705_v26  ;;  %v2489_v10 = vadd.f32 %v5557_v21, %v8682_v20  ;;  %v2483_v31 = vpop.f32.mrb[87].mxu1 }
 0x397   : > { %v8739_v16 = vmul.f32 %v2832_v58, %v2704_v33  ;;  %v2484_v60 = vadd.f32 %v2483_v31, %v8684_v44  ;;  %v1425_v58 = vpop.permute.xlu0 %1424 }
 0x398   : > { %v2707_v34 = vmax.f32 %v2489_v10, 0.0 }
 0x399   : > { %v5736_v19 = vpack.c.bf16 %v8736_v23, %v8739_v16  ;;  %v2706_v54 = vmax.f32 %v2484_v60, 0.0  ;;  %v5560_v49 = vpop.f32.mrb[88].mxu1 }
 0x39a   : > { %v8744_v48 = vmul.f32 %v2835_v12, %v2707_v34  ;;  %v2499_v14 = vadd.f32 %v5560_v49, %v1410_v43  ;;  %v2493_v55 = vpop.f32.mrb[89].mxu1  ;;  %v2840_v34 = vld [vmem:[#allocation8 + $0x370] sm:$0xff] }
 0x39b   : > { %v8748_v20 = vmul.f32 %v2834_v28, %v2706_v54  ;;  %v2494_v36 = vadd.f32 %v2493_v55, %v1405_v53  ;;  %v1430_v53 = vpop.permute.xlu1 %1429 }
 0x39c   : > { %v2709_v44 = vmax.f32 %v2499_v14, 0.0 }
 0x39d   : > { %v5740_v38 = vpack.c.bf16 %v8744_v48, %v8748_v20  ;;  %v2708_v61 = vmax.f32 %v2494_v36, 0.0  ;;  %v5563_v30 = vpop.f32.mrb[90].mxu1  ;;  %v2843_v36 = vld [vmem:[#allocation8 + $0x388] sm:$0xff] }
 0x39e   : > { %v8754_v2 = vmul.f32 %v2837_v0, %v2709_v44  ;;  %v2509_v27 = vadd.f32 %v5563_v30, %v1420_v35  ;;  %v2503_v43 = vpop.f32.mrb[91].mxu1  ;;  %v2841_v35 = vld [vmem:[#allocation8 + $0x378] sm:$0xff] }
 0x39f   : > { %v8756_v41 = vmul.f32 %v2836_v25, %v2708_v61  ;;  %v2504_v62 = vadd.f32 %v2503_v43, %v1415_v46  ;;  %v2842_v61 = vld [vmem:[#allocation8 + $0x380] sm:$0xff] }
 0x3a0   : > { %v2711_v5 = vmax.f32 %v2509_v27, 0.0 }
 0x3a1   : > { %v5744_v8 = vpack.c.bf16 %v8754_v2, %v8756_v41  ;;  %v2710_v59 = vmax.f32 %v2504_v62, 0.0  ;;  %v5566_v26 = vpop.f32.mrb[92].mxu1  ;;  %v9732_v2 = vld [vmem:[#allocation28_spill] sm:$0xff] }
 0x3a2   : > { %v8760_v33 = vmul.f32 %v2839_v22, %v2711_v5  ;;  %v2519_v21 = vadd.f32 %v5566_v26, %v1430_v53  ;;  %v2513_v10 = vpop.f32.mrb[93].mxu1  ;;  %v2845_v53 = vld [vmem:[#allocation8 + $0x398] sm:$0xff]  ;;  %v2844_v26 = vld [vmem:[#allocation8 + $0x390] sm:$0xff] }
 0x3a3   : > { %v8762_v31 = vmul.f32 %v2838_v56, %v2710_v59  ;;  %v2514_v12 = vadd.f32 %v2513_v10, %v1425_v58 }
 0x3a4   : > { %v2713_v60 = vmax.f32 %v2519_v21, 0.0 }
 0x3a5   : > { %v5748_v46 = vpack.c.bf16 %v8760_v33, %v8762_v31  ;;  %v2712_v28 = vmax.f32 %v2514_v12, 0.0  ;;  %v5569_v54 = vpop.f32.mrb[94].mxu1  ;;  %v3356_v31 = vld [vmem:[%s9737_s1 + $0x8] sm:$0xff] }
 0x3a6   : > { %v8766_v49 = vmul.f32 %v2841_v35, %v2713_v60  ;;  %v2529_v14 = vadd.f32 %v5569_v54, %v8550_v45  ;;  %v2523_v55 = vpop.f32.mrb[95].mxu1  ;;  %v2846_v54 = vld [vmem:[#allocation8 + $0x3a0] sm:$0xff] }
 0x3a7   : > { %v8769_v0 = vmul.f32 %v2840_v34, %v2712_v28  ;;  %v2524_v44 = vadd.f32 %v2523_v55, %v8553_v32  ;;  %v2847_v34 = vld [vmem:[#allocation8 + $0x3a8] sm:$0xff] }
 0x3a8   : > { %v2715_v25 = vmax.f32 %v2529_v14, 0.0 }
 0x3a9   : > { %v5752_v30 = vpack.c.bf16 %v8766_v49, %v8769_v0  ;;  %v2714_v27 = vmax.f32 %v2524_v44, 0.0  ;;  %v5572_v43 = vpop.f32.mrb[96].mxu1  ;;  %v6735_v49 = vmov 0.0  }
 0x3aa   : > { %v2971_v22 = vmul.f32 %v2843_v36, %v2715_v25  ;;  %v2539_v62 = vadd.f32 %v5572_v43, %v8587_v6  ;;  %v2533_v5 = vpop.f32.mrb[97].mxu1  ;;  %v2848_v43 = vld [vmem:[#allocation8 + $0x3b0] sm:$0xff] }
 0x3ab   : > { %v2970_v56 = vmul.f32 %v2842_v61, %v2714_v27  ;;  %v2534_v45 = vadd.f32 %v2533_v5, %v8592_v40  ;;  %v2849_v61 = vld [vmem:[#allocation8 + $0x3b8] sm:$0xff] }
 0x3ac   : > { %v2717_v59 = vmax.f32 %v2539_v62, 0.0 }
 0x3ad   : > { %v2716_v58 = vmax.f32 %v2534_v45, 0.0  ;;  %v5575_v21 = vpop.f32.mrb[98].mxu1  ;;  %v5722_v32 = vpack.c.bf16 %v2971_v22, %v2970_v56  ;;  %v2851_v56 = vld [vmem:[#allocation8 + $0x3c8] sm:$0xff]  ;;  %v2850_v45 = vld [vmem:[#allocation8 + $0x3c0] sm:$0xff] }
 0x3ae   : > { %v2973_v10 = vmul.f32 %v2845_v53, %v2717_v59  ;;  %v2549_v35 = vadd.f32 %v5575_v21, %v8619_v3  ;;  %v2543_v12 = vpop.f32.mrb[99].mxu1  ;;  %v2853_v21 = vld [vmem:[#allocation8 + $0x3d8] sm:$0xff] }
 0x3af   : > { %v2972_v60 = vmul.f32 %v2844_v26, %v2716_v58  ;;  %v2544_v28 = vadd.f32 %v2543_v12, %v8624_v11  ;;  %5723 = vmatprep.subr.bf16.mxu0 %v5722_v32 }
 0x3b0   : > { %v2719_v6 = vmax.f32 %v2549_v35, 0.0  ;;  %5725 = vmatpush3.bf16.msra.mxu0 %v5724_v63 }
 0x3b1   : > { %v2718_v40 = vmax.f32 %v2544_v28, 0.0  ;;  %v5578_v14 = vpop.f32.mrb[100].mxu1  ;;  %v5726_v55 = vpack.c.bf16 %v2973_v10, %v2972_v60  ;;  %v2852_v10 = vld [vmem:[#allocation8 + $0x3d0] sm:$0xff] }
 0x3b2   : > { %v2975_v36 = vmul.f32 %v2847_v34, %v2719_v6  ;;  %v2559_v44 = vadd.f32 %v5578_v14, %v8649_v7  ;;  %v2553_v25 = vpop.f32.mrb[101].mxu1  ;;  %v2855_v34 = vld [vmem:[#allocation8 + $0x3e8] sm:$0xff]  ;;  %v2854_v6 = vld [vmem:[#allocation8 + $0x3e0] sm:$0xff] }
 0x3b3   : > { %v2974_v3 = vmul.f32 %v2846_v54, %v2718_v40  ;;  %v2554_v27 = vadd.f32 %v2553_v25, %v8652_v39  ;;  %5727 = vmatprep.subr.bf16.mxu0 %v5726_v55  ;;  %v2857_v55 = vld [vmem:[#allocation8 + $0x3f8] sm:$0xff] }
 0x3b4   : > { %v2721_v11 = vmax.f32 %v2559_v44, 0.0  ;;  %5729 = vmatpush3.bf16.msra.mxu0 %v5728_v51  ;;  %v2856_v44 = vld [vmem:[#allocation8 + $0x3f0] sm:$0xff] }
 0x3b5   : > { %v2720_v47 = vmax.f32 %v2554_v27, 0.0  ;;  %v5581_v37 = vpop.f32.mrb[102].mxu1  ;;  %v5730_v63 = vpack.c.bf16 %v2975_v36, %v2974_v3  ;;  %v9731_v3 = vld [vmem:[#allocation29_spill] sm:$0xff] }
 0x3b6   : > { %v2977_v22 = vmul.f32 %v2849_v61, %v2721_v11  ;;  %v2569_v62 = vadd.f32 %v5581_v37, %v8669_v17  ;;  %v2563_v5 = vpop.f32.mrb[103].mxu1  ;;  %v9733_v41 = vpack.c.bf16 %v9731_v3, %v9732_v2  ;;  %v9735_v61 = vld [vmem:[#allocation30_spill] sm:$0xff]  ;;  %v3360_v37 = vld [vmem:[%s9737_s1 + $0x28] sm:$0xff] }
 0x3b7   : > { %v2976_v7 = vmul.f32 %v2848_v43, %v2720_v47  ;;  %v2564_v53 = vadd.f32 %v2563_v5, %v8672_v18  ;;  %5731 = vmatprep.subr.bf16.mxu0 %v5730_v63  ;;  %v6314_v11 = vld [vmem:[%s7124_s10 + $0x28] sm:$0xff]  ;;  %v6315_v43 = vld [vmem:[%s7124_s10 + $0x38] sm:$0xff]  ;;  %v3357_v47 = vld [vmem:[%s9737_s1 + $0x10] sm:$0xff] }
 0x3b8   : > { %v2723_v39 = vmax.f32 %v2569_v62, 0.0  ;;  %5733 = vmatpush3.bf16.msra.mxu0 %v5732_v50  ;;  %v5758_v33 = vpack.c.bf16 %v6315_v43, %v6314_v11  ;;  %v3362_v63 = vld [vmem:[%s9737_s1 + $0x38] sm:$0xff]  ;;  %v9739_v62 = vld [vmem:[#allocation32_spill] sm:$0xff] }
 0x3b9   : > { %v2722_v4 = vmax.f32 %v2564_v53, 0.0  ;;  %v5584_v13 = vpop.f32.mrb[104].mxu1  ;;  %v5734_v51 = vpack.c.bf16 %v2977_v22, %v2976_v7  ;;  %v9738_v22 = vld [vmem:[#allocation33_spill] sm:$0xff]  ;;  %v3274_v7 = vld [vmem:[#allocation11] sm:$0xff]  ;;  %v5766_v53 = vpack.c.bf16 %v3362_v63, %v3360_v37 }
 0x3ba   : > { %v2979_v59 = vmul.f32 %v2851_v56, %v2723_v39  ;;  %v2579_v26 = vadd.f32 %v5584_v13, %v8692_v29  ;;  %v2573_v58 = vpop.f32.mrb[105].mxu1  ;;  %v9740_v5 = vpack.c.bf16 %v9738_v22, %v9739_v62  ;;  %v3359_v39 = vld [vmem:[%s9737_s1 + $0x20] sm:$0xff]  ;;  %v3366_v13 = vld [vmem:[%s9737_s1 + $0x58] sm:$0xff] }
 0x3bb   : > { %v2978_v17 = vmul.f32 %v2850_v45, %v2722_v4  ;;  %v2574_v32 = vadd.f32 %v2573_v58, %v8695_v24  ;;  %5735 = vmatprep.subr.bf16.mxu0 %v5734_v51  ;;  %v3361_v45 = vld [vmem:[%s9737_s1 + $0x30] sm:$0xff]  ;;  %v3364_v4 = vld [vmem:[%s9737_s1 + $0x48] sm:$0xff] }
 0x3bc   : > { %v2725_v18 = vmax.f32 %v2579_v26, 0.0  ;;  %5737 = vmatpush3.bf16.msra.mxu0 %v5736_v19  ;;  %v5768_v51 = vpack.c.bf16 %v3361_v45, %v3359_v39  ;;  %v3363_v26 = vld [vmem:[%s9737_s1 + $0x40] sm:$0xff]  ;;  %v3365_v58 = vld [vmem:[%s9737_s1 + $0x50] sm:$0xff] }
 0x3bd   : > { %v2724_v42 = vmax.f32 %v2574_v32, 0.0  ;;  %v5587_v9 = vpop.f32.mrb[106].mxu1  ;;  %v5738_v50 = vpack.c.bf16 %v2979_v59, %v2978_v17  ;;  %v5770_v59 = vpack.c.bf16 %v3366_v13, %v3364_v4  ;;  %v3368_v17 = vld [vmem:[%s9737_s1 + $0x68] sm:$0xff]  ;;  %v5772_v32 = vpack.c.bf16 %v3365_v58, %v3363_v26 }
 0x3be   : > { %v2981_v35 = vmul.f32 %v2853_v21, %v2725_v18  ;;  %v2589_v12 = vadd.f32 %v5587_v9, %v8719_v1  ;;  %v2583_v60 = vpop.f32.mrb[107].mxu1  ;;  %v3370_v21 = vld [vmem:[%s9737_s1 + $0x78] sm:$0xff]  ;;  %v3372_v9 = vld [vmem:[%s9737_s1 + $0x88] sm:$0xff] }
 0x3bf   : > { %v2980_v29 = vmul.f32 %v2852_v10, %v2724_v42  ;;  %v2584_v28 = vadd.f32 %v2583_v60, %v8724_v15  ;;  %5739 = vmatprep.subr.bf16.mxu0 %v5738_v50  ;;  %v5774_v18 = vpack.c.bf16 %v3370_v21, %v3368_v17  ;;  %v3367_v10 = vld [vmem:[%s9737_s1 + $0x60] sm:$0xff]  ;;  %v3369_v42 = vld [vmem:[%s9737_s1 + $0x70] sm:$0xff]  ;;  %v3374_v50 = vld [vmem:[%s9737_s1 + $0x98] sm:$0xff] }
 0x3c0   : > { %v2727_v24 = vmax.f32 %v2589_v12, 0.0  ;;  %5741 = vmatpush3.bf16.msra.mxu0 %v5740_v38  ;;  %v5778_v12 = vpack.c.bf16 %v3374_v50, %v3372_v9  ;;  %v3371_v60 = vld [vmem:[%s9737_s1 + $0x80] sm:$0xff] }
 0x3c1   : > { %v2726_v23 = vmax.f32 %v2584_v28, 0.0  ;;  %v5590_v16 = vpop.f32.mrb[108].mxu1  ;;  %v5742_v19 = vpack.c.bf16 %v2981_v35, %v2980_v29  ;;  %v5776_v35 = vpack.c.bf16 %v3369_v42, %v3367_v10  ;;  %v3373_v29 = vld [vmem:[%s9737_s1 + $0x90] sm:$0xff]  ;;  %v3378_v28 = vld [vmem:[%s9737_s1 + $0xb8] sm:$0xff] }
 0x3c2   : > { %v2983_v54 = vmul.f32 %v2855_v34, %v2727_v24  ;;  %v2599_v40 = vadd.f32 %v5590_v16, %v8746_v57  ;;  %v2593_v14 = vpop.f32.mrb[109].mxu1  ;;  %v3376_v34 = vld [vmem:[%s9737_s1 + $0xa8] sm:$0xff]  ;;  %v5780_v24 = vpack.c.bf16 %v3373_v29, %v3371_v60  ;;  %v3377_v16 = vld [vmem:[%s9737_s1 + $0xb0] sm:$0xff] }
 0x3c3   : > { %v2982_v1 = vmul.f32 %v2854_v6, %v2726_v23  ;;  %v2594_v36 = vadd.f32 %v2593_v14, %v8750_v52  ;;  %5743 = vmatprep.subr.bf16.mxu0 %v5742_v19  ;;  %v2992_v52 = vld [vmem:[#allocation9 + $0x30] sm:$0xff]  ;;  %v5782_v6 = vpack.c.bf16 %v3378_v28, %v3376_v34  ;;  %v3375_v23 = vld [vmem:[%s9737_s1 + $0xa0] sm:$0xff]  ;;  %v3380_v19 = vld [vmem:[%s9737_s1 + $0xc8] sm:$0xff] }
 0x3c4   : > { %v2729_v15 = vmax.f32 %v2599_v40, 0.0  ;;  %5745 = vmatpush3.bf16.msra.mxu0 %v5744_v8  ;;  %v9734_v8 = vld [vmem:[#allocation31_spill] sm:$0xff]  ;;  %v5784_v40 = vpack.c.bf16 %v3377_v16, %v3375_v23 }
 0x3c5   : > { %v2728_v48 = vmax.f32 %v2594_v36, 0.0  ;;  %v5746_v20 = vpack.c.bf16 %v2983_v54, %v2982_v1  ;;  %v9736_v27 = vpack.c.bf16 %v9734_v8, %v9735_v61  ;;  %v3382_v54 = vld [vmem:[%s9737_s1 + $0xd8] sm:$0xff]  ;;  %v3379_v1 = vld [vmem:[%s9737_s1 + $0xc0] sm:$0xff] }
 0x3c6   : > { %v2985_v38 = vmul.f32 %v2857_v55, %v2729_v15  ;;  %v5786_v14 = vpack.c.bf16 %v3382_v54, %v3380_v19  ;;  %v3381_v55 = vld [vmem:[%s9737_s1 + $0xd0] sm:$0xff] }
 0x3c7   : > { %v2984_v25 = vmul.f32 %v2856_v44, %v2728_v48  ;;  %5747 = vmatprep.subr.bf16.mxu0 %v5746_v20  ;;  %v5788_v36 = vpack.c.bf16 %v3381_v55, %v3379_v1  ;;  %v3384_v20 = vld [vmem:[%s9737_s1 + $0xe8] sm:$0xff] }
 0x3c8   : > { %5749 = vmatpush3.bf16.msra.mxu0 %v5748_v46  ;;  %v3358_v46 = vld [vmem:[%s9737_s1 + $0x18] sm:$0xff] }
 0x3c9   : > { %v5750_v57 = vpack.c.bf16 %v2985_v38, %v2984_v25  ;;  %v5762_v0 = vpack.c.bf16 %v3358_v46, %v3356_v31  ;;  %v3386_v38 = vld [vmem:[%s9737_s1 + $0xf8] sm:$0xff] }
 0x3ca   : > { %v5790_v25 = vpack.c.bf16 %v3386_v38, %v3384_v20 }
 0x3cb   : > { %5751 = vmatprep.subr.bf16.mxu0 %v5750_v57  ;;  %v3383_v57 = vld [vmem:[%s9737_s1 + $0xe0] sm:$0xff] }
 0x3cc   : > { %5753 = vmatpush3.bf16.msra.mxu0 %v5752_v30  ;;  %v3355_v30 = vld [vmem:[%s9737_s1] sm:$0xff] }
 0x3cd   : > { %5755 = vmatprep.subr.bf16.mxu0 %v9733_v41  ;;  %v5764_v56 = vpack.c.bf16 %v3357_v47, %v3355_v30  ;;  %v3279_v30 = vpop.permute.xlu0 %3278 }
 0x3cf   : > { %3269 = vmatmul.mubr.f32.vlgmr.msra.gmra.mrb[32].mxu0 %v2992_v52  ;;  %v3385_v52 = vld [vmem:[%s9737_s1 + $0xf0] sm:$0xff] }
 0x3d0   : > { %5757 = vmatpush1.bf16.msra.mxu0 %v9736_v27  ;;  %3348 = vmatprep.mubr.f32.mxu0 %v6735_v49  ;;  %v5792_v3 = vpack.c.bf16 %v3385_v52, %v3383_v57 }
 0x3d1   : > { %5759 = vmatprep.subr.bf16.mxu0 %v5758_v33 }
 0x3d4   : > { %5761 = vmatpush1.bf16.msra.mxu0 %v9740_v5 }
 0x3d5   : > { %5763 = vmatprep.subr.bf16.mxu0 %v5762_v0 }
 0x3d7   : > { %5104 = vmatmul.mubr.msk.f32.vlgmr.msra.gmra.mrb[34].mxu0 %vm1512_vm1, %v3274_v7 }
 0x3d8   : > { %5765 = vmatpush1.bf16.msra.mxu0 %v5764_v56  ;;  %3451 = vmatprep.mubr.f32.mxu0 %v6735_v49 }
 0x3d9   : > { %5767 = vmatprep.subr.bf16.mxu0 %v5766_v53 }
 0x3dc   : > { %5769 = vmatpush1.bf16.msra.mxu0 %v5768_v51 }
 0x3dd   : > { %5771 = vmatprep.subr.bf16.mxu0 %v5770_v59 }
 0x3e0   : > { %5773 = vmatpush1.bf16.msra.mxu0 %v5772_v32 }
 0x3e1   : > { %5775 = vmatprep.subr.bf16.mxu0 %v5774_v18 }
 0x3e4   : > { %5777 = vmatpush1.bf16.msra.mxu0 %v5776_v35 }
 0x3e5   : > { %5779 = vmatprep.subr.bf16.mxu0 %v5778_v12 }
 0x3e8   : > { %5781 = vmatpush1.bf16.msra.mxu0 %v5780_v24 }
 0x3e9   : > { %5783 = vmatprep.subr.bf16.mxu0 %v5782_v6 }
 0x3ec   : > { %5785 = vmatpush1.bf16.msra.mxu0 %v5784_v40 }
 0x3ed   : > { %5787 = vmatprep.subr.bf16.mxu0 %v5786_v14 }
 0x3f0   : > { %5789 = vmatpush1.bf16.msra.mxu0 %v5788_v36 }
 0x3f1   : > { %5791 = vmatprep.subr.bf16.mxu0 %v5790_v25 }
 0x3f4   : > { %5793 = vmatpush1.bf16.msra.mxu0 %v5792_v3 }
 0x406   : > { %v5283_v15 = vpop.f32.mrb[26].mxu0 }
 0x407   : > { %v5284_v44 = vpop.f32.mrb[27].mxu0 }
 0x408   : > { %v5285_v48 = vadd.f32 %v5284_v44, %v5283_v15 }
 0x426   : > { %v5318_v2 = vpop.f32.mrb[28].mxu0 }
 0x427   : > { %v5319_v41 = vpop.f32.mrb[29].mxu0 }
 0x428   : > { %v5320_v8 = vadd.f32 %v5319_v41, %v5318_v2 }
 0x42a   : > { %v3131_v61 = vadd.f32 %v5320_v8, %v5285_v48 }
 0x462   : > { %v5353_v27 = vpop.f32.mrb[30].mxu0 }
 0x463   : > { %v5354_v11 = vpop.f32.mrb[31].mxu0 }
 0x464   : > { %v5355_v43 = vadd.f32 %v5354_v11, %v5353_v27 }
 0x466   : > { %v3201_v33 = vadd.f32 %v5355_v43, %v3131_v61 }
 0x4a2   : > { %v5388_v31 = vpop.f32.mrb[32].mxu0 }
 0x4a3   : > { %v5389_v46 = vpop.f32.mrb[33].mxu0 }
 0x4a4   : > { %v5390_v49 = vadd.f32 %v5389_v46, %v5388_v31 }
 0x4a6   : > { %v3271_v0 = vadd.f32 %v5390_v49, %v3201_v33 }
 0x4a8   : > { %3452 = vmatmul.mubr.f32.vlgmr.msra.gmra.mrb[34].mxu0 %v3271_v0 }
 0x57b   : > { %v3453_v47 = vpop.f32.mrb[34].mxu0 }
 0x57c   : > { %v6122_v37 = vadd.f32 %v3453_v47, %v3279_v30  ;;  %v3455_v63 = vpop.f32.mrb[35].mxu0 }
 0x57d   : > { %v6123_v22 = vadd.f32 %v3455_v63, %v3279_v30 }
 0x57e   : > { %3460 = vst [vmem:[#allocation2] sm:$0xff] %v6122_v37 }
 0x57f   : > { %3461 = vst.msk [vmem:[#allocation2 + $0x8] sm:$0xff] %vm518_vm0, %v6123_v22 }
 0x580 PF: > { %v3465_v62 = vld [vmem:[%s7139_s16 + $0x8] sm:$0xff]  ;;  %v3483_v5 = vld [vmem:[%s7139_s16 + $0x98] sm:$0xff]  ;;  %v3464_v39 = vld [vmem:[%s7139_s16] sm:$0xff]  ;;  %vm3788_vm2 = vcmask 130048   ;;  %s9742_s30 = sld [smem:[#allocation23_spill]]  ;;  %s9743_s2 = sld [smem:[#allocation21_spill]] }
 0x581   : > { %v3467_v7 = vld [vmem:[%s7139_s16 + $0x18] sm:$0xff]  ;;  %v5794_v56 = vpack.c.bf16 %v3483_v5, %v3465_v62  ;;  %v3485_v53 = vld [vmem:[%s7139_s16 + $0xa8] sm:$0xff]  ;;  %v3482_v45 = vld [vmem:[%s7139_s16 + $0x90] sm:$0xff]  ;;  %s9744_s19 = sld [smem:[#allocation25_spill]]  ;;  %s4808_s6 = sshll.u32 %s7148_s0, 4  ;;  %s9472_s6 = int_to_ptr.vmem [resolvable:$true] %s4808_s6 }
 0x582   : > { %v5830_v4 = vpack.c.bf16 %v3485_v53, %v3467_v7  ;;  %v5796_v13 = vpack.c.bf16 %v3482_v45, %v3464_v39  ;;  %v3466_v51 = vld [vmem:[%s7139_s16 + $0x10] sm:$0xff]  ;;  %v3484_v59 = vld [vmem:[%s7139_s16 + $0xa0] sm:$0xff]  ;;  %v3501_v26 = vld [vmem:[%s7139_s16 + $0x128] sm:$0xff]  ;;  %s9745_s10 = sld [smem:[#allocation75_spill]] }
 0x583   : > { %5795 = vmatprep.subr.bf16.mxu0 %v5794_v56  ;;  %v5832_v58 = vpack.c.bf16 %v3484_v59, %v3466_v51  ;;  %v3519_v17 = vld [vmem:[%s7139_s16 + $0x1b8] sm:$0xff]  ;;  %v3521_v32 = vld [vmem:[%s7139_s16 + $0x1c8] sm:$0xff]  ;;  %v3500_v42 = vld [vmem:[%s7139_s16 + $0x120] sm:$0xff] }
 0x584   : > { %v3503_v21 = vld [vmem:[%s7139_s16 + $0x138] sm:$0xff]  ;;  %5831 = vmatprep.subr.bf16.mxu1 %v5830_v4  ;;  %5797 = vmatpush1.bf16.msra.mxu0 %v5796_v13  ;;  %v5798_v18 = vpack.c.bf16 %v3519_v17, %v3501_v26  ;;  %v3518_v9 = vld [vmem:[%s7139_s16 + $0x1b0] sm:$0xff]  ;;  %v3520_v12 = vld [vmem:[%s7139_s16 + $0x1c0] sm:$0xff] }
 0x585   : > { %v5834_v10 = vpack.c.bf16 %v3521_v32, %v3503_v21  ;;  %v3502_v50 = vld [vmem:[%s7139_s16 + $0x130] sm:$0xff]  ;;  %5833 = vmatpush1.bf16.msra.mxu1 %v5832_v58  ;;  %v5800_v35 = vpack.c.bf16 %v3518_v9, %v3500_v42  ;;  %v3537_v60 = vld [vmem:[%s7139_s16 + $0x248] sm:$0xff]  ;;  %v3555_v29 = vld [vmem:[%s7139_s16 + $0x2d8] sm:$0xff] }
 0x586   : > { %5799 = vmatprep.subr.bf16.mxu0 %v5798_v18  ;;  %v5836_v34 = vpack.c.bf16 %v3520_v12, %v3502_v50  ;;  %v5802_v28 = vpack.c.bf16 %v3555_v29, %v3537_v60  ;;  %v3539_v24 = vld [vmem:[%s7139_s16 + $0x258] sm:$0xff]  ;;  %v3557_v6 = vld [vmem:[%s7139_s16 + $0x2e8] sm:$0xff]  ;;  %v3536_v23 = vld [vmem:[%s7139_s16 + $0x240] sm:$0xff]  ;;  %s6129_s29 = smul.u32 72, %s9742_s30  ;;  %s9746_s30 = sand.u32 1, %s9743_s2  }
 0x587   : > { %5835 = vmatprep.subr.bf16.mxu1 %v5834_v10  ;;  %v5838_v16 = vpack.c.bf16 %v3557_v6, %v3539_v24  ;;  %v3554_v19 = vld [vmem:[%s7139_s16 + $0x2d0] sm:$0xff]  ;;  %v3556_v40 = vld [vmem:[%s7139_s16 + $0x2e0] sm:$0xff]  ;;  %v3573_v1 = vld [vmem:[%s7139_s16 + $0x368] sm:$0xff]  ;;  %p9747_p4 = scmp.ne.s32.totalorder %s9744_s19, 0 }
 0x588   : > { %v3538_v54 = vld [vmem:[%s7139_s16 + $0x250] sm:$0xff]  ;;  %5801 = vmatpush1.bf16.msra.mxu0 %v5800_v35  ;;  %v5804_v14 = vpack.c.bf16 %v3554_v19, %v3536_v23  ;;  %v3591_v55 = vld [vmem:[%s7139_s16 + $0x3f8] sm:$0xff]  ;;  %v3593_v48 = vld [vmem:[%s7139_s16 + $0x408] sm:$0xff] }
 0x589   : > { %v3575_v36 = vld [vmem:[%s7139_s16 + $0x378] sm:$0xff]  ;;  %5837 = vmatpush1.bf16.msra.mxu1 %v5836_v34  ;;  %5803 = vmatprep.subr.bf16.mxu0 %v5802_v28  ;;  %v5840_v15 = vpack.c.bf16 %v3556_v40, %v3538_v54  ;;  %v5806_v44 = vpack.c.bf16 %v3591_v55, %v3573_v1  ;;  %v3572_v20 = vld [vmem:[%s7139_s16 + $0x360] sm:$0xff]  ;;  %v3590_v38 = vld [vmem:[%s7139_s16 + $0x3f0] sm:$0xff] }
 0x58a   : > { %5839 = vmatprep.subr.bf16.mxu1 %v5838_v16  ;;  %v5842_v25 = vpack.c.bf16 %v3593_v48, %v3575_v36  ;;  %v3574_v57 = vld [vmem:[%s7139_s16 + $0x370] sm:$0xff]  ;;  %v3592_v52 = vld [vmem:[%s7139_s16 + $0x400] sm:$0xff]  ;;  %v3609_v3 = vld [vmem:[%s7139_s16 + $0x488] sm:$0xff]  ;;  %v5808_v61 = vpack.c.bf16 %v3590_v38, %v3572_v20 }
 0x58b   : > { %v3627_v2 = vld [vmem:[%s7139_s16 + $0x518] sm:$0xff]  ;;  %v3629_v8 = vld [vmem:[%s7139_s16 + $0x528] sm:$0xff]  ;;  %v5844_v27 = vpack.c.bf16 %v3592_v52, %v3574_v57  ;;  %v3608_v43 = vld [vmem:[%s7139_s16 + $0x480] sm:$0xff] }
 0x58c   : > { %v3611_v41 = vld [vmem:[%s7139_s16 + $0x498] sm:$0xff]  ;;  %5805 = vmatpush1.bf16.msra.mxu0 %v5804_v14  ;;  %v5810_v11 = vpack.c.bf16 %v3627_v2, %v3609_v3  ;;  %v3626_v33 = vld [vmem:[%s7139_s16 + $0x510] sm:$0xff]  ;;  %v3628_v49 = vld [vmem:[%s7139_s16 + $0x520] sm:$0xff] }
 0x58d   : > { %5841 = vmatpush1.bf16.msra.mxu1 %v5840_v15  ;;  %5807 = vmatprep.subr.bf16.mxu0 %v5806_v44  ;;  %v3610_v31 = vld [vmem:[%s7139_s16 + $0x490] sm:$0xff]  ;;  %v5846_v46 = vpack.c.bf16 %v3629_v8, %v3611_v41  ;;  %v3645_v0 = vld [vmem:[%s7139_s16 + $0x5a8] sm:$0xff]  ;;  %v3663_v30 = vld [vmem:[%s7139_s16 + $0x638] sm:$0xff]  ;;  %v5812_v63 = vpack.c.bf16 %v3626_v33, %v3608_v43 }
 0x58e   : > { %5843 = vmatprep.subr.bf16.mxu1 %v5842_v25  ;;  %v3647_v47 = vld [vmem:[%s7139_s16 + $0x5b8] sm:$0xff]  ;;  %v3665_v37 = vld [vmem:[%s7139_s16 + $0x648] sm:$0xff]  ;;  %v5848_v22 = vpack.c.bf16 %v3628_v49, %v3610_v31  ;;  %v5814_v62 = vpack.c.bf16 %v3663_v30, %v3645_v0  ;;  %v3644_v5 = vld [vmem:[%s7139_s16 + $0x5a0] sm:$0xff] }
 0x58f   : > { %v3662_v7 = vld [vmem:[%s7139_s16 + $0x630] sm:$0xff]  ;;  %v5850_v53 = vpack.c.bf16 %v3665_v37, %v3647_v47  ;;  %v3664_v39 = vld [vmem:[%s7139_s16 + $0x640] sm:$0xff]  ;;  %v3681_v45 = vld [vmem:[%s7139_s16 + $0x6c8] sm:$0xff] }
 0x590   : > { %5809 = vmatpush1.bf16.msra.mxu0 %v5808_v61  ;;  %v3646_v56 = vld [vmem:[%s7139_s16 + $0x5b0] sm:$0xff]  ;;  %v3699_v4 = vld [vmem:[%s7139_s16 + $0x758] sm:$0xff]  ;;  %v3701_v51 = vld [vmem:[%s7139_s16 + $0x768] sm:$0xff]  ;;  %v5816_v59 = vpack.c.bf16 %v3662_v7, %v3644_v5 }
 0x591   : > { %5845 = vmatpush1.bf16.msra.mxu1 %v5844_v27  ;;  %5811 = vmatprep.subr.bf16.mxu0 %v5810_v11  ;;  %v3683_v13 = vld [vmem:[%s7139_s16 + $0x6d8] sm:$0xff]  ;;  %v5852_v26 = vpack.c.bf16 %v3664_v39, %v3646_v56  ;;  %v5818_v58 = vpack.c.bf16 %v3699_v4, %v3681_v45  ;;  %v3680_v17 = vld [vmem:[%s7139_s16 + $0x6c0] sm:$0xff]  ;;  %v3698_v21 = vld [vmem:[%s7139_s16 + $0x750] sm:$0xff] }
 0x592   : > { %5847 = vmatprep.subr.bf16.mxu1 %v5846_v46  ;;  %v3682_v32 = vld [vmem:[%s7139_s16 + $0x6d0] sm:$0xff]  ;;  %v5854_v18 = vpack.c.bf16 %v3701_v51, %v3683_v13  ;;  %v3700_v10 = vld [vmem:[%s7139_s16 + $0x760] sm:$0xff]  ;;  %v3717_v42 = vld [vmem:[%s7139_s16 + $0x7e8] sm:$0xff]  ;;  %v5820_v12 = vpack.c.bf16 %v3698_v21, %v3680_v17 }
 0x593   : > { %v3735_v9 = vld [vmem:[%s7139_s16 + $0x878] sm:$0xff]  ;;  %v3737_v35 = vld [vmem:[%s7139_s16 + $0x888] sm:$0xff]  ;;  %v8981_v60 = vld [vmem:[#allocation2 + $0x8] sm:$0xff]  ;;  %v5856_v29 = vpack.c.bf16 %v3700_v10, %v3682_v32 }
 0x594   : > { %5813 = vmatpush1.bf16.msra.mxu0 %v5812_v63  ;;  %v3719_v50 = vld [vmem:[%s7139_s16 + $0x7f8] sm:$0xff]  ;;  %v5822_v34 = vpack.c.bf16 %v3735_v9, %v3717_v42  ;;  %v3716_v28 = vld [vmem:[%s7139_s16 + $0x7e0] sm:$0xff]  ;;  %v3734_v24 = vld [vmem:[%s7139_s16 + $0x870] sm:$0xff]  ;;  %5105 = vmatprep.mubr.msk.f32.mxu0 %vm3788_vm2, %v8981_v60 }
 0x595   : > { %5849 = vmatpush1.bf16.msra.mxu1 %v5848_v22  ;;  %5815 = vmatprep.subr.bf16.mxu0 %v5814_v62  ;;  %v3718_v6 = vld [vmem:[%s7139_s16 + $0x7f0] sm:$0xff]  ;;  %v5858_v23 = vpack.c.bf16 %v3737_v35, %v3719_v50  ;;  %v3736_v16 = vld [vmem:[%s7139_s16 + $0x880] sm:$0xff]  ;;  %v3753_v19 = vld [vmem:[%s7139_s16 + $0x908] sm:$0xff]  ;;  %v5824_v1 = vpack.c.bf16 %v3734_v24, %v3716_v28 }
 0x596   : > { %5851 = vmatprep.subr.bf16.mxu1 %v5850_v53  ;;  %v3771_v54 = vld [vmem:[%s7139_s16 + $0x998] sm:$0xff]  ;;  %v3773_v14 = vld [vmem:[%s7139_s16 + $0x9a8] sm:$0xff]  ;;  %5106 = vmatprep.mubr.msk.f32.mxu1 %vm3788_vm2, %v8981_v60  ;;  %v5860_v55 = vpack.c.bf16 %v3736_v16, %v3718_v6  ;;  %v3752_v15 = vld [vmem:[%s7139_s16 + $0x900] sm:$0xff] }
 0x597   : > { %v3755_v40 = vld [vmem:[%s7139_s16 + $0x918] sm:$0xff]  ;;  %v5826_v36 = vpack.c.bf16 %v3771_v54, %v3753_v19  ;;  %v3770_v44 = vld [vmem:[%s7139_s16 + $0x990] sm:$0xff]  ;;  %v3772_v38 = vld [vmem:[%s7139_s16 + $0x9a0] sm:$0xff] }
 0x598   : > { %5817 = vmatpush1.bf16.msra.mxu0 %v5816_v59  ;;  %v3754_v48 = vld [vmem:[%s7139_s16 + $0x910] sm:$0xff]  ;;  %v5862_v20 = vpack.c.bf16 %v3773_v14, %v3755_v40  ;;  %v3469_v25 = vld [vmem:[%s7139_s16 + $0x28] sm:$0xff]  ;;  %v3487_v57 = vld [vmem:[%s7139_s16 + $0xb8] sm:$0xff]  ;;  %v5828_v2 = vpack.c.bf16 %v3770_v44, %v3752_v15 }
 0x599   : > { %5853 = vmatpush1.bf16.msra.mxu1 %v5852_v26  ;;  %5819 = vmatprep.subr.bf16.mxu0 %v5818_v58  ;;  %v3471_v52 = vld [vmem:[%s7139_s16 + $0x38] sm:$0xff]  ;;  %v3489_v3 = vld [vmem:[%s7139_s16 + $0xc8] sm:$0xff]  ;;  %v5864_v41 = vpack.c.bf16 %v3772_v38, %v3754_v48  ;;  %v5866_v8 = vpack.c.bf16 %v3487_v57, %v3469_v25  ;;  %v3468_v61 = vld [vmem:[%s7139_s16 + $0x20] sm:$0xff] }
 0x59a   : > { %5855 = vmatprep.subr.bf16.mxu1 %v5854_v18  ;;  %v3486_v27 = vld [vmem:[%s7139_s16 + $0xb0] sm:$0xff]  ;;  %v5902_v43 = vpack.c.bf16 %v3489_v3, %v3471_v52  ;;  %v3488_v33 = vld [vmem:[%s7139_s16 + $0xc0] sm:$0xff]  ;;  %v3505_v31 = vld [vmem:[%s7139_s16 + $0x148] sm:$0xff] }
 0x59b   : > { %v3470_v11 = vld [vmem:[%s7139_s16 + $0x30] sm:$0xff]  ;;  %v3523_v46 = vld [vmem:[%s7139_s16 + $0x1d8] sm:$0xff]  ;;  %v3525_v0 = vld [vmem:[%s7139_s16 + $0x1e8] sm:$0xff]  ;;  %v5868_v47 = vpack.c.bf16 %v3486_v27, %v3468_v61 }
 0x59c   : > { %5821 = vmatpush1.bf16.msra.mxu0 %v5820_v12  ;;  %v3507_v49 = vld [vmem:[%s7139_s16 + $0x158] sm:$0xff]  ;;  %v5904_v37 = vpack.c.bf16 %v3488_v33, %v3470_v11  ;;  %v5870_v63 = vpack.c.bf16 %v3523_v46, %v3505_v31  ;;  %v3504_v22 = vld [vmem:[%s7139_s16 + $0x140] sm:$0xff]  ;;  %v3522_v62 = vld [vmem:[%s7139_s16 + $0x1d0] sm:$0xff] }
 0x59d   : > { %5857 = vmatpush1.bf16.msra.mxu1 %v5856_v29  ;;  %5823 = vmatprep.subr.bf16.mxu0 %v5822_v34  ;;  %v9011_v30 = vld [vmem:[#allocation2] sm:$0xff]  ;;  %v3506_v5 = vld [vmem:[%s7139_s16 + $0x150] sm:$0xff]  ;;  %v5906_v7 = vpack.c.bf16 %v3525_v0, %v3507_v49  ;;  %v3524_v56 = vld [vmem:[%s7139_s16 + $0x1e0] sm:$0xff]  ;;  %v5872_v13 = vpack.c.bf16 %v3522_v62, %v3504_v22 }
 0x59e   : > { %5859 = vmatprep.subr.bf16.mxu1 %v5858_v23  ;;  %v3541_v53 = vld [vmem:[%s7139_s16 + $0x268] sm:$0xff]  ;;  %v3559_v39 = vld [vmem:[%s7139_s16 + $0x2f8] sm:$0xff]  ;;  %v5908_v51 = vpack.c.bf16 %v3524_v56, %v3506_v5  ;;  %v3540_v26 = vld [vmem:[%s7139_s16 + $0x260] sm:$0xff] }
 0x59f   : > { %v3543_v45 = vld [vmem:[%s7139_s16 + $0x278] sm:$0xff]  ;;  %v3561_v4 = vld [vmem:[%s7139_s16 + $0x308] sm:$0xff]  ;;  %v5874_v59 = vpack.c.bf16 %v3559_v39, %v3541_v53  ;;  %v3558_v58 = vld [vmem:[%s7139_s16 + $0x2f0] sm:$0xff] }
 0x5a0   : > { %5825 = vmatpush1.bf16.msra.mxu0 %v5824_v1  ;;  %v3542_v17 = vld [vmem:[%s7139_s16 + $0x270] sm:$0xff]  ;;  %v5910_v21 = vpack.c.bf16 %v3561_v4, %v3543_v45  ;;  %v3560_v32 = vld [vmem:[%s7139_s16 + $0x300] sm:$0xff]  ;;  %v3577_v18 = vld [vmem:[%s7139_s16 + $0x388] sm:$0xff]  ;;  %v5876_v50 = vpack.c.bf16 %v3558_v58, %v3540_v26 }
 0x5a1   : > { %5861 = vmatpush1.bf16.msra.mxu1 %v5860_v55  ;;  %5827 = vmatprep.subr.bf16.mxu0 %v5826_v36  ;;  %v3595_v10 = vld [vmem:[%s7139_s16 + $0x418] sm:$0xff]  ;;  %v3597_v9 = vld [vmem:[%s7139_s16 + $0x428] sm:$0xff]  ;;  %v5912_v35 = vpack.c.bf16 %v3560_v32, %v3542_v17  ;;  %v3576_v29 = vld [vmem:[%s7139_s16 + $0x380] sm:$0xff] }
 0x5a2   : > { %5863 = vmatprep.subr.bf16.mxu1 %v5862_v20  ;;  %v3579_v42 = vld [vmem:[%s7139_s16 + $0x398] sm:$0xff]  ;;  %v5878_v12 = vpack.c.bf16 %v3595_v10, %v3577_v18  ;;  %v3594_v34 = vld [vmem:[%s7139_s16 + $0x410] sm:$0xff]  ;;  %v3596_v6 = vld [vmem:[%s7139_s16 + $0x420] sm:$0xff] }
 0x5a3   : > { %v3578_v28 = vld [vmem:[%s7139_s16 + $0x390] sm:$0xff]  ;;  %v5914_v24 = vpack.c.bf16 %v3597_v9, %v3579_v42  ;;  %v3613_v23 = vld [vmem:[%s7139_s16 + $0x4a8] sm:$0xff]  ;;  %v3631_v16 = vld [vmem:[%s7139_s16 + $0x538] sm:$0xff]  ;;  %v5880_v40 = vpack.c.bf16 %v3594_v34, %v3576_v29 }
 0x5a4   : > { %5829 = vmatpush1.bf16.msra.mxu0 %v5828_v2  ;;  %v3615_v19 = vld [vmem:[%s7139_s16 + $0x4b8] sm:$0xff]  ;;  %v3633_v54 = vld [vmem:[%s7139_s16 + $0x548] sm:$0xff]  ;;  %v5916_v14 = vpack.c.bf16 %v3596_v6, %v3578_v28  ;;  %v5882_v1 = vpack.c.bf16 %v3631_v16, %v3613_v23  ;;  %v3612_v55 = vld [vmem:[%s7139_s16 + $0x4a0] sm:$0xff] }
 0x5a5   : > { %5865 = vmatpush1.bf16.msra.mxu1 %v5864_v41  ;;  %5867 = vmatprep.subr.bf16.mxu0 %v5866_v8  ;;  %v3630_v36 = vld [vmem:[%s7139_s16 + $0x530] sm:$0xff]  ;;  %v5918_v44 = vpack.c.bf16 %v3633_v54, %v3615_v19  ;;  %v3632_v48 = vld [vmem:[%s7139_s16 + $0x540] sm:$0xff]  ;;  %v3649_v20 = vld [vmem:[%s7139_s16 + $0x5c8] sm:$0xff] }
 0x5a6   : > { %5903 = vmatprep.subr.bf16.mxu1 %v5902_v43  ;;  %v3614_v15 = vld [vmem:[%s7139_s16 + $0x4b0] sm:$0xff]  ;;  %v3667_v38 = vld [vmem:[%s7139_s16 + $0x658] sm:$0xff]  ;;  %v3669_v57 = vld [vmem:[%s7139_s16 + $0x668] sm:$0xff]  ;;  %v5884_v52 = vpack.c.bf16 %v3630_v36, %v3612_v55 }
 0x5a7   : > { %3857 = vmatmul.mubr.f32.vlgmr.msra.gmra.mrb[0].mxu0 %v9011_v30  ;;  %v3651_v25 = vld [vmem:[%s7139_s16 + $0x5d8] sm:$0xff]  ;;  %v5920_v3 = vpack.c.bf16 %v3632_v48, %v3614_v15  ;;  %v5886_v2 = vpack.c.bf16 %v3667_v38, %v3649_v20  ;;  %v3648_v41 = vld [vmem:[%s7139_s16 + $0x5c0] sm:$0xff]  ;;  %v3666_v8 = vld [vmem:[%s7139_s16 + $0x650] sm:$0xff] }
 0x5a8   : > { %3928 = vmatmul.mubr.f32.vlgmr.msra.gmra.mrb[0].mxu1 %v9011_v30  ;;  %5869 = vmatpush1.bf16.msra.mxu0 %v5868_v47  ;;  %v3650_v61 = vld [vmem:[%s7139_s16 + $0x5d0] sm:$0xff]  ;;  %v5922_v27 = vpack.c.bf16 %v3669_v57, %v3651_v25  ;;  %v3668_v11 = vld [vmem:[%s7139_s16 + $0x660] sm:$0xff]  ;;  %v3685_v43 = vld [vmem:[%s7139_s16 + $0x6e8] sm:$0xff]  ;;  %v5888_v49 = vpack.c.bf16 %v3666_v8, %v3648_v41 }
 0x5a9   : > { %5905 = vmatpush1.bf16.msra.mxu1 %v5904_v37  ;;  %5871 = vmatprep.subr.bf16.mxu0 %v5870_v63  ;;  %v3703_v33 = vld [vmem:[%s7139_s16 + $0x778] sm:$0xff]  ;;  %v3705_v46 = vld [vmem:[%s7139_s16 + $0x788] sm:$0xff]  ;;  %v5924_v0 = vpack.c.bf16 %v3668_v11, %v3650_v61  ;;  %v3684_v37 = vld [vmem:[%s7139_s16 + $0x6e0] sm:$0xff] }
 0x5aa   : > { %5907 = vmatprep.subr.bf16.mxu1 %v5906_v7  ;;  %5107 = vmatprep.mubr.msk.f32.mxu0 %vm3788_vm2, %v8981_v60  ;;  %v3687_v31 = vld [vmem:[%s7139_s16 + $0x6f8] sm:$0xff]  ;;  %v5890_v47 = vpack.c.bf16 %v3703_v33, %v3685_v43  ;;  %v3702_v63 = vld [vmem:[%s7139_s16 + $0x770] sm:$0xff]  ;;  %v3704_v5 = vld [vmem:[%s7139_s16 + $0x780] sm:$0xff] }
 0x5ab   : > { %5108 = vmatprep.mubr.msk.f32.mxu1 %vm3788_vm2, %v8981_v60  ;;  %v3686_v22 = vld [vmem:[%s7139_s16 + $0x6f0] sm:$0xff]  ;;  %v5926_v62 = vpack.c.bf16 %v3705_v46, %v3687_v31  ;;  %v3721_v7 = vld [vmem:[%s7139_s16 + $0x808] sm:$0xff]  ;;  %v3739_v56 = vld [vmem:[%s7139_s16 + $0x898] sm:$0xff]  ;;  %v5892_v45 = vpack.c.bf16 %v3702_v63, %v3684_v37 }
 0x5ac   : > { %5873 = vmatpush1.bf16.msra.mxu0 %v5872_v13  ;;  %v3723_v53 = vld [vmem:[%s7139_s16 + $0x818] sm:$0xff]  ;;  %v3741_v39 = vld [vmem:[%s7139_s16 + $0x8a8] sm:$0xff]  ;;  %v5928_v4 = vpack.c.bf16 %v3704_v5, %v3686_v22  ;;  %v5894_v13 = vpack.c.bf16 %v3739_v56, %v3721_v7  ;;  %v3722_v26 = vld [vmem:[%s7139_s16 + $0x810] sm:$0xff] }
 0x5ad   : > { %5909 = vmatpush1.bf16.msra.mxu1 %v5908_v51  ;;  %5875 = vmatprep.subr.bf16.mxu0 %v5874_v59  ;;  %v3720_v51 = vld [vmem:[%s7139_s16 + $0x800] sm:$0xff]  ;;  %v3738_v59 = vld [vmem:[%s7139_s16 + $0x890] sm:$0xff]  ;;  %v5930_v58 = vpack.c.bf16 %v3741_v39, %v3723_v53  ;;  %v3775_v32 = vld [vmem:[%s7139_s16 + $0x9b8] sm:$0xff] }
 0x5ae   : > { %5911 = vmatprep.subr.bf16.mxu1 %v5910_v21  ;;  %v3740_v17 = vld [vmem:[%s7139_s16 + $0x8a0] sm:$0xff]  ;;  %v3757_v21 = vld [vmem:[%s7139_s16 + $0x928] sm:$0xff]  ;;  %v3759_v18 = vld [vmem:[%s7139_s16 + $0x938] sm:$0xff]  ;;  %v5896_v42 = vpack.c.bf16 %v3738_v59, %v3720_v51 }
 0x5af   : > { %v3777_v10 = vld [vmem:[%s7139_s16 + $0x9c8] sm:$0xff]  ;;  %v5932_v9 = vpack.c.bf16 %v3740_v17, %v3722_v26  ;;  %v3758_v29 = vld [vmem:[%s7139_s16 + $0x930] sm:$0xff]  ;;  %v3776_v28 = vld [vmem:[%s7139_s16 + $0x9c0] sm:$0xff] }
 0x5b0   : > { %5877 = vmatpush1.bf16.msra.mxu0 %v5876_v50  ;;  %v5898_v50 = vpack.c.bf16 %v3775_v32, %v3757_v21  ;;  %v5934_v34 = vpack.c.bf16 %v3777_v10, %v3759_v18  ;;  %v3491_v6 = vld [vmem:[%s7139_s16 + $0xd8] sm:$0xff]  ;;  %v3493_v16 = vld [vmem:[%s7139_s16 + $0xe8] sm:$0xff]  ;;  %v5936_v54 = vpack.c.bf16 %v3776_v28, %v3758_v29  ;;  %v3474_v55 = vld [vmem:[%s7139_s16 + $0x50] sm:$0xff] }
 0x5b1   : > { %5913 = vmatpush1.bf16.msra.mxu1 %v5912_v35  ;;  %5879 = vmatprep.subr.bf16.mxu0 %v5878_v12  ;;  %v3756_v35 = vld [vmem:[%s7139_s16 + $0x920] sm:$0xff]  ;;  %v3774_v12 = vld [vmem:[%s7139_s16 + $0x9b0] sm:$0xff]  ;;  %v3475_v23 = vld [vmem:[%s7139_s16 + $0x58] sm:$0xff] }
 0x5b2   : > { %5915 = vmatprep.subr.bf16.mxu1 %v5914_v24  ;;  %v3473_v24 = vld [vmem:[%s7139_s16 + $0x48] sm:$0xff]  ;;  %v5900_v19 = vpack.c.bf16 %v3774_v12, %v3756_v35  ;;  %v5974_v36 = vpack.c.bf16 %v3493_v16, %v3475_v23  ;;  %v3492_v15 = vld [vmem:[%s7139_s16 + $0xe0] sm:$0xff]  ;;  %v3527_v48 = vld [vmem:[%s7139_s16 + $0x1f8] sm:$0xff] }
 0x5b3   : > { %v3511_v20 = vld [vmem:[%s7139_s16 + $0x178] sm:$0xff]  ;;  %v3529_v38 = vld [vmem:[%s7139_s16 + $0x208] sm:$0xff]  ;;  %v5976_v57 = vpack.c.bf16 %v3492_v15, %v3474_v55  ;;  %v3510_v41 = vld [vmem:[%s7139_s16 + $0x170] sm:$0xff] }
 0x5b4   : > { %5881 = vmatpush1.bf16.msra.mxu0 %v5880_v40  ;;  %v5938_v40 = vpack.c.bf16 %v3491_v6, %v3473_v24  ;;  %v5978_v8 = vpack.c.bf16 %v3529_v38, %v3511_v20  ;;  %v3528_v61 = vld [vmem:[%s7139_s16 + $0x200] sm:$0xff]  ;;  %v3563_v11 = vld [vmem:[%s7139_s16 + $0x318] sm:$0xff]  ;;  %v3565_v33 = vld [vmem:[%s7139_s16 + $0x328] sm:$0xff] }
 0x5b5   : > { %5917 = vmatpush1.bf16.msra.mxu1 %v5916_v14  ;;  %5883 = vmatprep.subr.bf16.mxu0 %v5882_v1  ;;  %v3472_v14 = vld [vmem:[%s7139_s16 + $0x40] sm:$0xff]  ;;  %v3490_v1 = vld [vmem:[%s7139_s16 + $0xd0] sm:$0xff]  ;;  %v3547_v43 = vld [vmem:[%s7139_s16 + $0x298] sm:$0xff]  ;;  %v5980_v46 = vpack.c.bf16 %v3528_v61, %v3510_v41 }
 0x5b6   : > { %5919 = vmatprep.subr.bf16.mxu1 %v5918_v44  ;;  %v3509_v44 = vld [vmem:[%s7139_s16 + $0x168] sm:$0xff]  ;;  %v5940_v25 = vpack.c.bf16 %v3490_v1, %v3472_v14  ;;  %v3546_v37 = vld [vmem:[%s7139_s16 + $0x290] sm:$0xff]  ;;  %v5982_v63 = vpack.c.bf16 %v3565_v33, %v3547_v43  ;;  %v3564_v22 = vld [vmem:[%s7139_s16 + $0x320] sm:$0xff] }
 0x5b7   : > { %v3599_v5 = vld [vmem:[%s7139_s16 + $0x438] sm:$0xff]  ;;  %v3601_v56 = vld [vmem:[%s7139_s16 + $0x448] sm:$0xff]  ;;  %v5984_v39 = vpack.c.bf16 %v3564_v22, %v3546_v37  ;;  %v3582_v51 = vld [vmem:[%s7139_s16 + $0x3b0] sm:$0xff] }
 0x5b8   : > { %5885 = vmatpush1.bf16.msra.mxu0 %v5884_v52  ;;  %v5942_v52 = vpack.c.bf16 %v3527_v48, %v3509_v44  ;;  %v3583_v7 = vld [vmem:[%s7139_s16 + $0x3b8] sm:$0xff]  ;;  %v3600_v26 = vld [vmem:[%s7139_s16 + $0x440] sm:$0xff]  ;;  %v3637_v32 = vld [vmem:[%s7139_s16 + $0x568] sm:$0xff] }
 0x5b9   : > { %5921 = vmatpush1.bf16.msra.mxu1 %v5920_v3  ;;  %5887 = vmatprep.subr.bf16.mxu0 %v5886_v2  ;;  %v3508_v3 = vld [vmem:[%s7139_s16 + $0x160] sm:$0xff]  ;;  %v3526_v2 = vld [vmem:[%s7139_s16 + $0x1f0] sm:$0xff]  ;;  %v5986_v59 = vpack.c.bf16 %v3601_v56, %v3583_v7  ;;  %v3635_v17 = vld [vmem:[%s7139_s16 + $0x558] sm:$0xff]  ;;  %v5988_v10 = vpack.c.bf16 %v3600_v26, %v3582_v51 }
 0x5ba   : > { %5923 = vmatprep.subr.bf16.mxu1 %v5922_v27  ;;  %v3545_v27 = vld [vmem:[%s7139_s16 + $0x288] sm:$0xff]  ;;  %v5944_v31 = vpack.c.bf16 %v3526_v2, %v3508_v3  ;;  %v3619_v21 = vld [vmem:[%s7139_s16 + $0x4d8] sm:$0xff]  ;;  %v3618_v35 = vld [vmem:[%s7139_s16 + $0x4d0] sm:$0xff] }
 0x5bb   : > { %v5990_v12 = vpack.c.bf16 %v3637_v32, %v3619_v21  ;;  %v3636_v29 = vld [vmem:[%s7139_s16 + $0x560] sm:$0xff]  ;;  %v3671_v28 = vld [vmem:[%s7139_s16 + $0x678] sm:$0xff]  ;;  %v3673_v6 = vld [vmem:[%s7139_s16 + $0x688] sm:$0xff] }
 0x5bc   : > { %5889 = vmatpush1.bf16.msra.mxu0 %v5888_v49  ;;  %v5946_v49 = vpack.c.bf16 %v3563_v11, %v3545_v27  ;;  %v3655_v24 = vld [vmem:[%s7139_s16 + $0x5f8] sm:$0xff]  ;;  %v5992_v16 = vpack.c.bf16 %v3636_v29, %v3618_v35  ;;  %v3654_v14 = vld [vmem:[%s7139_s16 + $0x5f0] sm:$0xff]  ;;  %v3672_v55 = vld [vmem:[%s7139_s16 + $0x680] sm:$0xff] }
 0x5bd   : > { %5925 = vmatpush1.bf16.msra.mxu1 %v5924_v0  ;;  %5891 = vmatprep.subr.bf16.mxu0 %v5890_v47  ;;  %v3544_v0 = vld [vmem:[%s7139_s16 + $0x280] sm:$0xff]  ;;  %v3562_v47 = vld [vmem:[%s7139_s16 + $0x310] sm:$0xff]  ;;  %v5994_v1 = vpack.c.bf16 %v3673_v6, %v3655_v24  ;;  %v3707_v15 = vld [vmem:[%s7139_s16 + $0x798] sm:$0xff]  ;;  %v5996_v38 = vpack.c.bf16 %v3672_v55, %v3654_v14 }
 0x5be   : > { %5927 = vmatprep.subr.bf16.mxu1 %v5926_v62  ;;  %v3581_v62 = vld [vmem:[%s7139_s16 + $0x3a8] sm:$0xff]  ;;  %v5948_v53 = vpack.c.bf16 %v3562_v47, %v3544_v0  ;;  %v3691_v44 = vld [vmem:[%s7139_s16 + $0x718] sm:$0xff]  ;;  %v3690_v3 = vld [vmem:[%s7139_s16 + $0x710] sm:$0xff] }
 0x5bf   : > { %v3709_v48 = vld [vmem:[%s7139_s16 + $0x7a8] sm:$0xff]  ;;  %v3708_v41 = vld [vmem:[%s7139_s16 + $0x7a0] sm:$0xff]  ;;  %v3743_v61 = vld [vmem:[%s7139_s16 + $0x8b8] sm:$0xff] }
 0x5c0   : > { %5893 = vmatpush1.bf16.msra.mxu0 %v5892_v45  ;;  %v5950_v45 = vpack.c.bf16 %v3599_v5, %v3581_v62  ;;  %v5998_v2 = vpack.c.bf16 %v3709_v48, %v3691_v44  ;;  %v3727_v27 = vld [vmem:[%s7139_s16 + $0x838] sm:$0xff]  ;;  %v3745_v11 = vld [vmem:[%s7139_s16 + $0x8c8] sm:$0xff]  ;;  %v6000_v33 = vpack.c.bf16 %v3708_v41, %v3690_v3  ;;  %v3726_v0 = vld [vmem:[%s7139_s16 + $0x830] sm:$0xff] }
 0x5c1   : > { %5929 = vmatpush1.bf16.msra.mxu1 %v5928_v4  ;;  %5895 = vmatprep.subr.bf16.mxu0 %v5894_v13  ;;  %v3580_v4 = vld [vmem:[%s7139_s16 + $0x3a0] sm:$0xff]  ;;  %v3598_v13 = vld [vmem:[%s7139_s16 + $0x430] sm:$0xff]  ;;  %v6002_v47 = vpack.c.bf16 %v3745_v11, %v3727_v27  ;;  %v3779_v22 = vld [vmem:[%s7139_s16 + $0x9d8] sm:$0xff] }
 0x5c2   : > { %5931 = vmatprep.subr.bf16.mxu1 %v5930_v58  ;;  %v3617_v58 = vld [vmem:[%s7139_s16 + $0x4c8] sm:$0xff]  ;;  %v5952_v18 = vpack.c.bf16 %v3598_v13, %v3580_v4  ;;  %v3744_v37 = vld [vmem:[%s7139_s16 + $0x8c0] sm:$0xff]  ;;  %v3763_v62 = vld [vmem:[%s7139_s16 + $0x958] sm:$0xff] }
 0x5c3   : > { %v3781_v5 = vld [vmem:[%s7139_s16 + $0x9e8] sm:$0xff]  ;;  %v6004_v56 = vpack.c.bf16 %v3744_v37, %v3726_v0  ;;  %v3762_v4 = vld [vmem:[%s7139_s16 + $0x950] sm:$0xff]  ;;  %v3780_v51 = vld [vmem:[%s7139_s16 + $0x9e0] sm:$0xff] }
 0x5c4   : > { %5897 = vmatpush1.bf16.msra.mxu0 %v5896_v42  ;;  %v5954_v42 = vpack.c.bf16 %v3635_v17, %v3617_v58  ;;  %v6006_v13 = vpack.c.bf16 %v3781_v5, %v3763_v62  ;;  %v3495_v26 = vld [vmem:[%s7139_s16 + $0xf8] sm:$0xff]  ;;  %v3497_v17 = vld [vmem:[%s7139_s16 + $0x108] sm:$0xff]  ;;  %v6008_v32 = vpack.c.bf16 %v3780_v51, %v3762_v4  ;;  %v3496_v35 = vld [vmem:[%s7139_s16 + $0x100] sm:$0xff] }
 0x5c5   : > { %5933 = vmatpush1.bf16.msra.mxu1 %v5932_v9  ;;  %5899 = vmatprep.subr.bf16.mxu0 %v5898_v50  ;;  %v3616_v9 = vld [vmem:[%s7139_s16 + $0x4c0] sm:$0xff]  ;;  %v3634_v50 = vld [vmem:[%s7139_s16 + $0x550] sm:$0xff]  ;;  %v3479_v58 = vld [vmem:[%s7139_s16 + $0x78] sm:$0xff] }
 0x5c6   : > { %5935 = vmatprep.subr.bf16.mxu1 %v5934_v34  ;;  %v3653_v34 = vld [vmem:[%s7139_s16 + $0x5e8] sm:$0xff]  ;;  %v5956_v23 = vpack.c.bf16 %v3634_v50, %v3616_v9  ;;  %v3478_v9 = vld [vmem:[%s7139_s16 + $0x70] sm:$0xff]  ;;  %v6046_v50 = vpack.c.bf16 %v3497_v17, %v3479_v58  ;;  %v3531_v29 = vld [vmem:[%s7139_s16 + $0x218] sm:$0xff] }
 0x5c7   : > { %v6048_v6 = vpack.c.bf16 %v3496_v35, %v3478_v9  ;;  %v3532_v14 = vld [vmem:[%s7139_s16 + $0x220] sm:$0xff]  ;;  %v3567_v55 = vld [vmem:[%s7139_s16 + $0x338] sm:$0xff] }
 0x5c8   : > { %5901 = vmatpush1.bf16.msra.mxu0 %v5900_v19  ;;  %v5958_v19 = vpack.c.bf16 %v3671_v28, %v3653_v34  ;;  %v3515_v34 = vld [vmem:[%s7139_s16 + $0x198] sm:$0xff]  ;;  %v3533_v28 = vld [vmem:[%s7139_s16 + $0x228] sm:$0xff]  ;;  %v3568_v3 = vld [vmem:[%s7139_s16 + $0x340] sm:$0xff] }
 0x5c9   : > { %5937 = vmatpush1.bf16.msra.mxu1 %v5936_v54  ;;  %5939 = vmatprep.subr.bf16.mxu0 %v5938_v40  ;;  %v3652_v54 = vld [vmem:[%s7139_s16 + $0x5e0] sm:$0xff]  ;;  %v3670_v40 = vld [vmem:[%s7139_s16 + $0x670] sm:$0xff]  ;;  %v3603_v41 = vld [vmem:[%s7139_s16 + $0x458] sm:$0xff] }
 0x5ca   : > { %5975 = vmatprep.subr.bf16.mxu1 %v5974_v36  ;;  %v3689_v36 = vld [vmem:[%s7139_s16 + $0x708] sm:$0xff]  ;;  %v5960_v20 = vpack.c.bf16 %v3670_v40, %v3652_v54  ;;  %v3514_v54 = vld [vmem:[%s7139_s16 + $0x190] sm:$0xff]  ;;  %v6050_v40 = vpack.c.bf16 %v3533_v28, %v3515_v34  ;;  %v3604_v0 = vld [vmem:[%s7139_s16 + $0x460] sm:$0xff] }
 0x5cb   : > { %3999 = vmatmul.mubr.f32.vlgmr.msra.gmra.mrb[2].mxu0 %v9011_v30  ;;  %v6052_v48 = vpack.c.bf16 %v3532_v14, %v3514_v54  ;;  %v3639_v37 = vld [vmem:[%s7139_s16 + $0x578] sm:$0xff]  ;;  %v3640_v4 = vld [vmem:[%s7139_s16 + $0x580] sm:$0xff] }
 0x5cc   : > { %4070 = vmatmul.mubr.f32.vlgmr.msra.gmra.mrb[2].mxu1 %v9011_v30  ;;  %5941 = vmatpush1.bf16.msra.mxu0 %v5940_v25  ;;  %v5962_v25 = vpack.c.bf16 %v3707_v15, %v3689_v36  ;;  %v3551_v36 = vld [vmem:[%s7139_s16 + $0x2b8] sm:$0xff]  ;;  %v3569_v15 = vld [vmem:[%s7139_s16 + $0x348] sm:$0xff]  ;;  %v3676_v9 = vld [vmem:[%s7139_s16 + $0x6a0] sm:$0xff] }
 0x5cd   : > { %5977 = vmatpush1.bf16.msra.mxu1 %v5976_v57  ;;  %5943 = vmatprep.subr.bf16.mxu0 %v5942_v52  ;;  %v3688_v57 = vld [vmem:[%s7139_s16 + $0x700] sm:$0xff]  ;;  %v3706_v52 = vld [vmem:[%s7139_s16 + $0x790] sm:$0xff]  ;;  %v3675_v51 = vld [vmem:[%s7139_s16 + $0x698] sm:$0xff] }
 0x5ce   : > { %5979 = vmatprep.subr.bf16.mxu1 %v5978_v8  ;;  %5109 = vmatprep.mubr.msk.f32.mxu0 %vm3788_vm2, %v8981_v60  ;;  %v3725_v8 = vld [vmem:[%s7139_s16 + $0x828] sm:$0xff]  ;;  %v5964_v43 = vpack.c.bf16 %v3706_v52, %v3688_v57  ;;  %v3550_v57 = vld [vmem:[%s7139_s16 + $0x2b0] sm:$0xff]  ;;  %v6054_v52 = vpack.c.bf16 %v3569_v15, %v3551_v36  ;;  %v3711_v35 = vld [vmem:[%s7139_s16 + $0x7b8] sm:$0xff] }
 0x5cf   : > { %5110 = vmatprep.mubr.msk.f32.mxu1 %vm3788_vm2, %v8981_v60  ;;  %v6056_v11 = vpack.c.bf16 %v3568_v3, %v3550_v57  ;;  %v3712_v54 = vld [vmem:[%s7139_s16 + $0x7c0] sm:$0xff]  ;;  %v3747_v14 = vld [vmem:[%s7139_s16 + $0x8d8] sm:$0xff] }
 0x5d0   : > { %5945 = vmatpush1.bf16.msra.mxu0 %v5944_v31  ;;  %v5966_v31 = vpack.c.bf16 %v3743_v61, %v3725_v8  ;;  %v3587_v8 = vld [vmem:[%s7139_s16 + $0x3d8] sm:$0xff]  ;;  %v3605_v61 = vld [vmem:[%s7139_s16 + $0x468] sm:$0xff]  ;;  %v3748_v57 = vld [vmem:[%s7139_s16 + $0x8e0] sm:$0xff] }
 0x5d1   : > { %5981 = vmatpush1.bf16.msra.mxu1 %v5980_v46  ;;  %5947 = vmatprep.subr.bf16.mxu0 %v5946_v49  ;;  %v3724_v46 = vld [vmem:[%s7139_s16 + $0x820] sm:$0xff]  ;;  %v3742_v49 = vld [vmem:[%s7139_s16 + $0x8b0] sm:$0xff]  ;;  %v3783_v3 = vld [vmem:[%s7139_s16 + $0x9f8] sm:$0xff] }
 0x5d2   : > { %5983 = vmatprep.subr.bf16.mxu1 %v5982_v63  ;;  %v3761_v63 = vld [vmem:[%s7139_s16 + $0x948] sm:$0xff]  ;;  %v5968_v7 = vpack.c.bf16 %v3742_v49, %v3724_v46  ;;  %v3586_v46 = vld [vmem:[%s7139_s16 + $0x3d0] sm:$0xff]  ;;  %v6058_v49 = vpack.c.bf16 %v3605_v61, %v3587_v8 }
 0x5d3   : > { %v6060_v5 = vpack.c.bf16 %v3604_v0, %v3586_v46  ;;  %v3784_v46 = vld [vmem:[%s7139_s16 + $0xa00] sm:$0xff]  ;;  %v3499_v0 = vld [vmem:[%s7139_s16 + $0x118] sm:$0xff] }
 0x5d4   : > { %5949 = vmatpush1.bf16.msra.mxu0 %v5948_v53  ;;  %v5970_v53 = vpack.c.bf16 %v3779_v22, %v3761_v63  ;;  %v3623_v63 = vld [vmem:[%s7139_s16 + $0x4f8] sm:$0xff]  ;;  %v3641_v22 = vld [vmem:[%s7139_s16 + $0x588] sm:$0xff] }
 0x5d5   : > { %5985 = vmatpush1.bf16.msra.mxu1 %v5984_v39  ;;  %5951 = vmatprep.subr.bf16.mxu0 %v5950_v45  ;;  %v3760_v39 = vld [vmem:[%s7139_s16 + $0x940] sm:$0xff]  ;;  %v3778_v45 = vld [vmem:[%s7139_s16 + $0x9d0] sm:$0xff] }
 0x5d6   : > { %5987 = vmatprep.subr.bf16.mxu1 %v5986_v59  ;;  %v3477_v59 = vld [vmem:[%s7139_s16 + $0x68] sm:$0xff]  ;;  %v5972_v21 = vpack.c.bf16 %v3778_v45, %v3760_v39  ;;  %v3622_v39 = vld [vmem:[%s7139_s16 + $0x4f0] sm:$0xff]  ;;  %v6062_v45 = vpack.c.bf16 %v3641_v22, %v3623_v63  ;;  %v3480_v22 = vld [vmem:[%s7139_s16 + $0x80] sm:$0xff] }
 0x5d7   : > { %v6064_v17 = vpack.c.bf16 %v3640_v4, %v3622_v39  ;;  %v3516_v39 = vld [vmem:[%s7139_s16 + $0x1a0] sm:$0xff]  ;;  %v3553_v4 = vld [vmem:[%s7139_s16 + $0x2c8] sm:$0xff] }
 0x5d8   : > { %5953 = vmatpush1.bf16.msra.mxu0 %v5952_v18  ;;  %v6010_v18 = vpack.c.bf16 %v3495_v26, %v3477_v59  ;;  %v3659_v59 = vld [vmem:[%s7139_s16 + $0x618] sm:$0xff]  ;;  %v3677_v26 = vld [vmem:[%s7139_s16 + $0x6a8] sm:$0xff] }
 0x5d9   : > { %5989 = vmatpush1.bf16.msra.mxu1 %v5988_v10  ;;  %5955 = vmatprep.subr.bf16.mxu0 %v5954_v42  ;;  %v3476_v10 = vld [vmem:[%s7139_s16 + $0x60] sm:$0xff]  ;;  %v3494_v42 = vld [vmem:[%s7139_s16 + $0xf0] sm:$0xff] }
 0x5da   : > { %5991 = vmatprep.subr.bf16.mxu1 %v5990_v12  ;;  %v3513_v12 = vld [vmem:[%s7139_s16 + $0x188] sm:$0xff]  ;;  %v6012_v24 = vpack.c.bf16 %v3494_v42, %v3476_v10  ;;  %v3658_v10 = vld [vmem:[%s7139_s16 + $0x610] sm:$0xff]  ;;  %v6066_v42 = vpack.c.bf16 %v3677_v26, %v3659_v59  ;;  %v3552_v26 = vld [vmem:[%s7139_s16 + $0x2c0] sm:$0xff] }
 0x5db   : > { %v6068_v28 = vpack.c.bf16 %v3676_v9, %v3658_v10  ;;  %v3588_v10 = vld [vmem:[%s7139_s16 + $0x3e0] sm:$0xff]  ;;  %v3625_v9 = vld [vmem:[%s7139_s16 + $0x508] sm:$0xff] }
 0x5dc   : > { %5957 = vmatpush1.bf16.msra.mxu0 %v5956_v23  ;;  %v6014_v23 = vpack.c.bf16 %v3531_v29, %v3513_v12  ;;  %v3695_v12 = vld [vmem:[%s7139_s16 + $0x738] sm:$0xff]  ;;  %v3713_v29 = vld [vmem:[%s7139_s16 + $0x7c8] sm:$0xff] }
 0x5dd   : > { %5993 = vmatpush1.bf16.msra.mxu1 %v5992_v16  ;;  %5959 = vmatprep.subr.bf16.mxu0 %v5958_v19  ;;  %v3512_v16 = vld [vmem:[%s7139_s16 + $0x180] sm:$0xff]  ;;  %v3530_v19 = vld [vmem:[%s7139_s16 + $0x210] sm:$0xff] }
 0x5de   : > { %5995 = vmatprep.subr.bf16.mxu1 %v5994_v1  ;;  %v3549_v1 = vld [vmem:[%s7139_s16 + $0x2a8] sm:$0xff]  ;;  %v6016_v44 = vpack.c.bf16 %v3530_v19, %v3512_v16  ;;  %v3694_v16 = vld [vmem:[%s7139_s16 + $0x730] sm:$0xff]  ;;  %v6070_v19 = vpack.c.bf16 %v3713_v29, %v3695_v12  ;;  %v3624_v12 = vld [vmem:[%s7139_s16 + $0x500] sm:$0xff] }
 0x5df   : > { %v6072_v15 = vpack.c.bf16 %v3712_v54, %v3694_v16  ;;  %v3642_v29 = vld [vmem:[%s7139_s16 + $0x590] sm:$0xff]  ;;  %v3715_v54 = vld [vmem:[%s7139_s16 + $0x7d8] sm:$0xff] }
 0x5e0   : > { %5961 = vmatpush1.bf16.msra.mxu0 %v5960_v20  ;;  %v6018_v20 = vpack.c.bf16 %v3567_v55, %v3549_v1  ;;  %v3731_v1 = vld [vmem:[%s7139_s16 + $0x858] sm:$0xff]  ;;  %v3749_v55 = vld [vmem:[%s7139_s16 + $0x8e8] sm:$0xff]  ;;  %v3678_v16 = vld [vmem:[%s7139_s16 + $0x6b0] sm:$0xff] }
 0x5e1   : > { %5997 = vmatpush1.bf16.msra.mxu1 %v5996_v38  ;;  %5963 = vmatprep.subr.bf16.mxu0 %v5962_v25  ;;  %v3548_v38 = vld [vmem:[%s7139_s16 + $0x2a0] sm:$0xff]  ;;  %v3566_v25 = vld [vmem:[%s7139_s16 + $0x330] sm:$0xff] }
 0x5e2   : > { %5999 = vmatprep.subr.bf16.mxu1 %v5998_v2  ;;  %v3585_v2 = vld [vmem:[%s7139_s16 + $0x3c8] sm:$0xff]  ;;  %v6020_v27 = vpack.c.bf16 %v3566_v25, %v3548_v38  ;;  %v3730_v38 = vld [vmem:[%s7139_s16 + $0x850] sm:$0xff]  ;;  %v6074_v25 = vpack.c.bf16 %v3749_v55, %v3731_v1  ;;  %v3696_v1 = vld [vmem:[%s7139_s16 + $0x740] sm:$0xff] }
 0x5e3   : > { %v6076_v61 = vpack.c.bf16 %v3748_v57, %v3730_v38  ;;  %v3714_v55 = vld [vmem:[%s7139_s16 + $0x7d0] sm:$0xff]  ;;  %v3787_v57 = vld [vmem:[%s7139_s16 + $0xa18] sm:$0xff] }
 0x5e4   : > { %5965 = vmatpush1.bf16.msra.mxu0 %v5964_v43  ;;  %v6022_v43 = vpack.c.bf16 %v3603_v41, %v3585_v2  ;;  %v3767_v2 = vld [vmem:[%s7139_s16 + $0x978] sm:$0xff]  ;;  %v3785_v41 = vld [vmem:[%s7139_s16 + $0xa08] sm:$0xff]  ;;  %v3750_v38 = vld [vmem:[%s7139_s16 + $0x8f0] sm:$0xff] }
 0x5e5   : > { %6001 = vmatpush1.bf16.msra.mxu1 %v6000_v33  ;;  %5967 = vmatprep.subr.bf16.mxu0 %v5966_v31  ;;  %v3584_v33 = vld [vmem:[%s7139_s16 + $0x3c0] sm:$0xff]  ;;  %v3602_v31 = vld [vmem:[%s7139_s16 + $0x450] sm:$0xff] }
 0x5e6   : > { %6003 = vmatprep.subr.bf16.mxu1 %v6002_v47  ;;  %v3621_v47 = vld [vmem:[%s7139_s16 + $0x4e8] sm:$0xff]  ;;  %v6024_v62 = vpack.c.bf16 %v3602_v31, %v3584_v33  ;;  %v3766_v33 = vld [vmem:[%s7139_s16 + $0x970] sm:$0xff]  ;;  %v6078_v31 = vpack.c.bf16 %v3785_v41, %v3767_v2  ;;  %v3768_v2 = vld [vmem:[%s7139_s16 + $0x980] sm:$0xff] }
 0x5e7   : > { %v3786_v41 = vld [vmem:[%s7139_s16 + $0xa10] sm:$0xff] }
 0x5e8   : > { %5969 = vmatpush1.bf16.msra.mxu0 %v5968_v7  ;;  %v6026_v7 = vpack.c.bf16 %v3639_v37, %v3621_v47  ;;  %v6080_v37 = vpack.c.bf16 %v3784_v46, %v3766_v33 }
 0x5e9   : > { %6005 = vmatpush1.bf16.msra.mxu1 %v6004_v56  ;;  %5971 = vmatprep.subr.bf16.mxu0 %v5970_v53  ;;  %v3620_v56 = vld [vmem:[%s7139_s16 + $0x4e0] sm:$0xff]  ;;  %v3638_v53 = vld [vmem:[%s7139_s16 + $0x570] sm:$0xff] }
 0x5ea   : > { %6007 = vmatprep.subr.bf16.mxu1 %v6006_v13  ;;  %v3657_v13 = vld [vmem:[%s7139_s16 + $0x608] sm:$0xff]  ;;  %v6028_v58 = vpack.c.bf16 %v3638_v53, %v3620_v56 }
 0x5ec   : > { %5973 = vmatpush1.bf16.msra.mxu0 %v5972_v21  ;;  %v6030_v21 = vpack.c.bf16 %v3675_v51, %v3657_v13  ;;  %v3571_v13 = vld [vmem:[%s7139_s16 + $0x358] sm:$0xff] }
 0x5ed   : > { %6009 = vmatpush1.bf16.msra.mxu1 %v6008_v32  ;;  %6011 = vmatprep.subr.bf16.mxu0 %v6010_v18  ;;  %v3656_v32 = vld [vmem:[%s7139_s16 + $0x600] sm:$0xff]  ;;  %v3674_v18 = vld [vmem:[%s7139_s16 + $0x690] sm:$0xff]  ;;  %v6090_v59 = vpack.c.bf16 %v3571_v13, %v3553_v4 }
 0x5ee   : > { %6047 = vmatprep.subr.bf16.mxu1 %v6046_v50  ;;  %v3693_v50 = vld [vmem:[%s7139_s16 + $0x728] sm:$0xff]  ;;  %v6032_v34 = vpack.c.bf16 %v3674_v18, %v3656_v32 }
 0x5ef   : > { %4141 = vmatmul.mubr.f32.vlgmr.msra.gmra.mrb[4].mxu0 %v9011_v30 }
 0x5f0   : > { %4212 = vmatmul.mubr.f32.vlgmr.msra.gmra.mrb[4].mxu1 %v9011_v30  ;;  %6013 = vmatpush1.bf16.msra.mxu0 %v6012_v24  ;;  %v6034_v24 = vpack.c.bf16 %v3711_v35, %v3693_v50  ;;  %v3643_v50 = vld [vmem:[%s7139_s16 + $0x598] sm:$0xff] }
 0x5f1   : > { %6049 = vmatpush1.bf16.msra.mxu1 %v6048_v6  ;;  %6015 = vmatprep.subr.bf16.mxu0 %v6014_v23  ;;  %v3692_v6 = vld [vmem:[%s7139_s16 + $0x720] sm:$0xff]  ;;  %v3710_v23 = vld [vmem:[%s7139_s16 + $0x7b0] sm:$0xff] }
 0x5f2   : > { %6051 = vmatprep.subr.bf16.mxu1 %v6050_v40  ;;  %5111 = vmatprep.mubr.msk.f32.mxu0 %vm3788_vm2, %v8981_v60  ;;  %v3729_v40 = vld [vmem:[%s7139_s16 + $0x848] sm:$0xff]  ;;  %v6036_v36 = vpack.c.bf16 %v3710_v23, %v3692_v6  ;;  %v3660_v23 = vld [vmem:[%s7139_s16 + $0x620] sm:$0xff] }
 0x5f3   : > { %5112 = vmatprep.mubr.msk.f32.mxu1 %vm3788_vm2, %v8981_v60 }
 0x5f4   : > { %6017 = vmatpush1.bf16.msra.mxu0 %v6016_v44  ;;  %v6038_v44 = vpack.c.bf16 %v3747_v14, %v3729_v40  ;;  %v6104_v40 = vpack.c.bf16 %v3678_v16, %v3660_v23 }
 0x5f5   : > { %6053 = vmatpush1.bf16.msra.mxu1 %v6052_v48  ;;  %6019 = vmatprep.subr.bf16.mxu0 %v6018_v20  ;;  %v3728_v48 = vld [vmem:[%s7139_s16 + $0x840] sm:$0xff]  ;;  %v3746_v20 = vld [vmem:[%s7139_s16 + $0x8d0] sm:$0xff] }
 0x5f6   : > { %6055 = vmatprep.subr.bf16.mxu1 %v6054_v52  ;;  %v3765_v52 = vld [vmem:[%s7139_s16 + $0x968] sm:$0xff]  ;;  %v6040_v8 = vpack.c.bf16 %v3746_v20, %v3728_v48  ;;  %v3732_v20 = vld [vmem:[%s7139_s16 + $0x860] sm:$0xff] }
 0x5f8   : > { %6021 = vmatpush1.bf16.msra.mxu0 %v6020_v27  ;;  %v6042_v27 = vpack.c.bf16 %v3783_v3, %v3765_v52  ;;  %v6112_v52 = vpack.c.bf16 %v3750_v38, %v3732_v20 }
 0x5f9   : > { %6057 = vmatpush1.bf16.msra.mxu1 %v6056_v11  ;;  %6023 = vmatprep.subr.bf16.mxu0 %v6022_v43  ;;  %v3764_v11 = vld [vmem:[%s7139_s16 + $0x960] sm:$0xff]  ;;  %v3782_v43 = vld [vmem:[%s7139_s16 + $0x9f0] sm:$0xff] }
 0x5fa   : > { %6059 = vmatprep.subr.bf16.mxu1 %v6058_v49  ;;  %v3481_v49 = vld [vmem:[%s7139_s16 + $0x88] sm:$0xff]  ;;  %v6044_v47 = vpack.c.bf16 %v3782_v43, %v3764_v11 }
 0x5fb   : > { %v6082_v63 = vpack.c.bf16 %v3499_v0, %v3481_v49 }
 0x5fc   : > { %6025 = vmatpush1.bf16.msra.mxu0 %v6024_v62  ;;  %v3498_v62 = vld [vmem:[%s7139_s16 + $0x110] sm:$0xff] }
 0x5fd   : > { %6061 = vmatpush1.bf16.msra.mxu1 %v6060_v5  ;;  %6027 = vmatprep.subr.bf16.mxu0 %v6026_v7  ;;  %v3517_v5 = vld [vmem:[%s7139_s16 + $0x1a8] sm:$0xff]  ;;  %v3535_v7 = vld [vmem:[%s7139_s16 + $0x238] sm:$0xff]  ;;  %v6084_v56 = vpack.c.bf16 %v3498_v62, %v3480_v22 }
 0x5fe   : > { %6063 = vmatprep.subr.bf16.mxu1 %v6062_v45  ;;  %v6086_v53 = vpack.c.bf16 %v3535_v7, %v3517_v5  ;;  %v3534_v45 = vld [vmem:[%s7139_s16 + $0x230] sm:$0xff] }
 0x5ff   : > { %v6088_v51 = vpack.c.bf16 %v3534_v45, %v3516_v39 }
 0x600   : > { %6029 = vmatpush1.bf16.msra.mxu0 %v6028_v58  ;;  %v3570_v58 = vld [vmem:[%s7139_s16 + $0x350] sm:$0xff] }
 0x601   : > { %6065 = vmatpush1.bf16.msra.mxu1 %v6064_v17  ;;  %6031 = vmatprep.subr.bf16.mxu0 %v6030_v21  ;;  %v3589_v17 = vld [vmem:[%s7139_s16 + $0x3e8] sm:$0xff]  ;;  %v3607_v21 = vld [vmem:[%s7139_s16 + $0x478] sm:$0xff]  ;;  %v6092_v32 = vpack.c.bf16 %v3570_v58, %v3552_v26 }
 0x602   : > { %6067 = vmatprep.subr.bf16.mxu1 %v6066_v42  ;;  %v6094_v18 = vpack.c.bf16 %v3607_v21, %v3589_v17  ;;  %v3606_v42 = vld [vmem:[%s7139_s16 + $0x470] sm:$0xff] }
 0x603   : > { %v6096_v35 = vpack.c.bf16 %v3606_v42, %v3588_v10 }
 0x604   : > { %6033 = vmatpush1.bf16.msra.mxu0 %v6032_v34  ;;  %v3661_v34 = vld [vmem:[%s7139_s16 + $0x628] sm:$0xff] }
 0x605   : > { %6069 = vmatpush1.bf16.msra.mxu1 %v6068_v28  ;;  %6035 = vmatprep.subr.bf16.mxu0 %v6034_v24  ;;  %v3679_v28 = vld [vmem:[%s7139_s16 + $0x6b8] sm:$0xff]  ;;  %v6100_v24 = vpack.c.bf16 %v3642_v29, %v3624_v12 }
 0x606   : > { %6071 = vmatprep.subr.bf16.mxu1 %v6070_v19  ;;  %v6102_v6 = vpack.c.bf16 %v3679_v28, %v3661_v34  ;;  %v3697_v19 = vld [vmem:[%s7139_s16 + $0x748] sm:$0xff] }
 0x607   : > { %v6106_v14 = vpack.c.bf16 %v3715_v54, %v3697_v19 }
 0x608   : > { %6037 = vmatpush1.bf16.msra.mxu0 %v6036_v36  ;;  %v3733_v36 = vld [vmem:[%s7139_s16 + $0x868] sm:$0xff] }
 0x609   : > { %6073 = vmatpush1.bf16.msra.mxu1 %v6072_v15  ;;  %6039 = vmatprep.subr.bf16.mxu0 %v6038_v44  ;;  %v3751_v15 = vld [vmem:[%s7139_s16 + $0x8f8] sm:$0xff]  ;;  %v6108_v44 = vpack.c.bf16 %v3714_v55, %v3696_v1 }
 0x60a   : > { %6075 = vmatprep.subr.bf16.mxu1 %v6074_v25  ;;  %v6110_v48 = vpack.c.bf16 %v3751_v15, %v3733_v36  ;;  %v3769_v25 = vld [vmem:[%s7139_s16 + $0x988] sm:$0xff]  ;;  %s9741_s16 = sld [smem:[#allocation22_spill]] }
 0x60b   : > { %v6114_v3 = vpack.c.bf16 %v3787_v57, %v3769_v25 }
 0x60c   : > { %6041 = vmatpush1.bf16.msra.mxu0 %v6040_v8  ;;  %v6116_v8 = vpack.c.bf16 %v3786_v41, %v3768_v2 }
 0x60d   : > { %6077 = vmatpush1.bf16.msra.mxu1 %v6076_v61  ;;  %6043 = vmatprep.subr.bf16.mxu0 %v6042_v27 }
 0x60e   : > { %6079 = vmatprep.subr.bf16.mxu1 %v6078_v31 }
 0x610   : > { %6045 = vmatpush1.bf16.msra.mxu0 %v6044_v47  ;;  %s4799_s23 = smul.u32 18, %s9741_s16 }
 0x611   : > { %6081 = vmatpush1.bf16.msra.mxu1 %v6080_v37  ;;  %6083 = vmatprep.subr.bf16.mxu0 %v6082_v63 }
 0x612   : > { %s4804_s22 = sadd.s32 %s6129_s29, %s4799_s23  ;;  %s4792_s23 = scalar_lea.sflag [#allocation5], %s9746_s30 }
 0x613   : > { %4283 = vmatmul.mubr.f32.vlgmr.msra.gmra.mrb[6].mxu0 %v9011_v30  ;;  %s5114_s13 = sshll.u32 %s4804_s22, 7  ;;  %s6560_s29 = scalar_lea.vmem %s9472_s6, 2304 }
 0x614   : > { %4354 = vmatmul.mubr.f32.vlgmr.msra.gmra.mrb[6].mxu1 %v9011_v30  ;;  %6085 = vmatpush1.bf16.msra.mxu0 %v6084_v56  ;;  %s9470_s16 = scalar_lea.hbm %s9745_s10, %s5114_s13  ;;  %p6561_p13 = scmp.ne.s32.totalorder %s9472_s6, %s6560_s29 }
 0x615   : > { %6087 = vmatprep.subr.bf16.mxu0 %v6086_v53  ;;  %5113 = vmatprep.mubr.msk.f32.mxu0 %vm3788_vm2, %v8981_v60  ;;  %v6098_v60 = vpack.c.bf16 %v3643_v50, %v3625_v9  ;;  %s6736_s22 = smov [#allocation14]  }
 0x616   : > { %p6562_p10 = pnand %p6561_p13, %p9747_p4  ;;  %s6564_s1 = sshll.u32 %s6736_s22, 4  ;;  %s6565_s1 = int_to_ptr.vmem [resolvable:$false] %s6564_s1 }
 0x617   : > { %s6566_s14 = scalar_lea.vmem %s6565_s1, 4608  ;;  %p6567_p7 = scmp.lt.s32.totalorder %s9472_s6, %s6565_s1 }
 0x618   : > { %6089 = vmatpush1.bf16.msra.mxu0 %v6088_v51  ;;  %p6563_p3 = pneg %p6562_p10  ;;  %p6568_p9 = scmp.lt.s32.totalorder %s6566_s14, %s6560_s29 }
 0x619   : > { %6091 = vmatprep.subr.bf16.mxu0 %v6090_v59 }
 0x61a   : > { %p6569_p2 = por %p6568_p9, %p6567_p7 }
 0x61c   : > { %6093 = vmatpush1.bf16.msra.mxu0 %v6092_v32  ;;  %p6570_p6 = pnand %p6569_p2, %p6563_p3 }
 0x61d   : > { %6095 = vmatprep.subr.bf16.mxu0 %v6094_v18 }
 0x620   : > { %6097 = vmatpush1.bf16.msra.mxu0 %v6096_v35 }
 0x621   : > { %6099 = vmatprep.subr.bf16.mxu0 %v6098_v60 }
 0x624   : > { %6101 = vmatpush1.bf16.msra.mxu0 %v6100_v24 }
 0x625   : > { %6103 = vmatprep.subr.bf16.mxu0 %v6102_v6 }
 0x628   : > { %6105 = vmatpush1.bf16.msra.mxu0 %v6104_v40 }
 0x629   : > { %6107 = vmatprep.subr.bf16.mxu0 %v6106_v14 }
 0x62c   : > { %6109 = vmatpush1.bf16.msra.mxu0 %v6108_v44 }
 0x62d   : > { %6111 = vmatprep.subr.bf16.mxu0 %v6110_v48 }
 0x630   : > { %6113 = vmatpush1.bf16.msra.mxu0 %v6112_v52 }
 0x631   : > { %6115 = vmatprep.subr.bf16.mxu0 %v6114_v3 }
 0x634   : > { %6117 = vmatpush1.bf16.msra.mxu0 %v6116_v8 }
 0x637   : > { %4425 = vmatmul.mubr.f32.vlgmr.msra.gmra.mrb[8].mxu0 %v9011_v30 }
 0x67a   : > { %v9276_v61 = vpop.f32.mrb[0].mxu0 }
 0x67b   : > { %v4431_v27 = vrot.slane %v9276_v61, 4  ;;  %v9279_v11 = vpop.f32.mrb[0].mxu1  ;;  %v9281_v43 = vpop.f32.mrb[1].mxu0 }
 0x67c   : > { %v4443_v33 = vrot.slane %v9279_v11, 4  ;;  %v4437_v31 = vrot.slane %v9281_v43, 4  ;;  %v9285_v46 = vpop.f32.mrb[1].mxu1 }
 0x67d   : > { %v4432_v49 = vmax.f32 %v9276_v61, %v4431_v27  ;;  %v4449_v0 = vrot.slane %v9285_v46, 4 }
 0x67e   : > { %v4444_v30 = vmax.f32 %v9279_v11, %v4443_v33  ;;  %v4438_v47 = vmax.f32 %v9281_v43, %v4437_v31 }
 0x67f   : > { %v4433_v37 = vrot.slane %v4432_v49, 2  ;;  %v4450_v63 = vmax.f32 %v9285_v46, %v4449_v0 }
 0x680   : > { %v4445_v22 = vrot.slane %v4444_v30, 2  ;;  %v4439_v62 = vrot.slane %v4438_v47, 2 }
 0x681   : > { %v4434_v5 = vmax.f32 %v4432_v49, %v4433_v37  ;;  %v4451_v7 = vrot.slane %v4450_v63, 2 }
 0x682   : > { %v4446_v56 = vmax.f32 %v4444_v30, %v4445_v22  ;;  %v4440_v53 = vmax.f32 %v4438_v47, %v4439_v62 }
 0x683   : > { %v4435_v39 = vrot.slane %v4434_v5, 1  ;;  %v4452_v45 = vmax.f32 %v4450_v63, %v4451_v7 }
 0x684   : > { %v4447_v4 = vrot.slane %v4446_v56, 1  ;;  %v4441_v13 = vrot.slane %v4440_v53, 1 }
 0x685   : > { %v9292_v51 = vmax.f32 %v4434_v5, %v4435_v39  ;;  %v4453_v59 = vrot.slane %v4452_v45, 1 }
 0x686   : > { %v9294_v26 = vmax.f32 %v4446_v56, %v4447_v4  ;;  %v9296_v58 = vmax.f32 %v4440_v53, %v4441_v13 }
 0x687   : > { %v4539_v17 = vsub.f32 %v9276_v61, %v9292_v51  ;;  %v9300_v21 = vmax.f32 %v4452_v45, %v4453_v59 }
 0x688   : > { %v4541_v32 = vsub.f32 %v9279_v11, %v9294_v26  ;;  %v4540_v18 = vsub.f32 %v9281_v43, %v9296_v58 }
 0x689   : > { %v4557_v10 = vmul.f32 1.442695, %v4539_v17  ;;  %v4542_v42 = vsub.f32 %v9285_v46, %v9300_v21 }
 0x68a   : > { %v4561_v9 = vmul.f32 1.442695, %v4541_v32  ;;  %v4559_v50 = vmul.f32 1.442695, %v4540_v18 }
 0x68b   : > { %6316 = vpow2.f32 %v4557_v10  ;;  %v4563_v35 = vmul.f32 1.442695, %v4542_v42 }
 0x68c   : > { %6318 = vpow2.f32 %v4561_v9 }
 0x68d   : > { %6320 = vpow2.f32 %v4559_v50 }
 0x68e   : > { %6322 = vpow2.f32 %v4563_v35 }
 0x695   : > { %v6317_v60 = vpop.eup %6316 }
 0x696   : > { %v6319_v12 = vpop.eup %6318  ;;  %v4593_v29 = vrot.slane %v6317_v60, 4 }
 0x697   : > { %v6321_v34 = vpop.eup %6320  ;;  %v4605_v28 = vrot.slane %v6319_v12, 4 }
 0x698   : > { %v6323_v24 = vpop.eup %6322  ;;  %v4594_v6 = vadd.f32 %v6317_v60, %v4593_v29  ;;  %v4599_v23 = vrot.slane %v6321_v34, 4 }
 0x699   : > { %v4606_v16 = vadd.f32 %v6319_v12, %v4605_v28  ;;  %v4611_v19 = vrot.slane %v6323_v24, 4 }
 0x69a   : > { %v4595_v54 = vrot.slane %v4594_v6, 2  ;;  %v4600_v40 = vadd.f32 %v6321_v34, %v4599_v23 }
 0x69b   : > { %v4607_v14 = vrot.slane %v4606_v16, 2  ;;  %v4612_v1 = vadd.f32 %v6323_v24, %v4611_v19 }
 0x69c   : > { %v4596_v55 = vadd.f32 %v4595_v54, %v4594_v6  ;;  %v4601_v36 = vrot.slane %v4600_v40, 2 }
 0x69d   : > { %v4608_v15 = vadd.f32 %v4607_v14, %v4606_v16  ;;  %v4613_v44 = vrot.slane %v4612_v1, 2 }
 0x69e   : > { %v4597_v48 = vrot.slane %v4596_v55, 1  ;;  %v4602_v20 = vadd.f32 %v4601_v36, %v4600_v40  ;;  %v9308_v38 = vpop.f32.mrb[2].mxu0 }
 0x69f   : > { %v4609_v25 = vrot.slane %v4608_v15, 1  ;;  %v4614_v57 = vadd.f32 %v4613_v44, %v4612_v1  ;;  %v4455_v52 = vrot.slane %v9308_v38, 4  ;;  %v9311_v3 = vpop.f32.mrb[2].mxu1  ;;  %v9313_v2 = vpop.f32.mrb[3].mxu0 }
 0x6a0   : > { %v4598_v41 = vadd.f32 %v4597_v48, %v4596_v55  ;;  %v4603_v8 = vrot.slane %v4602_v20, 1  ;;  %v4467_v27 = vrot.slane %v9311_v3, 4  ;;  %v4461_v33 = vrot.slane %v9313_v2, 4  ;;  %v9317_v31 = vpop.f32.mrb[3].mxu1 }
 0x6a1   : > { %v4610_v49 = vadd.f32 %v4609_v25, %v4608_v15  ;;  %v4615_v0 = vrot.slane %v4614_v57, 1  ;;  %v4456_v30 = vmax.f32 %v9308_v38, %v4455_v52  ;;  %v4473_v47 = vrot.slane %v9317_v31, 4 }
 0x6a2   : > { %6324 = vlog2.f32 %v4598_v41  ;;  %v4604_v37 = vadd.f32 %v4603_v8, %v4602_v20  ;;  %v4468_v63 = vmax.f32 %v9311_v3, %v4467_v27  ;;  %v4462_v22 = vmax.f32 %v9313_v2, %v4461_v33 }
 0x6a3   : > { %6326 = vlog2.f32 %v4610_v49  ;;  %v4616_v62 = vadd.f32 %v4615_v0, %v4614_v57  ;;  %v4457_v5 = vrot.slane %v4456_v30, 2  ;;  %v4474_v7 = vmax.f32 %v9317_v31, %v4473_v47 }
 0x6a4   : > { %6328 = vlog2.f32 %v4604_v37  ;;  %v4469_v56 = vrot.slane %v4468_v63, 2  ;;  %v4463_v53 = vrot.slane %v4462_v22, 2 }
 0x6a5   : > { %6330 = vlog2.f32 %v4616_v62  ;;  %v4458_v39 = vmax.f32 %v4456_v30, %v4457_v5  ;;  %v4475_v45 = vrot.slane %v4474_v7, 2 }
 0x6a6   : > { %v4470_v4 = vmax.f32 %v4468_v63, %v4469_v56  ;;  %v4464_v13 = vmax.f32 %v4462_v22, %v4463_v53 }
 0x6a7   : > { %v4459_v59 = vrot.slane %v4458_v39, 1  ;;  %v4476_v17 = vmax.f32 %v4474_v7, %v4475_v45 }
 0x6a8   : > { %v4471_v32 = vrot.slane %v4470_v4, 1  ;;  %v4465_v18 = vrot.slane %v4464_v13, 1 }
 0x6a9   : > { %v9324_v10 = vmax.f32 %v4458_v39, %v4459_v59  ;;  %v4477_v42 = vrot.slane %v4476_v17, 1 }
 0x6aa   : > { %v9326_v9 = vmax.f32 %v4470_v4, %v4471_v32  ;;  %v9328_v50 = vmax.f32 %v4464_v13, %v4465_v18 }
 0x6ab   : > { %v4543_v35 = vsub.f32 %v9308_v38, %v9324_v10  ;;  %v9332_v60 = vmax.f32 %v4476_v17, %v4477_v42 }
 0x6ac   : > { %v6325_v12 = vpop.eup %6324  ;;  %v4545_v29 = vsub.f32 %v9311_v3, %v9326_v9  ;;  %v4544_v34 = vsub.f32 %v9313_v2, %v9328_v50 }
 0x6ad   : > { %v6327_v28 = vpop.eup %6326  ;;  %v4702_v24 = vmul.f32 0.6931472, %v6325_v12  ;;  %v4565_v6 = vmul.f32 1.442695, %v4543_v35  ;;  %v4546_v23 = vsub.f32 %v9317_v31, %v9332_v60 }
 0x6ae   : > { %v6329_v16 = vpop.eup %6328  ;;  %v4706_v19 = vmul.f32 0.6931472, %v6327_v28  ;;  %v4569_v54 = vmul.f32 1.442695, %v4545_v29  ;;  %v4567_v40 = vmul.f32 1.442695, %v4544_v34 }
 0x6af   : > { %v6331_v14 = vpop.eup %6330  ;;  %v4737_v1 = vadd.f32 %v4702_v24, %v9292_v51  ;;  %v4704_v55 = vmul.f32 0.6931472, %v6329_v16  ;;  %6332 = vpow2.f32 %v4565_v6  ;;  %v4571_v36 = vmul.f32 1.442695, %v4546_v23 }
 0x6b0   : > { %v4739_v15 = vadd.f32 %v4706_v19, %v9294_v26  ;;  %v4708_v44 = vmul.f32 0.6931472, %v6331_v14  ;;  %6334 = vpow2.f32 %v4569_v54 }
 0x6b1   : > { %v4755_v48 = vsub.f32 %v9276_v61, %v4737_v1  ;;  %v4738_v20 = vadd.f32 %v4704_v55, %v9296_v58  ;;  %6336 = vpow2.f32 %v4567_v40 }
 0x6b2   : > { %v4757_v25 = vsub.f32 %v9279_v11, %v4739_v15  ;;  %v4740_v57 = vadd.f32 %v4708_v44, %v9300_v21  ;;  %6338 = vpow2.f32 %v4571_v36 }
 0x6b3   : > { %4773 = vst [vmem:[%s7148_s0] sm:$0xff] %v4755_v48  ;;  %v4756_v51 = vsub.f32 %v9281_v43, %v4738_v20 }
 0x6b4   : > { %4775 = vst [vmem:[%s7148_s0 + $0x10] sm:$0xff] %v4757_v25  ;;  %v4758_v52 = vsub.f32 %v9285_v46, %v4740_v57 }
 0x6b5   : > { %4774 = vst [vmem:[%s7148_s0 + $0x8] sm:$0xff] %v4756_v51 }
 0x6b6   : > { %4776 = vst [vmem:[%s7148_s0 + $0x18] sm:$0xff] %v4758_v52 }
 0x6b9   : > { %v6333_v26 = vpop.eup %6332 }
 0x6ba   : > { %v6335_v41 = vpop.eup %6334  ;;  %v4617_v8 = vrot.slane %v6333_v26, 4 }
 0x6bb   : > { %v6337_v61 = vpop.eup %6336  ;;  %v4629_v27 = vrot.slane %v6335_v41, 4 }
 0x6bc   : > { %v6339_v58 = vpop.eup %6338  ;;  %v4618_v33 = vadd.f32 %v6333_v26, %v4617_v8  ;;  %v4623_v49 = vrot.slane %v6337_v61, 4 }
 0x6bd   : > { %v4630_v11 = vadd.f32 %v6335_v41, %v4629_v27  ;;  %v4635_v0 = vrot.slane %v6339_v58, 4 }
 0x6be   : > { %v4619_v21 = vrot.slane %v4618_v33, 2  ;;  %v4624_v30 = vadd.f32 %v6337_v61, %v4623_v49 }
 0x6bf   : > { %v4631_v47 = vrot.slane %v4630_v11, 2  ;;  %v4636_v37 = vadd.f32 %v6339_v58, %v4635_v0 }
 0x6c0   : > { %v4620_v43 = vadd.f32 %v4619_v21, %v4618_v33  ;;  %v4625_v63 = vrot.slane %v4624_v30, 2 }
 0x6c1   : > { %v4632_v22 = vadd.f32 %v4631_v47, %v4630_v11  ;;  %v4637_v46 = vrot.slane %v4636_v37, 2 }
 0x6c2   : > { %v4621_v62 = vrot.slane %v4620_v43, 1  ;;  %v4626_v5 = vadd.f32 %v4625_v63, %v4624_v30  ;;  %v9352_v7 = vpop.f32.mrb[4].mxu0 }
 0x6c3   : > { %v4633_v56 = vrot.slane %v4632_v22, 1  ;;  %v4638_v53 = vadd.f32 %v4637_v46, %v4636_v37  ;;  %v4479_v39 = vrot.slane %v9352_v7, 4  ;;  %v9355_v45 = vpop.f32.mrb[4].mxu1  ;;  %v9357_v4 = vpop.f32.mrb[5].mxu0 }
 0x6c4   : > { %v4622_v13 = vadd.f32 %v4621_v62, %v4620_v43  ;;  %v4627_v59 = vrot.slane %v4626_v5, 1  ;;  %v4491_v17 = vrot.slane %v9355_v45, 4  ;;  %v4485_v32 = vrot.slane %v9357_v4, 4  ;;  %v9361_v18 = vpop.f32.mrb[5].mxu1 }
 0x6c5   : > { %v4634_v42 = vadd.f32 %v4633_v56, %v4632_v22  ;;  %v4639_v35 = vrot.slane %v4638_v53, 1  ;;  %v4480_v12 = vmax.f32 %v9352_v7, %v4479_v39  ;;  %v4497_v29 = vrot.slane %v9361_v18, 4 }
 0x6c6   : > { %6340 = vlog2.f32 %v4622_v13  ;;  %v4628_v34 = vadd.f32 %v4627_v59, %v4626_v5  ;;  %v4492_v28 = vmax.f32 %v9355_v45, %v4491_v17  ;;  %v4486_v24 = vmax.f32 %v9357_v4, %v4485_v32 }
 0x6c7   : > { %6342 = vlog2.f32 %v4634_v42  ;;  %v4640_v6 = vadd.f32 %v4639_v35, %v4638_v53  ;;  %v4481_v23 = vrot.slane %v4480_v12, 2  ;;  %v4498_v16 = vmax.f32 %v9361_v18, %v4497_v29 }
 0x6c8   : > { %6344 = vlog2.f32 %v4628_v34  ;;  %v4493_v19 = vrot.slane %v4492_v28, 2  ;;  %v4487_v54 = vrot.slane %v4486_v24, 2 }
 0x6c9   : > { %6346 = vlog2.f32 %v4640_v6  ;;  %v4482_v40 = vmax.f32 %v4480_v12, %v4481_v23  ;;  %v4499_v14 = vrot.slane %v4498_v16, 2 }
 0x6ca   : > { %v4494_v1 = vmax.f32 %v4492_v28, %v4493_v19  ;;  %v4488_v55 = vmax.f32 %v4486_v24, %v4487_v54 }
 0x6cb   : > { %v4483_v36 = vrot.slane %v4482_v40, 1  ;;  %v4500_v15 = vmax.f32 %v4498_v16, %v4499_v14 }
 0x6cc   : > { %v4495_v44 = vrot.slane %v4494_v1, 1  ;;  %v4489_v48 = vrot.slane %v4488_v55, 1 }
 0x6cd   : > { %v9368_v20 = vmax.f32 %v4482_v40, %v4483_v36  ;;  %v4501_v25 = vrot.slane %v4500_v15, 1 }
 0x6ce   : > { %v9370_v57 = vmax.f32 %v4494_v1, %v4495_v44  ;;  %v9372_v51 = vmax.f32 %v4488_v55, %v4489_v48 }
 0x6cf   : > { %v4547_v52 = vsub.f32 %v9352_v7, %v9368_v20  ;;  %v9376_v26 = vmax.f32 %v4500_v15, %v4501_v25 }
 0x6d0   : > { %v6341_v41 = vpop.eup %6340  ;;  %v4549_v8 = vsub.f32 %v9355_v45, %v9370_v57  ;;  %v4548_v61 = vsub.f32 %v9357_v4, %v9372_v51 }
 0x6d1   : > { %v6343_v27 = vpop.eup %6342  ;;  %v4710_v58 = vmul.f32 0.6931472, %v6341_v41  ;;  %v4573_v33 = vmul.f32 1.442695, %v4547_v52  ;;  %v4550_v49 = vsub.f32 %v9361_v18, %v9376_v26 }
 0x6d2   : > { %v6345_v11 = vpop.eup %6344  ;;  %v4714_v0 = vmul.f32 0.6931472, %v6343_v27  ;;  %v4577_v21 = vmul.f32 1.442695, %v4549_v8  ;;  %v4575_v30 = vmul.f32 1.442695, %v4548_v61 }
 0x6d3   : > { %v6347_v47 = vpop.eup %6346  ;;  %v4741_v37 = vadd.f32 %v4710_v58, %v9324_v10  ;;  %v4712_v43 = vmul.f32 0.6931472, %v6345_v11  ;;  %6348 = vpow2.f32 %v4573_v33  ;;  %v4579_v63 = vmul.f32 1.442695, %v4550_v49 }
 0x6d4   : > { %v4743_v22 = vadd.f32 %v4714_v0, %v9326_v9  ;;  %v4716_v46 = vmul.f32 0.6931472, %v6347_v47  ;;  %6350 = vpow2.f32 %v4577_v21 }
 0x6d5   : > { %v4759_v62 = vsub.f32 %v9308_v38, %v4741_v37  ;;  %v4742_v5 = vadd.f32 %v4712_v43, %v9328_v50  ;;  %6352 = vpow2.f32 %v4575_v30 }
 0x6d6   : > { %v4761_v56 = vsub.f32 %v9311_v3, %v4743_v22  ;;  %v4744_v53 = vadd.f32 %v4716_v46, %v9332_v60  ;;  %6354 = vpow2.f32 %v4579_v63 }
 0x6d7   : > { %4777 = vst [vmem:[%s7148_s0 + $0x20] sm:$0xff] %v4759_v62  ;;  %v4760_v10 = vsub.f32 %v9313_v2, %v4742_v5 }
 0x6d8   : > { %4779 = vst [vmem:[%s7148_s0 + $0x30] sm:$0xff] %v4761_v56  ;;  %v4762_v39 = vsub.f32 %v9317_v31, %v4744_v53 }
 0x6d9   : > { %4778 = vst [vmem:[%s7148_s0 + $0x28] sm:$0xff] %v4760_v10 }
 0x6da   : > { %4780 = vst [vmem:[%s7148_s0 + $0x38] sm:$0xff] %v4762_v39 }
 0x6dd   : > { %v6349_v9 = vpop.eup %6348 }
 0x6de   : > { %v6351_v13 = vpop.eup %6350  ;;  %v4641_v59 = vrot.slane %v6349_v9, 4 }
 0x6df   : > { %v6353_v38 = vpop.eup %6352  ;;  %v4653_v17 = vrot.slane %v6351_v13, 4 }
 0x6e0   : > { %v6355_v50 = vpop.eup %6354  ;;  %v4642_v32 = vadd.f32 %v6349_v9, %v4641_v59  ;;  %v4647_v42 = vrot.slane %v6353_v38, 4 }
 0x6e1   : > { %v4654_v3 = vadd.f32 %v6351_v13, %v4653_v17  ;;  %v4659_v35 = vrot.slane %v6355_v50, 4 }
 0x6e2   : > { %v4643_v60 = vrot.slane %v4642_v32, 2  ;;  %v4648_v12 = vadd.f32 %v6353_v38, %v4647_v42 }
 0x6e3   : > { %v4655_v29 = vrot.slane %v4654_v3, 2  ;;  %v4660_v34 = vadd.f32 %v6355_v50, %v4659_v35 }
 0x6e4   : > { %v4644_v2 = vadd.f32 %v4643_v60, %v4642_v32  ;;  %v4649_v28 = vrot.slane %v4648_v12, 2 }
 0x6e5   : > { %v4656_v24 = vadd.f32 %v4655_v29, %v4654_v3  ;;  %v4661_v31 = vrot.slane %v4660_v34, 2 }
 0x6e6   : > { %v4645_v6 = vrot.slane %v4644_v2, 1  ;;  %v4650_v23 = vadd.f32 %v4649_v28, %v4648_v12  ;;  %v9396_v16 = vpop.f32.mrb[6].mxu0 }
 0x6e7   : > { %v4657_v19 = vrot.slane %v4656_v24, 1  ;;  %v4662_v54 = vadd.f32 %v4661_v31, %v4660_v34  ;;  %v4503_v40 = vrot.slane %v9396_v16, 4  ;;  %v9399_v14 = vpop.f32.mrb[6].mxu1  ;;  %v9401_v1 = vpop.f32.mrb[7].mxu0 }
 0x6e8   : > { %v4646_v55 = vadd.f32 %v4645_v6, %v4644_v2  ;;  %v4651_v36 = vrot.slane %v4650_v23, 1  ;;  %v4515_v15 = vrot.slane %v9399_v14, 4  ;;  %v4509_v44 = vrot.slane %v9401_v1, 4  ;;  %v9405_v48 = vpop.f32.mrb[7].mxu1 }
 0x6e9   : > { %v4658_v25 = vadd.f32 %v4657_v19, %v4656_v24  ;;  %v4663_v52 = vrot.slane %v4662_v54, 1  ;;  %v4504_v41 = vmax.f32 %v9396_v16, %v4503_v40  ;;  %v4521_v8 = vrot.slane %v9405_v48, 4 }
 0x6ea   : > { %6356 = vlog2.f32 %v4646_v55  ;;  %v4652_v61 = vadd.f32 %v4651_v36, %v4650_v23  ;;  %v4516_v27 = vmax.f32 %v9399_v14, %v4515_v15  ;;  %v4510_v58 = vmax.f32 %v9401_v1, %v4509_v44 }
 0x6eb   : > { %6358 = vlog2.f32 %v4658_v25  ;;  %v4664_v33 = vadd.f32 %v4663_v52, %v4662_v54  ;;  %v4505_v49 = vrot.slane %v4504_v41, 2  ;;  %v4522_v11 = vmax.f32 %v9405_v48, %v4521_v8 }
 0x6ec   : > { %6360 = vlog2.f32 %v4652_v61  ;;  %v4517_v0 = vrot.slane %v4516_v27, 2  ;;  %v4511_v21 = vrot.slane %v4510_v58, 2 }
 0x6ed   : > { %6362 = vlog2.f32 %v4664_v33  ;;  %v4506_v30 = vmax.f32 %v4504_v41, %v4505_v49  ;;  %v4523_v47 = vrot.slane %v4522_v11, 2 }
 0x6ee   : > { %v4518_v37 = vmax.f32 %v4516_v27, %v4517_v0  ;;  %v4512_v43 = vmax.f32 %v4510_v58, %v4511_v21 }
 0x6ef   : > { %v4507_v63 = vrot.slane %v4506_v30, 1  ;;  %v4524_v22 = vmax.f32 %v4522_v11, %v4523_v47 }
 0x6f0   : > { %v4519_v46 = vrot.slane %v4518_v37, 1  ;;  %v4513_v62 = vrot.slane %v4512_v43, 1 }
 0x6f1   : > { %v9412_v5 = vmax.f32 %v4506_v30, %v4507_v63  ;;  %v4525_v56 = vrot.slane %v4524_v22, 1 }
 0x6f2   : > { %v9414_v53 = vmax.f32 %v4518_v37, %v4519_v46  ;;  %v9416_v10 = vmax.f32 %v4512_v43, %v4513_v62 }
 0x6f3   : > { %v4551_v39 = vsub.f32 %v9396_v16, %v9412_v5  ;;  %v9420_v9 = vmax.f32 %v4524_v22, %v4525_v56 }
 0x6f4   : > { %v6357_v13 = vpop.eup %6356  ;;  %v4553_v59 = vsub.f32 %v9399_v14, %v9414_v53  ;;  %v4552_v38 = vsub.f32 %v9401_v1, %v9416_v10 }
 0x6f5   : > { %v6359_v17 = vpop.eup %6358  ;;  %v4718_v50 = vmul.f32 0.6931472, %v6357_v13  ;;  %v4581_v32 = vmul.f32 1.442695, %v4551_v39  ;;  %v4554_v42 = vsub.f32 %v9405_v48, %v9420_v9 }
 0x6f6   : > { %v6361_v3 = vpop.eup %6360  ;;  %v4722_v35 = vmul.f32 0.6931472, %v6359_v17  ;;  %v4585_v60 = vmul.f32 1.442695, %v4553_v59  ;;  %v4583_v12 = vmul.f32 1.442695, %v4552_v38 }
 0x6f7   : > { %v6363_v29 = vpop.eup %6362  ;;  %v4745_v34 = vadd.f32 %v4718_v50, %v9368_v20  ;;  %v4720_v2 = vmul.f32 0.6931472, %v6361_v3  ;;  %6364 = vpow2.f32 %v4581_v32  ;;  %v4587_v28 = vmul.f32 1.442695, %v4554_v42 }
 0x6f8   : > { %v4747_v24 = vadd.f32 %v4722_v35, %v9370_v57  ;;  %v4724_v31 = vmul.f32 0.6931472, %v6363_v29  ;;  %6366 = vpow2.f32 %v4585_v60 }
 0x6f9   : > { %v4763_v6 = vsub.f32 %v9352_v7, %v4745_v34  ;;  %v4746_v23 = vadd.f32 %v4720_v2, %v9372_v51  ;;  %6368 = vpow2.f32 %v4583_v12 }
 0x6fa   : > { %v4765_v19 = vsub.f32 %v9355_v45, %v4747_v24  ;;  %v4748_v54 = vadd.f32 %v4724_v31, %v9376_v26  ;;  %6370 = vpow2.f32 %v4587_v28 }
 0x6fb   : > { %4781 = vst [vmem:[%s7148_s0 + $0x40] sm:$0xff] %v4763_v6  ;;  %v4764_v20 = vsub.f32 %v9357_v4, %v4746_v23 }
 0x6fc   : > { %4783 = vst [vmem:[%s7148_s0 + $0x50] sm:$0xff] %v4765_v19  ;;  %v4766_v40 = vsub.f32 %v9361_v18, %v4748_v54 }
 0x6fd   : > { %4782 = vst [vmem:[%s7148_s0 + $0x48] sm:$0xff] %v4764_v20 }
 0x6fe   : > { %4784 = vst [vmem:[%s7148_s0 + $0x58] sm:$0xff] %v4766_v40 }
 0x701   : > { %v6365_v57 = vpop.eup %6364 }
 0x702   : > { %v6367_v55 = vpop.eup %6366  ;;  %v4665_v36 = vrot.slane %v6365_v57, 4 }
 0x703   : > { %v6369_v7 = vpop.eup %6368  ;;  %v4677_v15 = vrot.slane %v6367_v55, 4 }
 0x704   : > { %v6371_v51 = vpop.eup %6370  ;;  %v4666_v44 = vadd.f32 %v6365_v57, %v4665_v36  ;;  %v4671_v25 = vrot.slane %v6369_v7, 4 }
 0x705   : > { %v4678_v45 = vadd.f32 %v6367_v55, %v4677_v15  ;;  %v4683_v52 = vrot.slane %v6371_v51, 4 }
 0x706   : > { %v4667_v26 = vrot.slane %v4666_v44, 2  ;;  %v4672_v41 = vadd.f32 %v6369_v7, %v4671_v25 }
 0x707   : > { %v4679_v8 = vrot.slane %v4678_v45, 2  ;;  %v4684_v61 = vadd.f32 %v6371_v51, %v4683_v52 }
 0x708   : > { %v4668_v4 = vadd.f32 %v4667_v26, %v4666_v44  ;;  %v4673_v27 = vrot.slane %v4672_v41, 2 }
 0x709   : > { %v4680_v58 = vadd.f32 %v4679_v8, %v4678_v45  ;;  %v4685_v18 = vrot.slane %v4684_v61, 2 }
 0x70a   : > { %v4669_v33 = vrot.slane %v4668_v4, 1  ;;  %v4674_v49 = vadd.f32 %v4673_v27, %v4672_v41  ;;  %v9440_v11 = vpop.f32.mrb[8].mxu0 }
 0x70b   : > { %v4681_v0 = vrot.slane %v4680_v58, 1  ;;  %v4686_v21 = vadd.f32 %v4685_v18, %v4684_v61  ;;  %v4527_v30 = vrot.slane %v9440_v11, 4  ;;  %v9443_v47 = vpop.f32.mrb[9].mxu0 }
 0x70c   : > { %v4670_v37 = vadd.f32 %v4669_v33, %v4668_v4  ;;  %v4675_v43 = vrot.slane %v4674_v49, 1  ;;  %v4533_v63 = vrot.slane %v9443_v47, 4 }
 0x70d   : > { %v4682_v22 = vadd.f32 %v4681_v0, %v4680_v58  ;;  %v4687_v46 = vrot.slane %v4686_v21, 1  ;;  %v4528_v62 = vmax.f32 %v9440_v11, %v4527_v30 }
 0x70e   : > { %6372 = vlog2.f32 %v4670_v37  ;;  %v4676_v56 = vadd.f32 %v4675_v43, %v4674_v49  ;;  %v4534_v39 = vmax.f32 %v9443_v47, %v4533_v63 }
 0x70f   : > { %6374 = vlog2.f32 %v4682_v22  ;;  %v4688_v13 = vadd.f32 %v4687_v46, %v4686_v21  ;;  %v4529_v59 = vrot.slane %v4528_v62, 2 }
 0x710   : > { %6376 = vlog2.f32 %v4676_v56  ;;  %v4535_v38 = vrot.slane %v4534_v39, 2 }
 0x711   : > { %6378 = vlog2.f32 %v4688_v13  ;;  %v4530_v17 = vmax.f32 %v4528_v62, %v4529_v59 }
 0x712   : > { %v4536_v50 = vmax.f32 %v4534_v39, %v4535_v38 }
 0x713   : > { %v4531_v32 = vrot.slane %v4530_v17, 1 }
 0x714   : > { %v4537_v42 = vrot.slane %v4536_v50, 1 }
 0x715   : > { %v4532_v3 = vmax.f32 %v4530_v17, %v4531_v32 }
 0x716   : > { %v4538_v35 = vmax.f32 %v4536_v50, %v4537_v42 }
 0x717   : > { %v4555_v60 = vsub.f32 %v9440_v11, %v4532_v3 }
 0x718   : > { %v6373_v12 = vpop.eup %6372  ;;  %v4556_v29 = vsub.f32 %v9443_v47, %v4538_v35 }
 0x719   : > { %v6375_v34 = vpop.eup %6374  ;;  %v4726_v2 = vmul.f32 0.6931472, %v6373_v12  ;;  %v4589_v28 = vmul.f32 1.442695, %v4555_v60 }
 0x71a   : > { %v6377_v24 = vpop.eup %6376  ;;  %v4730_v31 = vmul.f32 0.6931472, %v6375_v34  ;;  %v4591_v6 = vmul.f32 1.442695, %v4556_v29 }
 0x71b   : > { %v6379_v23 = vpop.eup %6378  ;;  %v4749_v19 = vadd.f32 %v4726_v2, %v9412_v5  ;;  %v4728_v54 = vmul.f32 0.6931472, %v6377_v24  ;;  %6380 = vpow2.f32 %v4589_v28 }
 0x71c   : > { %v4751_v20 = vadd.f32 %v4730_v31, %v9414_v53  ;;  %v4732_v40 = vmul.f32 0.6931472, %v6379_v23  ;;  %6382 = vpow2.f32 %v4591_v6 }
 0x71d   : > { %v4767_v57 = vsub.f32 %v9396_v16, %v4749_v19  ;;  %v4750_v55 = vadd.f32 %v4728_v54, %v9416_v10 }
 0x71e   : > { %v4769_v36 = vsub.f32 %v9399_v14, %v4751_v20  ;;  %v4752_v7 = vadd.f32 %v4732_v40, %v9420_v9 }
 0x71f   : > { %4785 = vst [vmem:[%s7148_s0 + $0x60] sm:$0xff] %v4767_v57  ;;  %v4768_v15 = vsub.f32 %v9401_v1, %v4750_v55 }
 0x720   : > { %4787 = vst [vmem:[%s7148_s0 + $0x70] sm:$0xff] %v4769_v36  ;;  %v4770_v5 = vsub.f32 %v9405_v48, %v4752_v7 }
 0x721   : > { %4786 = vst [vmem:[%s7148_s0 + $0x68] sm:$0xff] %v4768_v15 }
 0x722   : > { %4788 = vst [vmem:[%s7148_s0 + $0x78] sm:$0xff] %v4770_v5 }
 0x725   : > { %v6381_v51 = vpop.eup %6380 }
 0x726   : > { %v6383_v53 = vpop.eup %6382  ;;  %v4689_v44 = vrot.slane %v6381_v51, 4 }
 0x727   : > { %v4695_v16 = vrot.slane %v6383_v53, 4 }
 0x728   : > { %v4690_v25 = vadd.f32 %v6381_v51, %v4689_v44 }
 0x729   : > { %v4696_v10 = vadd.f32 %v6383_v53, %v4695_v16 }
 0x72a   : > { %v4691_v45 = vrot.slane %v4690_v25, 2 }
 0x72b   : > { %v4697_v14 = vrot.slane %v4696_v10, 2 }
 0x72c   : > { %v4692_v52 = vadd.f32 %v4691_v45, %v4690_v25 }
 0x72d   : > { %v4698_v9 = vadd.f32 %v4697_v14, %v4696_v10 }
 0x72e   : > { %v4693_v26 = vrot.slane %v4692_v52, 1 }
 0x72f   : > { %v4699_v1 = vrot.slane %v4698_v9, 1 }
 0x730   : > { %v4694_v41 = vadd.f32 %v4693_v26, %v4692_v52 }
 0x731   : > { %v4700_v8 = vadd.f32 %v4699_v1, %v4698_v9 }
 0x732   : > { %6384 = vlog2.f32 %v4694_v41 }
 0x733   : > { %6386 = vlog2.f32 %v4700_v8 }
 0x73c   : > { %v6385_v48 = vpop.eup %6384 }
 0x73d   : > { %v6387_v61 = vpop.eup %6386  ;;  %v4734_v4 = vmul.f32 0.6931472, %v6385_v48 }
 0x73e   : > { %v4736_v27 = vmul.f32 0.6931472, %v6387_v61 }
 0x73f   : > { %v4753_v58 = vadd.f32 %v4734_v4, %v4532_v3 }
 0x740   : > { %v4754_v18 = vadd.f32 %v4736_v27, %v4538_v35 }
 0x741   : > { %v4771_v33 = vsub.f32 %v9440_v11, %v4753_v58 }
 0x742   : > { %v4772_v49 = vsub.f32 %v9443_v47, %v4754_v18 }
 0x743   : > { %4789 = vst [vmem:[%s7148_s0 + $0x80] sm:$0xff] %v4771_v33 }
 0x744   : > { %4790 = vst [vmem:[%s7148_s0 + $0x88] sm:$0xff] %v4772_v49 }
 0x745   : > { %6573 = shalt.err (!%p6570_p6)
}
 0x746   : > { %s6574_s0 = scalar_lea.hbm %s9470_s16, 2304  ;;  %s6578_s5 = scalar_lea.hbm %s9745_s10, 18432 }
 0x747   : > { %p6575_p5 = scmp.ne.s32.totalorder %s9470_s16, %s6574_s0  ;;  %p6579_p0 = scmp.lt.u32.totalorder %s9470_s16, %s9745_s10 }
 0x748   : > { %p6580_p1 = scmp.lt.u32.totalorder %s6578_s5, %s6574_s0  ;;  %p6582_p13 = scmp.lt.u32.totalorder %s6574_s0, %s9470_s16 }
 0x749   : > { %p6576_p8 = pnand %p6575_p5, %p9747_p4 }
 0x74a   : > { %p6581_p11 = por %p6580_p1, %p6579_p0 }
 0x74b   : > { %p6577_p12 = pneg %p6576_p8 }
 0x74c   : > { %p6583_p10 = por %p6582_p13, %p6581_p11 }
 0x74e   : > { %p6584_p3 = pnand %p6583_p10, %p6577_p12 }
 0x750   : > { %6587 = shalt.err (!%p6584_p3)
}
 0x751   : > { %6150 = dma.vmem_to_hbm [thread:$0]  (%p9747_p4), %s9472_s6, 2304, %s9470_s16, %s4792_s23  }
 0x752 PF: > { %s9748_s29 = sld [smem:[#allocation20_spill]]  ;;  %s9749_s22 = sld [smem:[#allocation26_spill]] }
 0x753   : > { %p6185_p7 = scmp.ge.s32.totalorder %s6718_s26, 2 }
 0x758   : > { %s4820_s14 = sand.u32 1, %s9748_s29   ;;  %p9750_p9 = scmp.ne.s32.totalorder %s9749_s22, 0 }
 0x759   : > { %s4821_s2 = scalar_lea.sflag [#allocation5], %s4820_s14 }
 0x75a   : > { %p6173_p2 = pnand %p6185_p7, %p9750_p9 }
 0x75c   : > { %6661 = dma.done.wait (!%p6173_p2), %s4821_s2, 2304  }
 0x75d   : > { %6663 = vsyncadd (!%p6173_p2), %s4821_s2, 4294964992  ;;  %s31_s26 = sadd.s32 1, %s6718_s26   ;;  %s9752_s13 = sld [smem:[#allocation21_spill]] }
 0x75e   : > { %p9504_p6 = scmp.ge.s32.totalorder %s31_s26, 10   ;;  %s9753_s14 = smov %s6674_s15 }
 0x75f   : > { %s9754_s15 = smov %s7084_s3  ;;  %s9755_s16 = smov %s6682_s17 }
 0x760   : > { %s9756_s17 = smov %s6686_s18  ;;  %s9757_s18 = smov %s7073_s11 }
 0x761   : > { %s9758_s19 = smov %s6694_s20  ;;  %s9759_s20 = smov %s6698_s21 }
 0x762   : > { %s9760_s21 = smov %s7081_s8  ;;  %s9761_s22 = smov %s6710_s24 }
 0x763   : > { %s9762_s23 = smov %s6714_s25  ;;  %s9763_s24 = smov %s9766_s12 }
 0x764   : > { %s9764_s25 = smov %s9770_s27  ;;  %30 = sbr.rel (!%p9504_p6) target bundleno = 24 (0x18), region = 138 }
 0x76b   :  { %4826 = vsyncpa [#allocation4], 1 }
 0x76c   :  { %4828 = vsyncpa [#allocation4 + $0x1], 1 }
 0x76d   :  { %4829 = vsyncpa [#allocation7], 1 }
 0x76e   :  { %4830 = vsyncpa [#allocation10], 1 }
 0x76f   :  { %4831 = vsyncpa [#allocation13], 1 }
 0x770   :  { %4833 = vsyncpa [#allocation13 + $0x1], 1 }
 0x771   :  { %4834 = vsyncpa [#allocation5], 1 }
 0x772   :  { %4836 = vsyncpa [#allocation5 + $0x1], 1 }

</bundles_post_ra>
